<compile_context>
chip_gen: v6e
topology: v6e:2x2x1
jax: 0.10.0
libtpu: 0.0.40
codegen_flags: <defaults>
</compile_context>

<pallas_src>
import numpy as np
import jax
import jax.numpy as jnp
from jax.experimental import pallas as pl
from jax.experimental.pallas import tpu as pltpu

LRELU_SLOPE = 0.2
BN_EPS = 1e-5


# ----------------------------- Pallas kernel ------------------------------- #

def _conv_taps(a_prev, g_ref, w_ref, cout, m_out):
    """acc = sum_t W_t @ (A_prev @ G_t)  ->  (cout, m_out) f32."""
    acc = jnp.zeros((cout, m_out), dtype=jnp.float32)
    for t in range(16):                       # static unroll: leading-dim index
        p = jnp.dot(a_prev, g_ref[t], preferred_element_type=jnp.float32)
        p = p.astype(jnp.bfloat16)            # exact (one-hot selection)
        acc = acc + jnp.dot(w_ref[t], p, preferred_element_type=jnp.float32)
    return acc


def _bn_lrelu(acc, gamma, beta):
    """Training-mode BatchNorm2d (biased batch var) + LeakyReLU(0.2).
    acc: (C, M) f32; gamma/beta: (C, 1) f32.  Single pass + folded scale/shift."""
    inv_m = 1.0 / acc.shape[1]
    mean = jnp.sum(acc, axis=1, keepdims=True) * inv_m
    meansq = jnp.sum(acc * acc, axis=1, keepdims=True) * inv_m
    var = meansq - mean * mean
    scale = gamma * jax.lax.rsqrt(var + BN_EPS)
    shift = beta - mean * scale
    y = acc * scale + shift
    return jnp.maximum(y, LRELU_SLOPE * y)


def _disc32_kernel(p1_ref, w1_ref,
                   g2_ref, w2_ref, gm2_ref, bt2_ref,
                   g3_ref, w3_ref, gm3_ref, bt3_ref,
                   w4_ref, bsel_ref,
                   o_ref):
    # layer1: Conv(Cin->8, 4,2,1) + LeakyReLU   (patches pre-gathered on host)
    y1 = jnp.dot(w1_ref[...], p1_ref[...], preferred_element_type=jnp.float32)
    a1 = jnp.maximum(y1, LRELU_SLOPE * y1).astype(jnp.bfloat16)        # (8, N*256)

    # layer2: Conv(8->16, 4,2,1) + BN + LeakyReLU
    c2, m2 = w2_ref.shape[1], g2_ref.shape[2]
    acc2 = _conv_taps(a1, g2_ref, w2_ref, c2, m2)                      # (16, N*64)
    a2 = _bn_lrelu(acc2, gm2_ref[...], bt2_ref[...]).astype(jnp.bfloat16)

    # layer3: Conv(16->32, 4,2,1) + BN + LeakyReLU
    c3, m3 = w3_ref.shape[1], g3_ref.shape[2]
    acc3 = _conv_taps(a2, g3_ref, w3_ref, c3, m3)                      # (32, N*16)
    a3 = _bn_lrelu(acc3, gm3_ref[...], bt3_ref[...])                   # f32

    # layer4: Conv(32->1, 4,1,0) + Sigmoid, as masked multiply + reductions
    z = a3 * w4_ref[...]                                               # (32, N*16)
    rs = jnp.sum(z, axis=0, keepdims=True)                             # (1, N*16)
    logits = jnp.dot(rs, bsel_ref[...], preferred_element_type=jnp.float32)  # (1, N)
    o_ref[...] = jax.nn.sigmoid(logits)


# --------------------------- pallas_call wrapper --------------------------- #

def _full_spec(shape):
    return pl.BlockSpec(shape, lambda i, _z=(0,) * len(shape): _z)


def fused_discriminator32(p1t, w1m, g2m, w2s, gm2, bt2, g3m, w3s, gm3, bt3,
                          w4big, bsel):
    n = bsel.shape[1]
    args = (p1t, w1m, g2m, w2s, gm2, bt2, g3m, w3s, gm3, bt3, w4big, bsel)
    return pl.pallas_call(
        _disc32_kernel,
        grid=(1,),
        out_shape=jax.ShapeDtypeStruct((1, n), jnp.float32),
        in_specs=[_full_spec(a.shape) for a in args],
        out_specs=_full_spec((1, n)),
        compiler_params=pltpu.CompilerParams(
            dimension_semantics=("arbitrary",)),
    )(*args)


# ------------------------ one-time host-side prep -------------------------- #

def _gather_mats(n, h_in, w_in, oh, ow):
    """One-hot gather matrices G[t] (M_in, M_out) for a 4x4/stride-2/pad-1 conv."""
    m_in, m_out = n * h_in * w_in, n * oh * ow
    g = np.zeros((16, m_in, m_out), np.float32)
    for di in range(4):
        for dj in range(4):
            t = di * 4 + dj
            for b in range(n):
                for i_oh in range(oh):
                    for i_ow in range(ow):
                        j = b * oh * ow + i_oh * ow + i_ow
                        hh = 2 * i_oh + di - 1
                        ww = 2 * i_ow + dj - 1
                        if 0 <= hh < h_in and 0 <= ww < w_in:
                            g[t, b * h_in * w_in + hh * w_in + ww, j] = 1.0
    return g


def _l1_patch_index(n, h):
    """Row-gather indices building layer-1 im2col patches; OOB -> zero row."""
    oh = h // 2
    m1 = n * oh * oh
    idx = np.full((m1, 16), n * h * h, np.int32)
    for b in range(n):
        for i_oh in range(oh):
            for i_ow in range(oh):
                j = b * oh * oh + i_oh * oh + i_ow
                for di in range(4):
                    for dj in range(4):
                        hh = 2 * i_oh + di - 1
                        ww = 2 * i_ow + dj - 1
                        if 0 <= hh < h and 0 <= ww < h:
                            idx[j, di * 4 + dj] = b * h * h + hh * h + ww
    return idx


def prepare_params(w1, w2, gamma2, beta2, w3, gamma3, beta3, w4, n, h=32):
    """Hoisted, one-time re-formatting of PyTorch-layout params (numpy)."""
    w1 = np.asarray(w1); w2 = np.asarray(w2); w3 = np.asarray(w3); w4 = np.asarray(w4)
    bf = jnp.bfloat16

    # layer1 weights: (Co,Ci,4,4) -> (Co, 16*Ci), columns ordered (di,dj,ci)
    w1m = np.transpose(w1, (0, 2, 3, 1)).reshape(w1.shape[0], -1)
    # layers 2/3: per-tap (Cout, Cin) slices, tap-major
    w2s = np.transpose(w2, (2, 3, 0, 1)).reshape(16, w2.shape[0], w2.shape[1])
    w3s = np.transpose(w3, (2, 3, 0, 1)).reshape(16, w3.shape[0], w3.shape[1])

    g2m = _gather_mats(n, h // 2, h // 2, h // 4, h // 4)   # (16, N*256, N*64)
    g3m = _gather_mats(n, h // 4, h // 4, h // 8, h // 8)   # (16, N*64,  N*16)

    # layer4: (1, C4, 4, 4) -> (C4, 16) tiled over batch columns + block selector
    c4 = w4.shape[1]
    w4big = np.tile(w4.reshape(c4, 16), (1, n)).astype(np.float32)     # (32, N*16)
    bsel = np.zeros((n * 16, n), np.float32)
    for b in range(n):
        bsel[b * 16:(b + 1) * 16, b] = 1.0

    return dict(
        idx1=jnp.asarray(_l1_patch_index(n, h)),
        w1m=jnp.asarray(w1m, dtype=bf),
        g2=jnp.asarray(g2m, dtype=bf),
        w2s=jnp.asarray(w2s, dtype=bf),
        gm2=jnp.asarray(np.asarray(gamma2).reshape(-1, 1), dtype=jnp.float32),
        bt2=jnp.asarray(np.asarray(beta2).reshape(-1, 1), dtype=jnp.float32),
        g3=jnp.asarray(g3m, dtype=bf),
        w3s=jnp.asarray(w3s, dtype=bf),
        gm3=jnp.asarray(np.asarray(gamma3).reshape(-1, 1), dtype=jnp.float32),
        bt3=jnp.asarray(np.asarray(beta3).reshape(-1, 1), dtype=jnp.float32),
        w4big=jnp.asarray(w4big),
        bsel=jnp.asarray(bsel),
    )


# -------------------------------- forward ----------------------------------- #

def discriminator32_forward(x, prep):
    """x: (N, C, 32, 32).  N/H are baked into `prep` (gather matrices)."""
    n, c, h, _ = x.shape
    # minimal host glue: build layer-1 im2col patches in (K, M) lane-dense form
    xcl = jnp.transpose(x, (0, 2, 3, 1)).reshape(n * h * h, c)
    xcl = jnp.concatenate([xcl, jnp.zeros((1, c), x.dtype)], axis=0)   # zero pad row
    p1 = jnp.take(xcl, prep["idx1"], axis=0)                 # (M1, 16, C)
    p1t = jnp.transpose(p1, (1, 2, 0)).reshape(16 * c, -1)   # (16*C, M1), rows (di,dj,ci)
    p1t = p1t.astype(jnp.bfloat16)

    out = fused_discriminator32(
        p1t, prep["w1m"],
        prep["g2"], prep["w2s"], prep["gm2"], prep["bt2"],
        prep["g3"], prep["w3s"], prep["gm3"], prep["bt3"],
        prep["w4big"], prep["bsel"])                         # (1, N)
    return out.reshape(n, 1, 1, 1)


# --------------------------------- main ------------------------------------- #

if __name__ == "__main__":
    # Module hyperparameters (spatial size must be 32 so layer4 yields 1x1).
    general_complexity = 8
    image_channels = 3
    packing = 1
    weights_mean, weights_std = 0.0, 0.02
    N = 2
    c_in = image_channels * packing
    gc = general_complexity

    key = jax.random.PRNGKey(0)
    k_x, k1, k2, k3, k4, kg2, kg3 = jax.random.split(key, 7)

    x = jax.random.normal(k_x, (N, c_in, 32, 32), dtype=jnp.float32)

    def normal(k, shape, mean, std):
        return mean + std * jax.random.normal(k, shape, dtype=jnp.float32)

    # weights_init_general: conv weights ~ N(mean, std); BN gamma ~ N(1, std), beta = 0
    w1 = normal(k1, (gc, c_in, 4, 4), weights_mean, weights_std)
    w2 = normal(k2, (gc * 2, gc, 4, 4), weights_mean, weights_std)
    w3 = normal(k3, (gc * 4, gc * 2, 4, 4), weights_mean, weights_std)
    w4 = normal(k4, (1, gc * 4, 4, 4), weights_mean, weights_std)
    gamma2 = normal(kg2, (gc * 2,), 1.0, weights_std)
    beta2 = jnp.zeros((gc * 2,), jnp.float32)
    gamma3 = normal(kg3, (gc * 4,), 1.0, weights_std)
    beta3 = jnp.zeros((gc * 4,), jnp.float32)

    # One-time (hoisted) parameter / gather-matrix preparation.
    prep = prepare_params(w1, w2, gamma2, beta2, w3, gamma3, beta3, w4, n=N, h=32)

    fwd = jax.jit(discriminator32_forward)
    out = jax.block_until_ready(fwd(x, prep))

    assert out.shape == (N, 1, 1, 1), out.shape
    assert bool(jnp.all(jnp.isfinite(out)))
    assert bool(jnp.all((out >= 0.0) & (out <= 1.0)))
    # TODO(synk): self.loss (nn.MSELoss) is defined but unused in forward; not implemented.
    print("KERNEL_OK")
</pallas_src>

<mosaic_0001>
module attributes {stable_mosaic.version = 11 : i64} {
  func.func @_disc32_kernel(%arg0: i32, %arg1: memref<48x512xbf16, #tpu.memory_space<vmem>>, %arg2: memref<8x48xbf16, #tpu.memory_space<vmem>>, %arg3: memref<16x512x128xbf16, #tpu.memory_space<vmem>>, %arg4: memref<16x16x8xbf16, #tpu.memory_space<vmem>>, %arg5: memref<16x1xf32, #tpu.memory_space<vmem>>, %arg6: memref<16x1xf32, #tpu.memory_space<vmem>>, %arg7: memref<16x128x32xbf16, #tpu.memory_space<vmem>>, %arg8: memref<16x32x16xbf16, #tpu.memory_space<vmem>>, %arg9: memref<32x1xf32, #tpu.memory_space<vmem>>, %arg10: memref<32x1xf32, #tpu.memory_space<vmem>>, %arg11: memref<32x32xf32, #tpu.memory_space<vmem>>, %arg12: memref<32x2xf32, #tpu.memory_space<vmem>>, %arg13: memref<1x2xf32, #tpu.memory_space<vmem>>) attributes {dimension_semantics = [#tpu.dimension_semantics<arbitrary>], iteration_bounds = array<i64: 1>, scalar_prefetch = 0 : i64, scratch_operands = 0 : i64, tpu.core_type = #tpu.core_type<tc>, window_params = [{pipeline_mode = #tpu.pipeline_mode<synchronous>, transform_indices = @transform_0, window_bounds = array<i64: 48, 512>}, {pipeline_mode = #tpu.pipeline_mode<synchronous>, transform_indices = @transform_1, window_bounds = array<i64: 8, 48>}, {pipeline_mode = #tpu.pipeline_mode<synchronous>, transform_indices = @transform_2, window_bounds = array<i64: 16, 512, 128>}, {pipeline_mode = #tpu.pipeline_mode<synchronous>, transform_indices = @transform_3, window_bounds = array<i64: 16, 16, 8>}, {pipeline_mode = #tpu.pipeline_mode<synchronous>, transform_indices = @transform_4, window_bounds = array<i64: 16, 1>}, {pipeline_mode = #tpu.pipeline_mode<synchronous>, transform_indices = @transform_5, window_bounds = array<i64: 16, 1>}, {pipeline_mode = #tpu.pipeline_mode<synchronous>, transform_indices = @transform_6, window_bounds = array<i64: 16, 128, 32>}, {pipeline_mode = #tpu.pipeline_mode<synchronous>, transform_indices = @transform_7, window_bounds = array<i64: 16, 32, 16>}, {pipeline_mode = #tpu.pipeline_mode<synchronous>, transform_indices = @transform_8, window_bounds = array<i64: 32, 1>}, {pipeline_mode = #tpu.pipeline_mode<synchronous>, transform_indices = @transform_9, window_bounds = array<i64: 32, 1>}, {pipeline_mode = #tpu.pipeline_mode<synchronous>, transform_indices = @transform_10, window_bounds = array<i64: 32, 32>}, {pipeline_mode = #tpu.pipeline_mode<synchronous>, transform_indices = @transform_11, window_bounds = array<i64: 32, 2>}, {pipeline_mode = #tpu.pipeline_mode<synchronous>, transform_indices = @transform_12, window_bounds = array<i64: 1, 2>}]} {
    %c0 = arith.constant 0 : index
    %c0_0 = arith.constant 0 : index
    %0 = vector.load %arg2[%c0, %c0_0] : memref<8x48xbf16, #tpu.memory_space<vmem>>, vector<8x48xbf16>
    %c0_1 = arith.constant 0 : index
    %c0_2 = arith.constant 0 : index
    %1 = vector.load %arg1[%c0_1, %c0_2] : memref<48x512xbf16, #tpu.memory_space<vmem>>, vector<48x512xbf16>
    %cst = arith.constant dense<0.000000e+00> : vector<8x512xf32>
    %2 = tpu.matmul %0, %1, %cst {dimension_numbers = #tpu.dot_dimension_numbers<[1], [0], [0], [1], [0, 0, 1, 1], [], []>} : vector<8x48xbf16>, vector<48x512xbf16>, vector<8x512xf32> -> vector<8x512xf32>
    %cst_3 = arith.constant 2.000000e-01 : f32
    %3 = vector.broadcast %cst_3 : f32 to vector<8x512xf32>
    %4 = arith.mulf %3, %2 : vector<8x512xf32>
    %5 = arith.maximumf %2, %4 : vector<8x512xf32>
    %6 = arith.truncf %5 : vector<8x512xf32> to vector<8x512xbf16>
    %cst_4 = arith.constant 0.000000e+00 : f32
    %7 = vector.broadcast %cst_4 : f32 to vector<16x128xf32>
    %c0_5 = arith.constant 0 : index
    %c0_6 = arith.constant 0 : index
    %c0_7 = arith.constant 0 : index
    %8 = vector.load %arg3[%c0_5, %c0_6, %c0_7] : memref<16x512x128xbf16, #tpu.memory_space<vmem>>, vector<1x512x128xbf16>
    %9 = vector.shape_cast %8 : vector<1x512x128xbf16> to vector<512x128xbf16>
    %cst_8 = arith.constant dense<0.000000e+00> : vector<8x128xf32>
    %10 = tpu.matmul %6, %9, %cst_8 {dimension_numbers = #tpu.dot_dimension_numbers<[1], [0], [0], [1], [0, 0, 1, 1], [], []>} : vector<8x512xbf16>, vector<512x128xbf16>, vector<8x128xf32> -> vector<8x128xf32>
    %11 = arith.truncf %10 : vector<8x128xf32> to vector<8x128xbf16>
    %c0_9 = arith.constant 0 : index
    %c0_10 = arith.constant 0 : index
    %c0_11 = arith.constant 0 : index
    %12 = vector.load %arg4[%c0_9, %c0_10, %c0_11] : memref<16x16x8xbf16, #tpu.memory_space<vmem>>, vector<1x16x8xbf16>
    %13 = vector.shape_cast %12 : vector<1x16x8xbf16> to vector<16x8xbf16>
    %cst_12 = arith.constant dense<0.000000e+00> : vector<16x128xf32>
    %14 = tpu.matmul %13, %11, %cst_12 {dimension_numbers = #tpu.dot_dimension_numbers<[1], [0], [0], [1], [0, 0, 1, 1], [], []>} : vector<16x8xbf16>, vector<8x128xbf16>, vector<16x128xf32> -> vector<16x128xf32>
    %15 = arith.addf %7, %14 : vector<16x128xf32>
    %c1 = arith.constant 1 : index
    %c0_13 = arith.constant 0 : index
    %c0_14 = arith.constant 0 : index
    %16 = vector.load %arg3[%c1, %c0_13, %c0_14] : memref<16x512x128xbf16, #tpu.memory_space<vmem>>, vector<1x512x128xbf16>
    %17 = vector.shape_cast %16 : vector<1x512x128xbf16> to vector<512x128xbf16>
    %cst_15 = arith.constant dense<0.000000e+00> : vector<8x128xf32>
    %18 = tpu.matmul %6, %17, %cst_15 {dimension_numbers = #tpu.dot_dimension_numbers<[1], [0], [0], [1], [0, 0, 1, 1], [], []>} : vector<8x512xbf16>, vector<512x128xbf16>, vector<8x128xf32> -> vector<8x128xf32>
    %19 = arith.truncf %18 : vector<8x128xf32> to vector<8x128xbf16>
    %c1_16 = arith.constant 1 : index
    %c0_17 = arith.constant 0 : index
    %c0_18 = arith.constant 0 : index
    %20 = vector.load %arg4[%c1_16, %c0_17, %c0_18] : memref<16x16x8xbf16, #tpu.memory_space<vmem>>, vector<1x16x8xbf16>
    %21 = vector.shape_cast %20 : vector<1x16x8xbf16> to vector<16x8xbf16>
    %cst_19 = arith.constant dense<0.000000e+00> : vector<16x128xf32>
    %22 = tpu.matmul %21, %19, %cst_19 {dimension_numbers = #tpu.dot_dimension_numbers<[1], [0], [0], [1], [0, 0, 1, 1], [], []>} : vector<16x8xbf16>, vector<8x128xbf16>, vector<16x128xf32> -> vector<16x128xf32>
    %23 = arith.addf %15, %22 : vector<16x128xf32>
    %c2 = arith.constant 2 : index
    %c0_20 = arith.constant 0 : index
    %c0_21 = arith.constant 0 : index
    %24 = vector.load %arg3[%c2, %c0_20, %c0_21] : memref<16x512x128xbf16, #tpu.memory_space<vmem>>, vector<1x512x128xbf16>
    %25 = vector.shape_cast %24 : vector<1x512x128xbf16> to vector<512x128xbf16>
    %cst_22 = arith.constant dense<0.000000e+00> : vector<8x128xf32>
    %26 = tpu.matmul %6, %25, %cst_22 {dimension_numbers = #tpu.dot_dimension_numbers<[1], [0], [0], [1], [0, 0, 1, 1], [], []>} : vector<8x512xbf16>, vector<512x128xbf16>, vector<8x128xf32> -> vector<8x128xf32>
    %27 = arith.truncf %26 : vector<8x128xf32> to vector<8x128xbf16>
    %c2_23 = arith.constant 2 : index
    %c0_24 = arith.constant 0 : index
    %c0_25 = arith.constant 0 : index
    %28 = vector.load %arg4[%c2_23, %c0_24, %c0_25] : memref<16x16x8xbf16, #tpu.memory_space<vmem>>, vector<1x16x8xbf16>
    %29 = vector.shape_cast %28 : vector<1x16x8xbf16> to vector<16x8xbf16>
    %cst_26 = arith.constant dense<0.000000e+00> : vector<16x128xf32>
    %30 = tpu.matmul %29, %27, %cst_26 {dimension_numbers = #tpu.dot_dimension_numbers<[1], [0], [0], [1], [0, 0, 1, 1], [], []>} : vector<16x8xbf16>, vector<8x128xbf16>, vector<16x128xf32> -> vector<16x128xf32>
    %31 = arith.addf %23, %30 : vector<16x128xf32>
    %c3 = arith.constant 3 : index
    %c0_27 = arith.constant 0 : index
    %c0_28 = arith.constant 0 : index
    %32 = vector.load %arg3[%c3, %c0_27, %c0_28] : memref<16x512x128xbf16, #tpu.memory_space<vmem>>, vector<1x512x128xbf16>
    %33 = vector.shape_cast %32 : vector<1x512x128xbf16> to vector<512x128xbf16>
    %cst_29 = arith.constant dense<0.000000e+00> : vector<8x128xf32>
    %34 = tpu.matmul %6, %33, %cst_29 {dimension_numbers = #tpu.dot_dimension_numbers<[1], [0], [0], [1], [0, 0, 1, 1], [], []>} : vector<8x512xbf16>, vector<512x128xbf16>, vector<8x128xf32> -> vector<8x128xf32>
    %35 = arith.truncf %34 : vector<8x128xf32> to vector<8x128xbf16>
    %c3_30 = arith.constant 3 : index
    %c0_31 = arith.constant 0 : index
    %c0_32 = arith.constant 0 : index
    %36 = vector.load %arg4[%c3_30, %c0_31, %c0_32] : memref<16x16x8xbf16, #tpu.memory_space<vmem>>, vector<1x16x8xbf16>
    %37 = vector.shape_cast %36 : vector<1x16x8xbf16> to vector<16x8xbf16>
    %cst_33 = arith.constant dense<0.000000e+00> : vector<16x128xf32>
    %38 = tpu.matmul %37, %35, %cst_33 {dimension_numbers = #tpu.dot_dimension_numbers<[1], [0], [0], [1], [0, 0, 1, 1], [], []>} : vector<16x8xbf16>, vector<8x128xbf16>, vector<16x128xf32> -> vector<16x128xf32>
    %39 = arith.addf %31, %38 : vector<16x128xf32>
    %c4 = arith.constant 4 : index
    %c0_34 = arith.constant 0 : index
    %c0_35 = arith.constant 0 : index
    %40 = vector.load %arg3[%c4, %c0_34, %c0_35] : memref<16x512x128xbf16, #tpu.memory_space<vmem>>, vector<1x512x128xbf16>
    %41 = vector.shape_cast %40 : vector<1x512x128xbf16> to vector<512x128xbf16>
    %cst_36 = arith.constant dense<0.000000e+00> : vector<8x128xf32>
    %42 = tpu.matmul %6, %41, %cst_36 {dimension_numbers = #tpu.dot_dimension_numbers<[1], [0], [0], [1], [0, 0, 1, 1], [], []>} : vector<8x512xbf16>, vector<512x128xbf16>, vector<8x128xf32> -> vector<8x128xf32>
    %43 = arith.truncf %42 : vector<8x128xf32> to vector<8x128xbf16>
    %c4_37 = arith.constant 4 : index
    %c0_38 = arith.constant 0 : index
    %c0_39 = arith.constant 0 : index
    %44 = vector.load %arg4[%c4_37, %c0_38, %c0_39] : memref<16x16x8xbf16, #tpu.memory_space<vmem>>, vector<1x16x8xbf16>
    %45 = vector.shape_cast %44 : vector<1x16x8xbf16> to vector<16x8xbf16>
    %cst_40 = arith.constant dense<0.000000e+00> : vector<16x128xf32>
    %46 = tpu.matmul %45, %43, %cst_40 {dimension_numbers = #tpu.dot_dimension_numbers<[1], [0], [0], [1], [0, 0, 1, 1], [], []>} : vector<16x8xbf16>, vector<8x128xbf16>, vector<16x128xf32> -> vector<16x128xf32>
    %47 = arith.addf %39, %46 : vector<16x128xf32>
    %c5 = arith.constant 5 : index
    %c0_41 = arith.constant 0 : index
    %c0_42 = arith.constant 0 : index
    %48 = vector.load %arg3[%c5, %c0_41, %c0_42] : memref<16x512x128xbf16, #tpu.memory_space<vmem>>, vector<1x512x128xbf16>
    %49 = vector.shape_cast %48 : vector<1x512x128xbf16> to vector<512x128xbf16>
    %cst_43 = arith.constant dense<0.000000e+00> : vector<8x128xf32>
    %50 = tpu.matmul %6, %49, %cst_43 {dimension_numbers = #tpu.dot_dimension_numbers<[1], [0], [0], [1], [0, 0, 1, 1], [], []>} : vector<8x512xbf16>, vector<512x128xbf16>, vector<8x128xf32> -> vector<8x128xf32>
    %51 = arith.truncf %50 : vector<8x128xf32> to vector<8x128xbf16>
    %c5_44 = arith.constant 5 : index
    %c0_45 = arith.constant 0 : index
    %c0_46 = arith.constant 0 : index
    %52 = vector.load %arg4[%c5_44, %c0_45, %c0_46] : memref<16x16x8xbf16, #tpu.memory_space<vmem>>, vector<1x16x8xbf16>
    %53 = vector.shape_cast %52 : vector<1x16x8xbf16> to vector<16x8xbf16>
    %cst_47 = arith.constant dense<0.000000e+00> : vector<16x128xf32>
    %54 = tpu.matmul %53, %51, %cst_47 {dimension_numbers = #tpu.dot_dimension_numbers<[1], [0], [0], [1], [0, 0, 1, 1], [], []>} : vector<16x8xbf16>, vector<8x128xbf16>, vector<16x128xf32> -> vector<16x128xf32>
    %55 = arith.addf %47, %54 : vector<16x128xf32>
    %c6 = arith.constant 6 : index
    %c0_48 = arith.constant 0 : index
    %c0_49 = arith.constant 0 : index
    %56 = vector.load %arg3[%c6, %c0_48, %c0_49] : memref<16x512x128xbf16, #tpu.memory_space<vmem>>, vector<1x512x128xbf16>
    %57 = vector.shape_cast %56 : vector<1x512x128xbf16> to vector<512x128xbf16>
    %cst_50 = arith.constant dense<0.000000e+00> : vector<8x128xf32>
    %58 = tpu.matmul %6, %57, %cst_50 {dimension_numbers = #tpu.dot_dimension_numbers<[1], [0], [0], [1], [0, 0, 1, 1], [], []>} : vector<8x512xbf16>, vector<512x128xbf16>, vector<8x128xf32> -> vector<8x128xf32>
    %59 = arith.truncf %58 : vector<8x128xf32> to vector<8x128xbf16>
    %c6_51 = arith.constant 6 : index
    %c0_52 = arith.constant 0 : index
    %c0_53 = arith.constant 0 : index
    %60 = vector.load %arg4[%c6_51, %c0_52, %c0_53] : memref<16x16x8xbf16, #tpu.memory_space<vmem>>, vector<1x16x8xbf16>
    %61 = vector.shape_cast %60 : vector<1x16x8xbf16> to vector<16x8xbf16>
    %cst_54 = arith.constant dense<0.000000e+00> : vector<16x128xf32>
    %62 = tpu.matmul %61, %59, %cst_54 {dimension_numbers = #tpu.dot_dimension_numbers<[1], [0], [0], [1], [0, 0, 1, 1], [], []>} : vector<16x8xbf16>, vector<8x128xbf16>, vector<16x128xf32> -> vector<16x128xf32>
    %63 = arith.addf %55, %62 : vector<16x128xf32>
    %c7 = arith.constant 7 : index
    %c0_55 = arith.constant 0 : index
    %c0_56 = arith.constant 0 : index
    %64 = vector.load %arg3[%c7, %c0_55, %c0_56] : memref<16x512x128xbf16, #tpu.memory_space<vmem>>, vector<1x512x128xbf16>
    %65 = vector.shape_cast %64 : vector<1x512x128xbf16> to vector<512x128xbf16>
    %cst_57 = arith.constant dense<0.000000e+00> : vector<8x128xf32>
    %66 = tpu.matmul %6, %65, %cst_57 {dimension_numbers = #tpu.dot_dimension_numbers<[1], [0], [0], [1], [0, 0, 1, 1], [], []>} : vector<8x512xbf16>, vector<512x128xbf16>, vector<8x128xf32> -> vector<8x128xf32>
    %67 = arith.truncf %66 : vector<8x128xf32> to vector<8x128xbf16>
    %c7_58 = arith.constant 7 : index
    %c0_59 = arith.constant 0 : index
    %c0_60 = arith.constant 0 : index
    %68 = vector.load %arg4[%c7_58, %c0_59, %c0_60] : memref<16x16x8xbf16, #tpu.memory_space<vmem>>, vector<1x16x8xbf16>
    %69 = vector.shape_cast %68 : vector<1x16x8xbf16> to vector<16x8xbf16>
    %cst_61 = arith.constant dense<0.000000e+00> : vector<16x128xf32>
    %70 = tpu.matmul %69, %67, %cst_61 {dimension_numbers = #tpu.dot_dimension_numbers<[1], [0], [0], [1], [0, 0, 1, 1], [], []>} : vector<16x8xbf16>, vector<8x128xbf16>, vector<16x128xf32> -> vector<16x128xf32>
    %71 = arith.addf %63, %70 : vector<16x128xf32>
    %c8 = arith.constant 8 : index
    %c0_62 = arith.constant 0 : index
    %c0_63 = arith.constant 0 : index
    %72 = vector.load %arg3[%c8, %c0_62, %c0_63] : memref<16x512x128xbf16, #tpu.memory_space<vmem>>, vector<1x512x128xbf16>
    %73 = vector.shape_cast %72 : vector<1x512x128xbf16> to vector<512x128xbf16>
    %cst_64 = arith.constant dense<0.000000e+00> : vector<8x128xf32>
    %74 = tpu.matmul %6, %73, %cst_64 {dimension_numbers = #tpu.dot_dimension_numbers<[1], [0], [0], [1], [0, 0, 1, 1], [], []>} : vector<8x512xbf16>, vector<512x128xbf16>, vector<8x128xf32> -> vector<8x128xf32>
    %75 = arith.truncf %74 : vector<8x128xf32> to vector<8x128xbf16>
    %c8_65 = arith.constant 8 : index
    %c0_66 = arith.constant 0 : index
    %c0_67 = arith.constant 0 : index
    %76 = vector.load %arg4[%c8_65, %c0_66, %c0_67] : memref<16x16x8xbf16, #tpu.memory_space<vmem>>, vector<1x16x8xbf16>
    %77 = vector.shape_cast %76 : vector<1x16x8xbf16> to vector<16x8xbf16>
    %cst_68 = arith.constant dense<0.000000e+00> : vector<16x128xf32>
    %78 = tpu.matmul %77, %75, %cst_68 {dimension_numbers = #tpu.dot_dimension_numbers<[1], [0], [0], [1], [0, 0, 1, 1], [], []>} : vector<16x8xbf16>, vector<8x128xbf16>, vector<16x128xf32> -> vector<16x128xf32>
    %79 = arith.addf %71, %78 : vector<16x128xf32>
    %c9 = arith.constant 9 : index
    %c0_69 = arith.constant 0 : index
    %c0_70 = arith.constant 0 : index
    %80 = vector.load %arg3[%c9, %c0_69, %c0_70] : memref<16x512x128xbf16, #tpu.memory_space<vmem>>, vector<1x512x128xbf16>
    %81 = vector.shape_cast %80 : vector<1x512x128xbf16> to vector<512x128xbf16>
    %cst_71 = arith.constant dense<0.000000e+00> : vector<8x128xf32>
    %82 = tpu.matmul %6, %81, %cst_71 {dimension_numbers = #tpu.dot_dimension_numbers<[1], [0], [0], [1], [0, 0, 1, 1], [], []>} : vector<8x512xbf16>, vector<512x128xbf16>, vector<8x128xf32> -> vector<8x128xf32>
    %83 = arith.truncf %82 : vector<8x128xf32> to vector<8x128xbf16>
    %c9_72 = arith.constant 9 : index
    %c0_73 = arith.constant 0 : index
    %c0_74 = arith.constant 0 : index
    %84 = vector.load %arg4[%c9_72, %c0_73, %c0_74] : memref<16x16x8xbf16, #tpu.memory_space<vmem>>, vector<1x16x8xbf16>
    %85 = vector.shape_cast %84 : vector<1x16x8xbf16> to vector<16x8xbf16>
    %cst_75 = arith.constant dense<0.000000e+00> : vector<16x128xf32>
    %86 = tpu.matmul %85, %83, %cst_75 {dimension_numbers = #tpu.dot_dimension_numbers<[1], [0], [0], [1], [0, 0, 1, 1], [], []>} : vector<16x8xbf16>, vector<8x128xbf16>, vector<16x128xf32> -> vector<16x128xf32>
    %87 = arith.addf %79, %86 : vector<16x128xf32>
    %c10 = arith.constant 10 : index
    %c0_76 = arith.constant 0 : index
    %c0_77 = arith.constant 0 : index
    %88 = vector.load %arg3[%c10, %c0_76, %c0_77] : memref<16x512x128xbf16, #tpu.memory_space<vmem>>, vector<1x512x128xbf16>
    %89 = vector.shape_cast %88 : vector<1x512x128xbf16> to vector<512x128xbf16>
    %cst_78 = arith.constant dense<0.000000e+00> : vector<8x128xf32>
    %90 = tpu.matmul %6, %89, %cst_78 {dimension_numbers = #tpu.dot_dimension_numbers<[1], [0], [0], [1], [0, 0, 1, 1], [], []>} : vector<8x512xbf16>, vector<512x128xbf16>, vector<8x128xf32> -> vector<8x128xf32>
    %91 = arith.truncf %90 : vector<8x128xf32> to vector<8x128xbf16>
    %c10_79 = arith.constant 10 : index
    %c0_80 = arith.constant 0 : index
    %c0_81 = arith.constant 0 : index
    %92 = vector.load %arg4[%c10_79, %c0_80, %c0_81] : memref<16x16x8xbf16, #tpu.memory_space<vmem>>, vector<1x16x8xbf16>
    %93 = vector.shape_cast %92 : vector<1x16x8xbf16> to vector<16x8xbf16>
    %cst_82 = arith.constant dense<0.000000e+00> : vector<16x128xf32>
    %94 = tpu.matmul %93, %91, %cst_82 {dimension_numbers = #tpu.dot_dimension_numbers<[1], [0], [0], [1], [0, 0, 1, 1], [], []>} : vector<16x8xbf16>, vector<8x128xbf16>, vector<16x128xf32> -> vector<16x128xf32>
    %95 = arith.addf %87, %94 : vector<16x128xf32>
    %c11 = arith.constant 11 : index
    %c0_83 = arith.constant 0 : index
    %c0_84 = arith.constant 0 : index
    %96 = vector.load %arg3[%c11, %c0_83, %c0_84] : memref<16x512x128xbf16, #tpu.memory_space<vmem>>, vector<1x512x128xbf16>
    %97 = vector.shape_cast %96 : vector<1x512x128xbf16> to vector<512x128xbf16>
    %cst_85 = arith.constant dense<0.000000e+00> : vector<8x128xf32>
    %98 = tpu.matmul %6, %97, %cst_85 {dimension_numbers = #tpu.dot_dimension_numbers<[1], [0], [0], [1], [0, 0, 1, 1], [], []>} : vector<8x512xbf16>, vector<512x128xbf16>, vector<8x128xf32> -> vector<8x128xf32>
    %99 = arith.truncf %98 : vector<8x128xf32> to vector<8x128xbf16>
    %c11_86 = arith.constant 11 : index
    %c0_87 = arith.constant 0 : index
    %c0_88 = arith.constant 0 : index
    %100 = vector.load %arg4[%c11_86, %c0_87, %c0_88] : memref<16x16x8xbf16, #tpu.memory_space<vmem>>, vector<1x16x8xbf16>
    %101 = vector.shape_cast %100 : vector<1x16x8xbf16> to vector<16x8xbf16>
    %cst_89 = arith.constant dense<0.000000e+00> : vector<16x128xf32>
    %102 = tpu.matmul %101, %99, %cst_89 {dimension_numbers = #tpu.dot_dimension_numbers<[1], [0], [0], [1], [0, 0, 1, 1], [], []>} : vector<16x8xbf16>, vector<8x128xbf16>, vector<16x128xf32> -> vector<16x128xf32>
    %103 = arith.addf %95, %102 : vector<16x128xf32>
    %c12 = arith.constant 12 : index
    %c0_90 = arith.constant 0 : index
    %c0_91 = arith.constant 0 : index
    %104 = vector.load %arg3[%c12, %c0_90, %c0_91] : memref<16x512x128xbf16, #tpu.memory_space<vmem>>, vector<1x512x128xbf16>
    %105 = vector.shape_cast %104 : vector<1x512x128xbf16> to vector<512x128xbf16>
    %cst_92 = arith.constant dense<0.000000e+00> : vector<8x128xf32>
    %106 = tpu.matmul %6, %105, %cst_92 {dimension_numbers = #tpu.dot_dimension_numbers<[1], [0], [0], [1], [0, 0, 1, 1], [], []>} : vector<8x512xbf16>, vector<512x128xbf16>, vector<8x128xf32> -> vector<8x128xf32>
    %107 = arith.truncf %106 : vector<8x128xf32> to vector<8x128xbf16>
    %c12_93 = arith.constant 12 : index
    %c0_94 = arith.constant 0 : index
    %c0_95 = arith.constant 0 : index
    %108 = vector.load %arg4[%c12_93, %c0_94, %c0_95] : memref<16x16x8xbf16, #tpu.memory_space<vmem>>, vector<1x16x8xbf16>
    %109 = vector.shape_cast %108 : vector<1x16x8xbf16> to vector<16x8xbf16>
    %cst_96 = arith.constant dense<0.000000e+00> : vector<16x128xf32>
    %110 = tpu.matmul %109, %107, %cst_96 {dimension_numbers = #tpu.dot_dimension_numbers<[1], [0], [0], [1], [0, 0, 1, 1], [], []>} : vector<16x8xbf16>, vector<8x128xbf16>, vector<16x128xf32> -> vector<16x128xf32>
    %111 = arith.addf %103, %110 : vector<16x128xf32>
    %c13 = arith.constant 13 : index
    %c0_97 = arith.constant 0 : index
    %c0_98 = arith.constant 0 : index
    %112 = vector.load %arg3[%c13, %c0_97, %c0_98] : memref<16x512x128xbf16, #tpu.memory_space<vmem>>, vector<1x512x128xbf16>
    %113 = vector.shape_cast %112 : vector<1x512x128xbf16> to vector<512x128xbf16>
    %cst_99 = arith.constant dense<0.000000e+00> : vector<8x128xf32>
    %114 = tpu.matmul %6, %113, %cst_99 {dimension_numbers = #tpu.dot_dimension_numbers<[1], [0], [0], [1], [0, 0, 1, 1], [], []>} : vector<8x512xbf16>, vector<512x128xbf16>, vector<8x128xf32> -> vector<8x128xf32>
    %115 = arith.truncf %114 : vector<8x128xf32> to vector<8x128xbf16>
    %c13_100 = arith.constant 13 : index
    %c0_101 = arith.constant 0 : index
    %c0_102 = arith.constant 0 : index
    %116 = vector.load %arg4[%c13_100, %c0_101, %c0_102] : memref<16x16x8xbf16, #tpu.memory_space<vmem>>, vector<1x16x8xbf16>
    %117 = vector.shape_cast %116 : vector<1x16x8xbf16> to vector<16x8xbf16>
    %cst_103 = arith.constant dense<0.000000e+00> : vector<16x128xf32>
    %118 = tpu.matmul %117, %115, %cst_103 {dimension_numbers = #tpu.dot_dimension_numbers<[1], [0], [0], [1], [0, 0, 1, 1], [], []>} : vector<16x8xbf16>, vector<8x128xbf16>, vector<16x128xf32> -> vector<16x128xf32>
    %119 = arith.addf %111, %118 : vector<16x128xf32>
    %c14 = arith.constant 14 : index
    %c0_104 = arith.constant 0 : index
    %c0_105 = arith.constant 0 : index
    %120 = vector.load %arg3[%c14, %c0_104, %c0_105] : memref<16x512x128xbf16, #tpu.memory_space<vmem>>, vector<1x512x128xbf16>
    %121 = vector.shape_cast %120 : vector<1x512x128xbf16> to vector<512x128xbf16>
    %cst_106 = arith.constant dense<0.000000e+00> : vector<8x128xf32>
    %122 = tpu.matmul %6, %121, %cst_106 {dimension_numbers = #tpu.dot_dimension_numbers<[1], [0], [0], [1], [0, 0, 1, 1], [], []>} : vector<8x512xbf16>, vector<512x128xbf16>, vector<8x128xf32> -> vector<8x128xf32>
    %123 = arith.truncf %122 : vector<8x128xf32> to vector<8x128xbf16>
    %c14_107 = arith.constant 14 : index
    %c0_108 = arith.constant 0 : index
    %c0_109 = arith.constant 0 : index
    %124 = vector.load %arg4[%c14_107, %c0_108, %c0_109] : memref<16x16x8xbf16, #tpu.memory_space<vmem>>, vector<1x16x8xbf16>
    %125 = vector.shape_cast %124 : vector<1x16x8xbf16> to vector<16x8xbf16>
    %cst_110 = arith.constant dense<0.000000e+00> : vector<16x128xf32>
    %126 = tpu.matmul %125, %123, %cst_110 {dimension_numbers = #tpu.dot_dimension_numbers<[1], [0], [0], [1], [0, 0, 1, 1], [], []>} : vector<16x8xbf16>, vector<8x128xbf16>, vector<16x128xf32> -> vector<16x128xf32>
    %127 = arith.addf %119, %126 : vector<16x128xf32>
    %c15 = arith.constant 15 : index
    %c0_111 = arith.constant 0 : index
    %c0_112 = arith.constant 0 : index
    %128 = vector.load %arg3[%c15, %c0_111, %c0_112] : memref<16x512x128xbf16, #tpu.memory_space<vmem>>, vector<1x512x128xbf16>
    %129 = vector.shape_cast %128 : vector<1x512x128xbf16> to vector<512x128xbf16>
    %cst_113 = arith.constant dense<0.000000e+00> : vector<8x128xf32>
    %130 = tpu.matmul %6, %129, %cst_113 {dimension_numbers = #tpu.dot_dimension_numbers<[1], [0], [0], [1], [0, 0, 1, 1], [], []>} : vector<8x512xbf16>, vector<512x128xbf16>, vector<8x128xf32> -> vector<8x128xf32>
    %131 = arith.truncf %130 : vector<8x128xf32> to vector<8x128xbf16>
    %c15_114 = arith.constant 15 : index
    %c0_115 = arith.constant 0 : index
    %c0_116 = arith.constant 0 : index
    %132 = vector.load %arg4[%c15_114, %c0_115, %c0_116] : memref<16x16x8xbf16, #tpu.memory_space<vmem>>, vector<1x16x8xbf16>
    %133 = vector.shape_cast %132 : vector<1x16x8xbf16> to vector<16x8xbf16>
    %cst_117 = arith.constant dense<0.000000e+00> : vector<16x128xf32>
    %134 = tpu.matmul %133, %131, %cst_117 {dimension_numbers = #tpu.dot_dimension_numbers<[1], [0], [0], [1], [0, 0, 1, 1], [], []>} : vector<16x8xbf16>, vector<8x128xbf16>, vector<16x128xf32> -> vector<16x128xf32>
    %135 = arith.addf %127, %134 : vector<16x128xf32>
    %c0_118 = arith.constant 0 : index
    %c0_119 = arith.constant 0 : index
    %136 = vector.load %arg5[%c0_118, %c0_119] : memref<16x1xf32, #tpu.memory_space<vmem>>, vector<16x1xf32>
    %c0_120 = arith.constant 0 : index
    %c0_121 = arith.constant 0 : index
    %137 = vector.load %arg6[%c0_120, %c0_121] : memref<16x1xf32, #tpu.memory_space<vmem>>, vector<16x1xf32>
    %cst_122 = arith.constant dense<0.000000e+00> : vector<16xf32>
    %138 = vector.multi_reduction <add>, %135, %cst_122 [1] : vector<16x128xf32> to vector<16xf32>
    %139 = vector.shape_cast %138 : vector<16xf32> to vector<16x1xf32>
    %cst_123 = arith.constant 7.812500e-03 : f32
    %140 = vector.broadcast %cst_123 : f32 to vector<16x1xf32>
    %141 = arith.mulf %139, %140 : vector<16x1xf32>
    %142 = arith.mulf %135, %135 : vector<16x128xf32>
    %cst_124 = arith.constant dense<0.000000e+00> : vector<16xf32>
    %143 = vector.multi_reduction <add>, %142, %cst_124 [1] : vector<16x128xf32> to vector<16xf32>
    %144 = vector.shape_cast %143 : vector<16xf32> to vector<16x1xf32>
    %cst_125 = arith.constant 7.812500e-03 : f32
    %145 = vector.broadcast %cst_125 : f32 to vector<16x1xf32>
    %146 = arith.mulf %144, %145 : vector<16x1xf32>
    %147 = arith.mulf %141, %141 : vector<16x1xf32>
    %148 = arith.subf %146, %147 : vector<16x1xf32>
    %cst_126 = arith.constant 9.99999974E-6 : f32
    %149 = vector.broadcast %cst_126 : f32 to vector<16x1xf32>
    %150 = arith.addf %148, %149 : vector<16x1xf32>
    %151 = math.rsqrt %150 : vector<16x1xf32>
    %152 = arith.mulf %136, %151 : vector<16x1xf32>
    %153 = arith.mulf %141, %152 : vector<16x1xf32>
    %154 = arith.subf %137, %153 : vector<16x1xf32>
    %155 = vector.broadcast %152 : vector<16x1xf32> to vector<16x128xf32>
    %156 = arith.mulf %135, %155 : vector<16x128xf32>
    %157 = vector.broadcast %154 : vector<16x1xf32> to vector<16x128xf32>
    %158 = arith.addf %156, %157 : vector<16x128xf32>
    %cst_127 = arith.constant 2.000000e-01 : f32
    %159 = vector.broadcast %cst_127 : f32 to vector<16x128xf32>
    %160 = arith.mulf %159, %158 : vector<16x128xf32>
    %161 = arith.maximumf %158, %160 : vector<16x128xf32>
    %162 = arith.truncf %161 : vector<16x128xf32> to vector<16x128xbf16>
    %cst_128 = arith.constant 0.000000e+00 : f32
    %163 = vector.broadcast %cst_128 : f32 to vector<32x32xf32>
    %c0_129 = arith.constant 0 : index
    %c0_130 = arith.constant 0 : index
    %c0_131 = arith.constant 0 : index
    %164 = vector.load %arg7[%c0_129, %c0_130, %c0_131] : memref<16x128x32xbf16, #tpu.memory_space<vmem>>, vector<1x128x32xbf16>
    %165 = vector.shape_cast %164 : vector<1x128x32xbf16> to vector<128x32xbf16>
    %cst_132 = arith.constant dense<0.000000e+00> : vector<16x32xf32>
    %166 = tpu.matmul %162, %165, %cst_132 {dimension_numbers = #tpu.dot_dimension_numbers<[1], [0], [0], [1], [0, 0, 1, 1], [], []>} : vector<16x128xbf16>, vector<128x32xbf16>, vector<16x32xf32> -> vector<16x32xf32>
    %167 = arith.truncf %166 : vector<16x32xf32> to vector<16x32xbf16>
    %c0_133 = arith.constant 0 : index
    %c0_134 = arith.constant 0 : index
    %c0_135 = arith.constant 0 : index
    %168 = vector.load %arg8[%c0_133, %c0_134, %c0_135] : memref<16x32x16xbf16, #tpu.memory_space<vmem>>, vector<1x32x16xbf16>
    %169 = vector.shape_cast %168 : vector<1x32x16xbf16> to vector<32x16xbf16>
    %cst_136 = arith.constant dense<0.000000e+00> : vector<32x32xf32>
    %170 = tpu.matmul %169, %167, %cst_136 {dimension_numbers = #tpu.dot_dimension_numbers<[1], [0], [0], [1], [0, 0, 1, 1], [], []>} : vector<32x16xbf16>, vector<16x32xbf16>, vector<32x32xf32> -> vector<32x32xf32>
    %171 = arith.addf %163, %170 : vector<32x32xf32>
    %c1_137 = arith.constant 1 : index
    %c0_138 = arith.constant 0 : index
    %c0_139 = arith.constant 0 : index
    %172 = vector.load %arg7[%c1_137, %c0_138, %c0_139] : memref<16x128x32xbf16, #tpu.memory_space<vmem>>, vector<1x128x32xbf16>
    %173 = vector.shape_cast %172 : vector<1x128x32xbf16> to vector<128x32xbf16>
    %cst_140 = arith.constant dense<0.000000e+00> : vector<16x32xf32>
    %174 = tpu.matmul %162, %173, %cst_140 {dimension_numbers = #tpu.dot_dimension_numbers<[1], [0], [0], [1], [0, 0, 1, 1], [], []>} : vector<16x128xbf16>, vector<128x32xbf16>, vector<16x32xf32> -> vector<16x32xf32>
    %175 = arith.truncf %174 : vector<16x32xf32> to vector<16x32xbf16>
    %c1_141 = arith.constant 1 : index
    %c0_142 = arith.constant 0 : index
    %c0_143 = arith.constant 0 : index
    %176 = vector.load %arg8[%c1_141, %c0_142, %c0_143] : memref<16x32x16xbf16, #tpu.memory_space<vmem>>, vector<1x32x16xbf16>
    %177 = vector.shape_cast %176 : vector<1x32x16xbf16> to vector<32x16xbf16>
    %cst_144 = arith.constant dense<0.000000e+00> : vector<32x32xf32>
    %178 = tpu.matmul %177, %175, %cst_144 {dimension_numbers = #tpu.dot_dimension_numbers<[1], [0], [0], [1], [0, 0, 1, 1], [], []>} : vector<32x16xbf16>, vector<16x32xbf16>, vector<32x32xf32> -> vector<32x32xf32>
    %179 = arith.addf %171, %178 : vector<32x32xf32>
    %c2_145 = arith.constant 2 : index
    %c0_146 = arith.constant 0 : index
    %c0_147 = arith.constant 0 : index
    %180 = vector.load %arg7[%c2_145, %c0_146, %c0_147] : memref<16x128x32xbf16, #tpu.memory_space<vmem>>, vector<1x128x32xbf16>
    %181 = vector.shape_cast %180 : vector<1x128x32xbf16> to vector<128x32xbf16>
    %cst_148 = arith.constant dense<0.000000e+00> : vector<16x32xf32>
    %182 = tpu.matmul %162, %181, %cst_148 {dimension_numbers = #tpu.dot_dimension_numbers<[1], [0], [0], [1], [0, 0, 1, 1], [], []>} : vector<16x128xbf16>, vector<128x32xbf16>, vector<16x32xf32> -> vector<16x32xf32>
    %183 = arith.truncf %182 : vector<16x32xf32> to vector<16x32xbf16>
    %c2_149 = arith.constant 2 : index
    %c0_150 = arith.constant 0 : index
    %c0_151 = arith.constant 0 : index
    %184 = vector.load %arg8[%c2_149, %c0_150, %c0_151] : memref<16x32x16xbf16, #tpu.memory_space<vmem>>, vector<1x32x16xbf16>
    %185 = vector.shape_cast %184 : vector<1x32x16xbf16> to vector<32x16xbf16>
    %cst_152 = arith.constant dense<0.000000e+00> : vector<32x32xf32>
    %186 = tpu.matmul %185, %183, %cst_152 {dimension_numbers = #tpu.dot_dimension_numbers<[1], [0], [0], [1], [0, 0, 1, 1], [], []>} : vector<32x16xbf16>, vector<16x32xbf16>, vector<32x32xf32> -> vector<32x32xf32>
    %187 = arith.addf %179, %186 : vector<32x32xf32>
    %c3_153 = arith.constant 3 : index
    %c0_154 = arith.constant 0 : index
    %c0_155 = arith.constant 0 : index
    %188 = vector.load %arg7[%c3_153, %c0_154, %c0_155] : memref<16x128x32xbf16, #tpu.memory_space<vmem>>, vector<1x128x32xbf16>
    %189 = vector.shape_cast %188 : vector<1x128x32xbf16> to vector<128x32xbf16>
    %cst_156 = arith.constant dense<0.000000e+00> : vector<16x32xf32>
    %190 = tpu.matmul %162, %189, %cst_156 {dimension_numbers = #tpu.dot_dimension_numbers<[1], [0], [0], [1], [0, 0, 1, 1], [], []>} : vector<16x128xbf16>, vector<128x32xbf16>, vector<16x32xf32> -> vector<16x32xf32>
    %191 = arith.truncf %190 : vector<16x32xf32> to vector<16x32xbf16>
    %c3_157 = arith.constant 3 : index
    %c0_158 = arith.constant 0 : index
    %c0_159 = arith.constant 0 : index
    %192 = vector.load %arg8[%c3_157, %c0_158, %c0_159] : memref<16x32x16xbf16, #tpu.memory_space<vmem>>, vector<1x32x16xbf16>
    %193 = vector.shape_cast %192 : vector<1x32x16xbf16> to vector<32x16xbf16>
    %cst_160 = arith.constant dense<0.000000e+00> : vector<32x32xf32>
    %194 = tpu.matmul %193, %191, %cst_160 {dimension_numbers = #tpu.dot_dimension_numbers<[1], [0], [0], [1], [0, 0, 1, 1], [], []>} : vector<32x16xbf16>, vector<16x32xbf16>, vector<32x32xf32> -> vector<32x32xf32>
    %195 = arith.addf %187, %194 : vector<32x32xf32>
    %c4_161 = arith.constant 4 : index
    %c0_162 = arith.constant 0 : index
    %c0_163 = arith.constant 0 : index
    %196 = vector.load %arg7[%c4_161, %c0_162, %c0_163] : memref<16x128x32xbf16, #tpu.memory_space<vmem>>, vector<1x128x32xbf16>
    %197 = vector.shape_cast %196 : vector<1x128x32xbf16> to vector<128x32xbf16>
    %cst_164 = arith.constant dense<0.000000e+00> : vector<16x32xf32>
    %198 = tpu.matmul %162, %197, %cst_164 {dimension_numbers = #tpu.dot_dimension_numbers<[1], [0], [0], [1], [0, 0, 1, 1], [], []>} : vector<16x128xbf16>, vector<128x32xbf16>, vector<16x32xf32> -> vector<16x32xf32>
    %199 = arith.truncf %198 : vector<16x32xf32> to vector<16x32xbf16>
    %c4_165 = arith.constant 4 : index
    %c0_166 = arith.constant 0 : index
    %c0_167 = arith.constant 0 : index
    %200 = vector.load %arg8[%c4_165, %c0_166, %c0_167] : memref<16x32x16xbf16, #tpu.memory_space<vmem>>, vector<1x32x16xbf16>
    %201 = vector.shape_cast %200 : vector<1x32x16xbf16> to vector<32x16xbf16>
    %cst_168 = arith.constant dense<0.000000e+00> : vector<32x32xf32>
    %202 = tpu.matmul %201, %199, %cst_168 {dimension_numbers = #tpu.dot_dimension_numbers<[1], [0], [0], [1], [0, 0, 1, 1], [], []>} : vector<32x16xbf16>, vector<16x32xbf16>, vector<32x32xf32> -> vector<32x32xf32>
    %203 = arith.addf %195, %202 : vector<32x32xf32>
    %c5_169 = arith.constant 5 : index
    %c0_170 = arith.constant 0 : index
    %c0_171 = arith.constant 0 : index
    %204 = vector.load %arg7[%c5_169, %c0_170, %c0_171] : memref<16x128x32xbf16, #tpu.memory_space<vmem>>, vector<1x128x32xbf16>
    %205 = vector.shape_cast %204 : vector<1x128x32xbf16> to vector<128x32xbf16>
    %cst_172 = arith.constant dense<0.000000e+00> : vector<16x32xf32>
    %206 = tpu.matmul %162, %205, %cst_172 {dimension_numbers = #tpu.dot_dimension_numbers<[1], [0], [0], [1], [0, 0, 1, 1], [], []>} : vector<16x128xbf16>, vector<128x32xbf16>, vector<16x32xf32> -> vector<16x32xf32>
    %207 = arith.truncf %206 : vector<16x32xf32> to vector<16x32xbf16>
    %c5_173 = arith.constant 5 : index
    %c0_174 = arith.constant 0 : index
    %c0_175 = arith.constant 0 : index
    %208 = vector.load %arg8[%c5_173, %c0_174, %c0_175] : memref<16x32x16xbf16, #tpu.memory_space<vmem>>, vector<1x32x16xbf16>
    %209 = vector.shape_cast %208 : vector<1x32x16xbf16> to vector<32x16xbf16>
    %cst_176 = arith.constant dense<0.000000e+00> : vector<32x32xf32>
    %210 = tpu.matmul %209, %207, %cst_176 {dimension_numbers = #tpu.dot_dimension_numbers<[1], [0], [0], [1], [0, 0, 1, 1], [], []>} : vector<32x16xbf16>, vector<16x32xbf16>, vector<32x32xf32> -> vector<32x32xf32>
    %211 = arith.addf %203, %210 : vector<32x32xf32>
    %c6_177 = arith.constant 6 : index
    %c0_178 = arith.constant 0 : index
    %c0_179 = arith.constant 0 : index
    %212 = vector.load %arg7[%c6_177, %c0_178, %c0_179] : memref<16x128x32xbf16, #tpu.memory_space<vmem>>, vector<1x128x32xbf16>
    %213 = vector.shape_cast %212 : vector<1x128x32xbf16> to vector<128x32xbf16>
    %cst_180 = arith.constant dense<0.000000e+00> : vector<16x32xf32>
    %214 = tpu.matmul %162, %213, %cst_180 {dimension_numbers = #tpu.dot_dimension_numbers<[1], [0], [0], [1], [0, 0, 1, 1], [], []>} : vector<16x128xbf16>, vector<128x32xbf16>, vector<16x32xf32> -> vector<16x32xf32>
    %215 = arith.truncf %214 : vector<16x32xf32> to vector<16x32xbf16>
    %c6_181 = arith.constant 6 : index
    %c0_182 = arith.constant 0 : index
    %c0_183 = arith.constant 0 : index
    %216 = vector.load %arg8[%c6_181, %c0_182, %c0_183] : memref<16x32x16xbf16, #tpu.memory_space<vmem>>, vector<1x32x16xbf16>
    %217 = vector.shape_cast %216 : vector<1x32x16xbf16> to vector<32x16xbf16>
    %cst_184 = arith.constant dense<0.000000e+00> : vector<32x32xf32>
    %218 = tpu.matmul %217, %215, %cst_184 {dimension_numbers = #tpu.dot_dimension_numbers<[1], [0], [0], [1], [0, 0, 1, 1], [], []>} : vector<32x16xbf16>, vector<16x32xbf16>, vector<32x32xf32> -> vector<32x32xf32>
    %219 = arith.addf %211, %218 : vector<32x32xf32>
    %c7_185 = arith.constant 7 : index
    %c0_186 = arith.constant 0 : index
    %c0_187 = arith.constant 0 : index
    %220 = vector.load %arg7[%c7_185, %c0_186, %c0_187] : memref<16x128x32xbf16, #tpu.memory_space<vmem>>, vector<1x128x32xbf16>
    %221 = vector.shape_cast %220 : vector<1x128x32xbf16> to vector<128x32xbf16>
    %cst_188 = arith.constant dense<0.000000e+00> : vector<16x32xf32>
    %222 = tpu.matmul %162, %221, %cst_188 {dimension_numbers = #tpu.dot_dimension_numbers<[1], [0], [0], [1], [0, 0, 1, 1], [], []>} : vector<16x128xbf16>, vector<128x32xbf16>, vector<16x32xf32> -> vector<16x32xf32>
    %223 = arith.truncf %222 : vector<16x32xf32> to vector<16x32xbf16>
    %c7_189 = arith.constant 7 : index
    %c0_190 = arith.constant 0 : index
    %c0_191 = arith.constant 0 : index
    %224 = vector.load %arg8[%c7_189, %c0_190, %c0_191] : memref<16x32x16xbf16, #tpu.memory_space<vmem>>, vector<1x32x16xbf16>
    %225 = vector.shape_cast %224 : vector<1x32x16xbf16> to vector<32x16xbf16>
    %cst_192 = arith.constant dense<0.000000e+00> : vector<32x32xf32>
    %226 = tpu.matmul %225, %223, %cst_192 {dimension_numbers = #tpu.dot_dimension_numbers<[1], [0], [0], [1], [0, 0, 1, 1], [], []>} : vector<32x16xbf16>, vector<16x32xbf16>, vector<32x32xf32> -> vector<32x32xf32>
    %227 = arith.addf %219, %226 : vector<32x32xf32>
    %c8_193 = arith.constant 8 : index
    %c0_194 = arith.constant 0 : index
    %c0_195 = arith.constant 0 : index
    %228 = vector.load %arg7[%c8_193, %c0_194, %c0_195] : memref<16x128x32xbf16, #tpu.memory_space<vmem>>, vector<1x128x32xbf16>
    %229 = vector.shape_cast %228 : vector<1x128x32xbf16> to vector<128x32xbf16>
    %cst_196 = arith.constant dense<0.000000e+00> : vector<16x32xf32>
    %230 = tpu.matmul %162, %229, %cst_196 {dimension_numbers = #tpu.dot_dimension_numbers<[1], [0], [0], [1], [0, 0, 1, 1], [], []>} : vector<16x128xbf16>, vector<128x32xbf16>, vector<16x32xf32> -> vector<16x32xf32>
    %231 = arith.truncf %230 : vector<16x32xf32> to vector<16x32xbf16>
    %c8_197 = arith.constant 8 : index
    %c0_198 = arith.constant 0 : index
    %c0_199 = arith.constant 0 : index
    %232 = vector.load %arg8[%c8_197, %c0_198, %c0_199] : memref<16x32x16xbf16, #tpu.memory_space<vmem>>, vector<1x32x16xbf16>
    %233 = vector.shape_cast %232 : vector<1x32x16xbf16> to vector<32x16xbf16>
    %cst_200 = arith.constant dense<0.000000e+00> : vector<32x32xf32>
    %234 = tpu.matmul %233, %231, %cst_200 {dimension_numbers = #tpu.dot_dimension_numbers<[1], [0], [0], [1], [0, 0, 1, 1], [], []>} : vector<32x16xbf16>, vector<16x32xbf16>, vector<32x32xf32> -> vector<32x32xf32>
    %235 = arith.addf %227, %234 : vector<32x32xf32>
    %c9_201 = arith.constant 9 : index
    %c0_202 = arith.constant 0 : index
    %c0_203 = arith.constant 0 : index
    %236 = vector.load %arg7[%c9_201, %c0_202, %c0_203] : memref<16x128x32xbf16, #tpu.memory_space<vmem>>, vector<1x128x32xbf16>
    %237 = vector.shape_cast %236 : vector<1x128x32xbf16> to vector<128x32xbf16>
    %cst_204 = arith.constant dense<0.000000e+00> : vector<16x32xf32>
    %238 = tpu.matmul %162, %237, %cst_204 {dimension_numbers = #tpu.dot_dimension_numbers<[1], [0], [0], [1], [0, 0, 1, 1], [], []>} : vector<16x128xbf16>, vector<128x32xbf16>, vector<16x32xf32> -> vector<16x32xf32>
    %239 = arith.truncf %238 : vector<16x32xf32> to vector<16x32xbf16>
    %c9_205 = arith.constant 9 : index
    %c0_206 = arith.constant 0 : index
    %c0_207 = arith.constant 0 : index
    %240 = vector.load %arg8[%c9_205, %c0_206, %c0_207] : memref<16x32x16xbf16, #tpu.memory_space<vmem>>, vector<1x32x16xbf16>
    %241 = vector.shape_cast %240 : vector<1x32x16xbf16> to vector<32x16xbf16>
    %cst_208 = arith.constant dense<0.000000e+00> : vector<32x32xf32>
    %242 = tpu.matmul %241, %239, %cst_208 {dimension_numbers = #tpu.dot_dimension_numbers<[1], [0], [0], [1], [0, 0, 1, 1], [], []>} : vector<32x16xbf16>, vector<16x32xbf16>, vector<32x32xf32> -> vector<32x32xf32>
    %243 = arith.addf %235, %242 : vector<32x32xf32>
    %c10_209 = arith.constant 10 : index
    %c0_210 = arith.constant 0 : index
    %c0_211 = arith.constant 0 : index
    %244 = vector.load %arg7[%c10_209, %c0_210, %c0_211] : memref<16x128x32xbf16, #tpu.memory_space<vmem>>, vector<1x128x32xbf16>
    %245 = vector.shape_cast %244 : vector<1x128x32xbf16> to vector<128x32xbf16>
    %cst_212 = arith.constant dense<0.000000e+00> : vector<16x32xf32>
    %246 = tpu.matmul %162, %245, %cst_212 {dimension_numbers = #tpu.dot_dimension_numbers<[1], [0], [0], [1], [0, 0, 1, 1], [], []>} : vector<16x128xbf16>, vector<128x32xbf16>, vector<16x32xf32> -> vector<16x32xf32>
    %247 = arith.truncf %246 : vector<16x32xf32> to vector<16x32xbf16>
    %c10_213 = arith.constant 10 : index
    %c0_214 = arith.constant 0 : index
    %c0_215 = arith.constant 0 : index
    %248 = vector.load %arg8[%c10_213, %c0_214, %c0_215] : memref<16x32x16xbf16, #tpu.memory_space<vmem>>, vector<1x32x16xbf16>
    %249 = vector.shape_cast %248 : vector<1x32x16xbf16> to vector<32x16xbf16>
    %cst_216 = arith.constant dense<0.000000e+00> : vector<32x32xf32>
    %250 = tpu.matmul %249, %247, %cst_216 {dimension_numbers = #tpu.dot_dimension_numbers<[1], [0], [0], [1], [0, 0, 1, 1], [], []>} : vector<32x16xbf16>, vector<16x32xbf16>, vector<32x32xf32> -> vector<32x32xf32>
    %251 = arith.addf %243, %250 : vector<32x32xf32>
    %c11_217 = arith.constant 11 : index
    %c0_218 = arith.constant 0 : index
    %c0_219 = arith.constant 0 : index
    %252 = vector.load %arg7[%c11_217, %c0_218, %c0_219] : memref<16x128x32xbf16, #tpu.memory_space<vmem>>, vector<1x128x32xbf16>
    %253 = vector.shape_cast %252 : vector<1x128x32xbf16> to vector<128x32xbf16>
    %cst_220 = arith.constant dense<0.000000e+00> : vector<16x32xf32>
    %254 = tpu.matmul %162, %253, %cst_220 {dimension_numbers = #tpu.dot_dimension_numbers<[1], [0], [0], [1], [0, 0, 1, 1], [], []>} : vector<16x128xbf16>, vector<128x32xbf16>, vector<16x32xf32> -> vector<16x32xf32>
    %255 = arith.truncf %254 : vector<16x32xf32> to vector<16x32xbf16>
    %c11_221 = arith.constant 11 : index
    %c0_222 = arith.constant 0 : index
    %c0_223 = arith.constant 0 : index
    %256 = vector.load %arg8[%c11_221, %c0_222, %c0_223] : memref<16x32x16xbf16, #tpu.memory_space<vmem>>, vector<1x32x16xbf16>
    %257 = vector.shape_cast %256 : vector<1x32x16xbf16> to vector<32x16xbf16>
    %cst_224 = arith.constant dense<0.000000e+00> : vector<32x32xf32>
    %258 = tpu.matmul %257, %255, %cst_224 {dimension_numbers = #tpu.dot_dimension_numbers<[1], [0], [0], [1], [0, 0, 1, 1], [], []>} : vector<32x16xbf16>, vector<16x32xbf16>, vector<32x32xf32> -> vector<32x32xf32>
    %259 = arith.addf %251, %258 : vector<32x32xf32>
    %c12_225 = arith.constant 12 : index
    %c0_226 = arith.constant 0 : index
    %c0_227 = arith.constant 0 : index
    %260 = vector.load %arg7[%c12_225, %c0_226, %c0_227] : memref<16x128x32xbf16, #tpu.memory_space<vmem>>, vector<1x128x32xbf16>
    %261 = vector.shape_cast %260 : vector<1x128x32xbf16> to vector<128x32xbf16>
    %cst_228 = arith.constant dense<0.000000e+00> : vector<16x32xf32>
    %262 = tpu.matmul %162, %261, %cst_228 {dimension_numbers = #tpu.dot_dimension_numbers<[1], [0], [0], [1], [0, 0, 1, 1], [], []>} : vector<16x128xbf16>, vector<128x32xbf16>, vector<16x32xf32> -> vector<16x32xf32>
    %263 = arith.truncf %262 : vector<16x32xf32> to vector<16x32xbf16>
    %c12_229 = arith.constant 12 : index
    %c0_230 = arith.constant 0 : index
    %c0_231 = arith.constant 0 : index
    %264 = vector.load %arg8[%c12_229, %c0_230, %c0_231] : memref<16x32x16xbf16, #tpu.memory_space<vmem>>, vector<1x32x16xbf16>
    %265 = vector.shape_cast %264 : vector<1x32x16xbf16> to vector<32x16xbf16>
    %cst_232 = arith.constant dense<0.000000e+00> : vector<32x32xf32>
    %266 = tpu.matmul %265, %263, %cst_232 {dimension_numbers = #tpu.dot_dimension_numbers<[1], [0], [0], [1], [0, 0, 1, 1], [], []>} : vector<32x16xbf16>, vector<16x32xbf16>, vector<32x32xf32> -> vector<32x32xf32>
    %267 = arith.addf %259, %266 : vector<32x32xf32>
    %c13_233 = arith.constant 13 : index
    %c0_234 = arith.constant 0 : index
    %c0_235 = arith.constant 0 : index
    %268 = vector.load %arg7[%c13_233, %c0_234, %c0_235] : memref<16x128x32xbf16, #tpu.memory_space<vmem>>, vector<1x128x32xbf16>
    %269 = vector.shape_cast %268 : vector<1x128x32xbf16> to vector<128x32xbf16>
    %cst_236 = arith.constant dense<0.000000e+00> : vector<16x32xf32>
    %270 = tpu.matmul %162, %269, %cst_236 {dimension_numbers = #tpu.dot_dimension_numbers<[1], [0], [0], [1], [0, 0, 1, 1], [], []>} : vector<16x128xbf16>, vector<128x32xbf16>, vector<16x32xf32> -> vector<16x32xf32>
    %271 = arith.truncf %270 : vector<16x32xf32> to vector<16x32xbf16>
    %c13_237 = arith.constant 13 : index
    %c0_238 = arith.constant 0 : index
    %c0_239 = arith.constant 0 : index
    %272 = vector.load %arg8[%c13_237, %c0_238, %c0_239] : memref<16x32x16xbf16, #tpu.memory_space<vmem>>, vector<1x32x16xbf16>
    %273 = vector.shape_cast %272 : vector<1x32x16xbf16> to vector<32x16xbf16>
    %cst_240 = arith.constant dense<0.000000e+00> : vector<32x32xf32>
    %274 = tpu.matmul %273, %271, %cst_240 {dimension_numbers = #tpu.dot_dimension_numbers<[1], [0], [0], [1], [0, 0, 1, 1], [], []>} : vector<32x16xbf16>, vector<16x32xbf16>, vector<32x32xf32> -> vector<32x32xf32>
    %275 = arith.addf %267, %274 : vector<32x32xf32>
    %c14_241 = arith.constant 14 : index
    %c0_242 = arith.constant 0 : index
    %c0_243 = arith.constant 0 : index
    %276 = vector.load %arg7[%c14_241, %c0_242, %c0_243] : memref<16x128x32xbf16, #tpu.memory_space<vmem>>, vector<1x128x32xbf16>
    %277 = vector.shape_cast %276 : vector<1x128x32xbf16> to vector<128x32xbf16>
    %cst_244 = arith.constant dense<0.000000e+00> : vector<16x32xf32>
    %278 = tpu.matmul %162, %277, %cst_244 {dimension_numbers = #tpu.dot_dimension_numbers<[1], [0], [0], [1], [0, 0, 1, 1], [], []>} : vector<16x128xbf16>, vector<128x32xbf16>, vector<16x32xf32> -> vector<16x32xf32>
    %279 = arith.truncf %278 : vector<16x32xf32> to vector<16x32xbf16>
    %c14_245 = arith.constant 14 : index
    %c0_246 = arith.constant 0 : index
    %c0_247 = arith.constant 0 : index
    %280 = vector.load %arg8[%c14_245, %c0_246, %c0_247] : memref<16x32x16xbf16, #tpu.memory_space<vmem>>, vector<1x32x16xbf16>
    %281 = vector.shape_cast %280 : vector<1x32x16xbf16> to vector<32x16xbf16>
    %cst_248 = arith.constant dense<0.000000e+00> : vector<32x32xf32>
    %282 = tpu.matmul %281, %279, %cst_248 {dimension_numbers = #tpu.dot_dimension_numbers<[1], [0], [0], [1], [0, 0, 1, 1], [], []>} : vector<32x16xbf16>, vector<16x32xbf16>, vector<32x32xf32> -> vector<32x32xf32>
    %283 = arith.addf %275, %282 : vector<32x32xf32>
    %c15_249 = arith.constant 15 : index
    %c0_250 = arith.constant 0 : index
    %c0_251 = arith.constant 0 : index
    %284 = vector.load %arg7[%c15_249, %c0_250, %c0_251] : memref<16x128x32xbf16, #tpu.memory_space<vmem>>, vector<1x128x32xbf16>
    %285 = vector.shape_cast %284 : vector<1x128x32xbf16> to vector<128x32xbf16>
    %cst_252 = arith.constant dense<0.000000e+00> : vector<16x32xf32>
    %286 = tpu.matmul %162, %285, %cst_252 {dimension_numbers = #tpu.dot_dimension_numbers<[1], [0], [0], [1], [0, 0, 1, 1], [], []>} : vector<16x128xbf16>, vector<128x32xbf16>, vector<16x32xf32> -> vector<16x32xf32>
    %287 = arith.truncf %286 : vector<16x32xf32> to vector<16x32xbf16>
    %c15_253 = arith.constant 15 : index
    %c0_254 = arith.constant 0 : index
    %c0_255 = arith.constant 0 : index
    %288 = vector.load %arg8[%c15_253, %c0_254, %c0_255] : memref<16x32x16xbf16, #tpu.memory_space<vmem>>, vector<1x32x16xbf16>
    %289 = vector.shape_cast %288 : vector<1x32x16xbf16> to vector<32x16xbf16>
    %cst_256 = arith.constant dense<0.000000e+00> : vector<32x32xf32>
    %290 = tpu.matmul %289, %287, %cst_256 {dimension_numbers = #tpu.dot_dimension_numbers<[1], [0], [0], [1], [0, 0, 1, 1], [], []>} : vector<32x16xbf16>, vector<16x32xbf16>, vector<32x32xf32> -> vector<32x32xf32>
    %291 = arith.addf %283, %290 : vector<32x32xf32>
    %c0_257 = arith.constant 0 : index
    %c0_258 = arith.constant 0 : index
    %292 = vector.load %arg9[%c0_257, %c0_258] : memref<32x1xf32, #tpu.memory_space<vmem>>, vector<32x1xf32>
    %c0_259 = arith.constant 0 : index
    %c0_260 = arith.constant 0 : index
    %293 = vector.load %arg10[%c0_259, %c0_260] : memref<32x1xf32, #tpu.memory_space<vmem>>, vector<32x1xf32>
    %cst_261 = arith.constant dense<0.000000e+00> : vector<32xf32>
    %294 = vector.multi_reduction <add>, %291, %cst_261 [1] : vector<32x32xf32> to vector<32xf32>
    %295 = vector.shape_cast %294 : vector<32xf32> to vector<32x1xf32>
    %cst_262 = arith.constant 3.125000e-02 : f32
    %296 = vector.broadcast %cst_262 : f32 to vector<32x1xf32>
    %297 = arith.mulf %295, %296 : vector<32x1xf32>
    %298 = arith.mulf %291, %291 : vector<32x32xf32>
    %cst_263 = arith.constant dense<0.000000e+00> : vector<32xf32>
    %299 = vector.multi_reduction <add>, %298, %cst_263 [1] : vector<32x32xf32> to vector<32xf32>
    %300 = vector.shape_cast %299 : vector<32xf32> to vector<32x1xf32>
    %cst_264 = arith.constant 3.125000e-02 : f32
    %301 = vector.broadcast %cst_264 : f32 to vector<32x1xf32>
    %302 = arith.mulf %300, %301 : vector<32x1xf32>
    %303 = arith.mulf %297, %297 : vector<32x1xf32>
    %304 = arith.subf %302, %303 : vector<32x1xf32>
    %cst_265 = arith.constant 9.99999974E-6 : f32
    %305 = vector.broadcast %cst_265 : f32 to vector<32x1xf32>
    %306 = arith.addf %304, %305 : vector<32x1xf32>
    %307 = math.rsqrt %306 : vector<32x1xf32>
    %308 = arith.mulf %292, %307 : vector<32x1xf32>
    %309 = arith.mulf %297, %308 : vector<32x1xf32>
    %310 = arith.subf %293, %309 : vector<32x1xf32>
    %311 = vector.broadcast %308 : vector<32x1xf32> to vector<32x32xf32>
    %312 = arith.mulf %291, %311 : vector<32x32xf32>
    %313 = vector.broadcast %310 : vector<32x1xf32> to vector<32x32xf32>
    %314 = arith.addf %312, %313 : vector<32x32xf32>
    %cst_266 = arith.constant 2.000000e-01 : f32
    %315 = vector.broadcast %cst_266 : f32 to vector<32x32xf32>
    %316 = arith.mulf %315, %314 : vector<32x32xf32>
    %317 = arith.maximumf %314, %316 : vector<32x32xf32>
    %c0_267 = arith.constant 0 : index
    %c0_268 = arith.constant 0 : index
    %318 = vector.load %arg11[%c0_267, %c0_268] : memref<32x32xf32, #tpu.memory_space<vmem>>, vector<32x32xf32>
    %319 = arith.mulf %317, %318 : vector<32x32xf32>
    %cst_269 = arith.constant dense<0.000000e+00> : vector<32xf32>
    %320 = vector.multi_reduction <add>, %319, %cst_269 [0] : vector<32x32xf32> to vector<32xf32>
    %321 = vector.shape_cast %320 : vector<32xf32> to vector<1x32xf32>
    %c0_270 = arith.constant 0 : index
    %c0_271 = arith.constant 0 : index
    %322 = vector.load %arg12[%c0_270, %c0_271] : memref<32x2xf32, #tpu.memory_space<vmem>>, vector<32x2xf32>
    %cst_272 = arith.constant dense<0.000000e+00> : vector<1x2xf32>
    %323 = tpu.matmul %321, %322, %cst_272 {dimension_numbers = #tpu.dot_dimension_numbers<[1], [0], [0], [1], [0, 0, 1, 1], [], []>} : vector<1x32xf32>, vector<32x2xf32>, vector<1x2xf32> -> vector<1x2xf32>
    %324 = arith.negf %323 : vector<1x2xf32>
    %325 = math.exp %324 : vector<1x2xf32>
    %cst_273 = arith.constant 1.000000e+00 : f32
    %326 = vector.broadcast %cst_273 : f32 to vector<1x2xf32>
    %327 = arith.addf %326, %325 : vector<1x2xf32>
    %328 = arith.divf %326, %327 : vector<1x2xf32>
    %c0_274 = arith.constant 0 : index
    %c0_275 = arith.constant 0 : index
    %329 = vector.load %arg13[%c0_274, %c0_275] : memref<1x2xf32, #tpu.memory_space<vmem>>, vector<1x2xf32>
    tpu.vector_store %arg13[%c0_274, %c0_275], %328 {strides = array<i32>} : memref<1x2xf32, #tpu.memory_space<vmem>>, vector<1x2xf32>,
    return
  }
  func.func @transform_0(%arg0: i32) -> (i32, i32) {
    %c0_i32 = arith.constant 0 : i32
    %c0_i32_0 = arith.constant 0 : i32
    %c0_i32_1 = arith.constant 0 : i32
    return %c0_i32, %c0_i32_0 : i32, i32
  }
  func.func @transform_1(%arg0: i32) -> (i32, i32) {
    %c0_i32 = arith.constant 0 : i32
    %c0_i32_0 = arith.constant 0 : i32
    %c0_i32_1 = arith.constant 0 : i32
    return %c0_i32, %c0_i32_0 : i32, i32
  }
  func.func @transform_2(%arg0: i32) -> (i32, i32, i32) {
    %c0_i32 = arith.constant 0 : i32
    %c0_i32_0 = arith.constant 0 : i32
    %c0_i32_1 = arith.constant 0 : i32
    %c0_i32_2 = arith.constant 0 : i32
    return %c0_i32, %c0_i32_0, %c0_i32_1 : i32, i32, i32
  }
  func.func @transform_3(%arg0: i32) -> (i32, i32, i32) {
    %c0_i32 = arith.constant 0 : i32
    %c0_i32_0 = arith.constant 0 : i32
    %c0_i32_1 = arith.constant 0 : i32
    %c0_i32_2 = arith.constant 0 : i32
    return %c0_i32, %c0_i32_0, %c0_i32_1 : i32, i32, i32
  }
  func.func @transform_4(%arg0: i32) -> (i32, i32) {
    %c0_i32 = arith.constant 0 : i32
    %c0_i32_0 = arith.constant 0 : i32
    %c0_i32_1 = arith.constant 0 : i32
    return %c0_i32, %c0_i32_0 : i32, i32
  }
  func.func @transform_5(%arg0: i32) -> (i32, i32) {
    %c0_i32 = arith.constant 0 : i32
    %c0_i32_0 = arith.constant 0 : i32
    %c0_i32_1 = arith.constant 0 : i32
    return %c0_i32, %c0_i32_0 : i32, i32
  }
  func.func @transform_6(%arg0: i32) -> (i32, i32, i32) {
    %c0_i32 = arith.constant 0 : i32
    %c0_i32_0 = arith.constant 0 : i32
    %c0_i32_1 = arith.constant 0 : i32
    %c0_i32_2 = arith.constant 0 : i32
    return %c0_i32, %c0_i32_0, %c0_i32_1 : i32, i32, i32
  }
  func.func @transform_7(%arg0: i32) -> (i32, i32, i32) {
    %c0_i32 = arith.constant 0 : i32
    %c0_i32_0 = arith.constant 0 : i32
    %c0_i32_1 = arith.constant 0 : i32
    %c0_i32_2 = arith.constant 0 : i32
    return %c0_i32, %c0_i32_0, %c0_i32_1 : i32, i32, i32
  }
  func.func @transform_8(%arg0: i32) -> (i32, i32) {
    %c0_i32 = arith.constant 0 : i32
    %c0_i32_0 = arith.constant 0 : i32
    %c0_i32_1 = arith.constant 0 : i32
    return %c0_i32, %c0_i32_0 : i32, i32
  }
  func.func @transform_9(%arg0: i32) -> (i32, i32) {
    %c0_i32 = arith.constant 0 : i32
    %c0_i32_0 = arith.constant 0 : i32
    %c0_i32_1 = arith.constant 0 : i32
    return %c0_i32, %c0_i32_0 : i32, i32
  }
  func.func @transform_10(%arg0: i32) -> (i32, i32) {
    %c0_i32 = arith.constant 0 : i32
    %c0_i32_0 = arith.constant 0 : i32
    %c0_i32_1 = arith.constant 0 : i32
    return %c0_i32, %c0_i32_0 : i32, i32
  }
  func.func @transform_11(%arg0: i32) -> (i32, i32) {
    %c0_i32 = arith.constant 0 : i32
    %c0_i32_0 = arith.constant 0 : i32
    %c0_i32_1 = arith.constant 0 : i32
    return %c0_i32, %c0_i32_0 : i32, i32
  }
  func.func @transform_12(%arg0: i32) -> (i32, i32) {
    %c0_i32 = arith.constant 0 : i32
    %c0_i32_0 = arith.constant 0 : i32
    %c0_i32_1 = arith.constant 0 : i32
    return %c0_i32, %c0_i32_0 : i32, i32
  }
}

</mosaic_0001>

<bundles_post_ra>
// kernel: discriminator32_forward.1
= control target key start
LH: loop header
LB: loop body
LE: loop exit
PB: predicated region body
PF: predicated region fallthrough
CT: control target
= control target key end

     0   :  { %v13975_v2 = vmov 0   ;;  %vm116_vm0 = vcmask 392192   ;;  %vm13977_vm1 = vmmov 0   ;;  %vm903_vm2 = vcmask 1043456   ;;  %s16702_s0 = inlined_call_operand.vmem [shape: bf16[48,512], index: 0, kind: input, shape index: {}]   ;;  %s16703_s1 = inlined_call_operand.vmem [shape: bf16[8,48], index: 1, kind: input, shape index: {}]   ;;  %s16704_s2 = inlined_call_operand.vmem [shape: bf16[16,512,128], index: 2, kind: input, shape index: {}]   ;;  %s16705_s3 = inlined_call_operand.vmem [shape: bf16[16,16,8], index: 3, kind: input, shape index: {}]   ;;  %s16706_s4 = inlined_call_operand.vmem [shape: f32[16,1], index: 4, kind: input, shape index: {}]   ;;  %s16707_s5 = inlined_call_operand.vmem [shape: f32[16,1], index: 5, kind: input, shape index: {}]   ;;  %s16708_s6 = inlined_call_operand.vmem [shape: bf16[16,128,32], index: 6, kind: input, shape index: {}]   ;;  %s16709_s7 = inlined_call_operand.vmem [shape: bf16[16,32,16], index: 7, kind: input, shape index: {}]   ;;  %s16710_s8 = inlined_call_operand.vmem [shape: f32[32,1], index: 8, kind: input, shape index: {}]   ;;  %s16711_s9 = inlined_call_operand.vmem [shape: f32[32,1], index: 9, kind: input, shape index: {}]   ;;  %s16712_s10 = inlined_call_operand.vmem [shape: f32[32,32], index: 10, kind: input, shape index: {}]   ;;  %s16713_s11 = inlined_call_operand.vmem [shape: f32[32,2], index: 11, kind: input, shape index: {}]   ;;  %s16714_s12 = inlined_call_operand.hbm [shape: f32[1,2], index: 12, kind: output, shape index: {}]  }
   0x1   :  { %v13231_v0 = vld [vmem:[%s16702_s0 + $0x44] ss:$16 sps:$4 sm:$0xff]   ;;  %v13233_v1 = vld [vmem:[%s16702_s0 + $0x4c] ss:$16 sps:$4 sm:$0xff]   ;;  %152 = vmatprep.mubr.bf16.mxu0 %v13975_v2  ;;  %193 = vmatprep.mubr.bf16.mxu1 %v13975_v2  ;;  %v13235_v3 = vld [vmem:[%s16702_s0 + $0x40] ss:$16 sps:$4 sm:$0xff]  }
   0x2   :  { %130 = vmatprep.subr.bf16.mxu0 %v13231_v0  ;;  %v13236_v4 = vld [vmem:[%s16702_s0 + $0x48] ss:$16 sps:$4 sm:$0xff]   ;;  %13229 = vset.pattern.permute.xlu0 %v13975_v2  ;;  %v13237_v5 = vld [vmem:[%s16702_s0 + $0x24] ss:$16 sps:$4 sm:$0xff]   ;;  %v13239_v6 = vld [vmem:[%s16702_s0 + $0x2c] ss:$16 sps:$4 sm:$0xff]  }
   0x3   :  { %171 = vmatprep.subr.bf16.mxu1 %v13233_v1  ;;  %13230 = vset.pattern.permute.xlu1 %v13975_v2  ;;  %v13241_v7 = vld [vmem:[%s16702_s0 + $0x20] ss:$16 sps:$4 sm:$0xff]   ;;  %v13242_v8 = vld [vmem:[%s16702_s0 + $0x28] ss:$16 sps:$4 sm:$0xff]   ;;  %v13243_v9 = vld [vmem:[%s16702_s0 + $0x4] ss:$16 sps:$4 sm:$0xff]  }
   0x4   :  { %131 = vmatpush1.bf16.msra.mxu0 %v13235_v3  ;;  %172 = vmatpush1.bf16.msra.mxu1 %v13236_v4  ;;  %v13245_v10 = vld [vmem:[%s16702_s0 + $0xc] ss:$16 sps:$4 sm:$0xff]   ;;  %v13247_v11 = vld [vmem:[%s16702_s0] ss:$16 sps:$4 sm:$0xff]   ;;  %v13248_v12 = vld [vmem:[%s16702_s0 + $0x8] ss:$16 sps:$4 sm:$0xff]  }
   0x5   :  { %132 = vmatprep.subr.bf16.mxu0 %v13237_v5  ;;  %173 = vmatprep.subr.bf16.mxu1 %v13239_v6  ;;  %v13249_v13 = vld [vmem:[%s16704_s2 + $0x78] sm:$0xff]   ;;  %v43_v14 = vld [vmem:[%s16703_s1] sm:$0xf]  ;;  %v13253_v18 = vld [vmem:[%s16704_s2 + $0x70] sm:$0xff]   ;;  %vm899_vm3 = vcmask 64512  }
   0x6   :  { %v13250_v15 = vld [vmem:[%s16704_s2 + $0xf8] sm:$0xff]   ;;  %v13254_v19 = vld [vmem:[%s16704_s2 + $0xf0] sm:$0xff]   ;;  %v13257_v22 = vld [vmem:[%s16704_s2 + $0x68] sm:$0xff]  }
   0x7   :  { %v13251_v16 = vld [vmem:[%s16704_s2 + $0x38] sm:$0xff]   ;;  %v13255_v20 = vld [vmem:[%s16704_s2 + $0x30] sm:$0xff]   ;;  %v13258_v23 = vld [vmem:[%s16704_s2 + $0xe8] sm:$0xff]  }
   0x8   :  { %133 = vmatpush1.bf16.msra.mxu0 %v13241_v7  ;;  %174 = vmatpush1.bf16.msra.mxu1 %v13242_v8  ;;  %v13252_v17 = vld [vmem:[%s16704_s2 + $0xb8] sm:$0xff]   ;;  %v13256_v21 = vld [vmem:[%s16704_s2 + $0xb0] sm:$0xff]   ;;  %v13259_v24 = vld [vmem:[%s16704_s2 + $0x28] sm:$0xff]  }
   0x9   :  { %134 = vmatprep.subr.bf16.mxu0 %v13243_v9  ;;  %175 = vmatprep.subr.bf16.mxu1 %v13245_v10  ;;  %v13260_v25 = vld [vmem:[%s16704_s2 + $0xa8] sm:$0xff]   ;;  %v13261_v26 = vld [vmem:[%s16704_s2 + $0x60] sm:$0xff]   ;;  %v13265_v30 = vld [vmem:[%s16704_s2 + $0x58] sm:$0xff]  }
   0xa   :  { %v13262_v27 = vld [vmem:[%s16704_s2 + $0xe0] sm:$0xff]   ;;  %v13266_v31 = vld [vmem:[%s16704_s2 + $0xd8] sm:$0xff]   ;;  %v13269_v34 = vld [vmem:[%s16704_s2 + $0x50] sm:$0xff]  }
   0xb   :  { %v13263_v28 = vld [vmem:[%s16704_s2 + $0x20] sm:$0xff]   ;;  %v13267_v32 = vld [vmem:[%s16704_s2 + $0x18] sm:$0xff]   ;;  %v13270_v35 = vld [vmem:[%s16704_s2 + $0xd0] sm:$0xff]  }
   0xc   :  { %135 = vmatpush1.bf16.msra.mxu0 %v13247_v11  ;;  %176 = vmatpush1.bf16.msra.mxu1 %v13248_v12  ;;  %v13264_v29 = vld [vmem:[%s16704_s2 + $0xa0] sm:$0xff]   ;;  %v13268_v33 = vld [vmem:[%s16704_s2 + $0x98] sm:$0xff]   ;;  %v13271_v36 = vld [vmem:[%s16704_s2 + $0x10] sm:$0xff]  }
   0xd   :  { %11769 = vmatprep.subr.bf16.mxu0 %v13249_v13  ;;  %11791 = vmatprep.subr.bf16.mxu1 %v13250_v15  ;;  %v13272_v37 = vld [vmem:[%s16704_s2 + $0x90] sm:$0xff]   ;;  %v13273_v38 = vld [vmem:[%s16704_s2 + $0x48] sm:$0xff]   ;;  %v13277_v42 = vld [vmem:[%s16704_s2 + $0x40] sm:$0xff]  }
   0xe   :  { %v13274_v39 = vld [vmem:[%s16704_s2 + $0xc8] sm:$0xff]   ;;  %v13278_v43 = vld [vmem:[%s16704_s2 + $0xc0] sm:$0xff]   ;;  %v13281_v46 = vld [vmem:[%s16704_s2 + $0x178] sm:$0xff]  }
   0xf   :  { %9739 = vmatmul.mubr.msk.bf16.vlgmr.msra.gmra.mxu0 %vm116_vm0, %v43_v14  ;;  %9740 = vmatmul.mubr.msk.bf16.vlgmr.msra.gmra.mxu1 %vm116_vm0, %v43_v14  ;;  %v13275_v40 = vld [vmem:[%s16704_s2 + $0x8] sm:$0xff]   ;;  %v13279_v44 = vld [vmem:[%s16704_s2] sm:$0xff]   ;;  %v13282_v47 = vld [vmem:[%s16704_s2 + $0x1f8] sm:$0xff]  }
  0x10   :  { %11770 = vmatpush3.bf16.msra.mxu0 %v13251_v16  ;;  %11792 = vmatpush3.bf16.msra.mxu1 %v13252_v17  ;;  %v13276_v41 = vld [vmem:[%s16704_s2 + $0x88] sm:$0xff]   ;;  %v13280_v45 = vld [vmem:[%s16704_s2 + $0x80] sm:$0xff]   ;;  %v13283_v62 = vld [vmem:[%s16704_s2 + $0x138] sm:$0xff]  }
  0x11   :  { %11771 = vmatprep.subr.bf16.mxu0 %v13253_v18  ;;  %11793 = vmatprep.subr.bf16.mxu1 %v13254_v19  ;;  %v13284_v63 = vld [vmem:[%s16704_s2 + $0x1b8] sm:$0xff]   ;;  %v13285_v4 = vld [vmem:[%s16704_s2 + $0x170] sm:$0xff]   ;;  %v13289_v10 = vld [vmem:[%s16704_s2 + $0x168] sm:$0xff]  }
  0x12   :  { %v13286_v5 = vld [vmem:[%s16704_s2 + $0x1f0] sm:$0xff]   ;;  %v13290_v11 = vld [vmem:[%s16704_s2 + $0x1e8] sm:$0xff]   ;;  %v13293_v14 = vld [vmem:[%s16704_s2 + $0x160] sm:$0xff]  }
  0x13   :  { %v13287_v8 = vld [vmem:[%s16704_s2 + $0x130] sm:$0xff]   ;;  %v13291_v12 = vld [vmem:[%s16704_s2 + $0x128] sm:$0xff]   ;;  %v13294_v15 = vld [vmem:[%s16704_s2 + $0x1e0] sm:$0xff]  }
  0x14   :  { %11772 = vmatpush3.bf16.msra.mxu0 %v13255_v20  ;;  %11794 = vmatpush3.bf16.msra.mxu1 %v13256_v21  ;;  %v13288_v9 = vld [vmem:[%s16704_s2 + $0x1b0] sm:$0xff]   ;;  %v13292_v13 = vld [vmem:[%s16704_s2 + $0x1a8] sm:$0xff]   ;;  %v13295_v16 = vld [vmem:[%s16704_s2 + $0x120] sm:$0xff]  }
  0x15   :  { %11773 = vmatprep.subr.bf16.mxu0 %v13257_v22  ;;  %11795 = vmatprep.subr.bf16.mxu1 %v13258_v23  ;;  %v13296_v17 = vld [vmem:[%s16704_s2 + $0x1a0] sm:$0xff]   ;;  %v13297_v18 = vld [vmem:[%s16704_s2 + $0x158] sm:$0xff]   ;;  %v13301_v22 = vld [vmem:[%s16704_s2 + $0x150] sm:$0xff]  }
  0x16   :  { %v13298_v19 = vld [vmem:[%s16704_s2 + $0x1d8] sm:$0xff]   ;;  %v13302_v23 = vld [vmem:[%s16704_s2 + $0x1d0] sm:$0xff]  }
  0x17   :  { %v13299_v20 = vld [vmem:[%s16704_s2 + $0x118] sm:$0xff]  }
  0x18   :  { %11774 = vmatpush3.bf16.msra.mxu0 %v13259_v24  ;;  %11796 = vmatpush3.bf16.msra.mxu1 %v13260_v25  ;;  %v13300_v21 = vld [vmem:[%s16704_s2 + $0x198] sm:$0xff]   ;;  %v13303_v24 = vld [vmem:[%s16704_s2 + $0x110] sm:$0xff]  }
  0x19   :  { %11775 = vmatprep.subr.bf16.mxu0 %v13261_v26  ;;  %11797 = vmatprep.subr.bf16.mxu1 %v13262_v27  ;;  %v13304_v25 = vld [vmem:[%s16704_s2 + $0x190] sm:$0xff]   ;;  %v13305_v26 = vld [vmem:[%s16704_s2 + $0x148] sm:$0xff]  }
  0x1a   :  { %v13306_v27 = vld [vmem:[%s16704_s2 + $0x1c8] sm:$0xff]  }
  0x1c   :  { %11776 = vmatpush3.bf16.msra.mxu0 %v13263_v28  ;;  %11798 = vmatpush3.bf16.msra.mxu1 %v13264_v29  ;;  %v13307_v28 = vld [vmem:[%s16704_s2 + $0x108] sm:$0xff]  }
  0x1d   :  { %11777 = vmatprep.subr.bf16.mxu0 %v13265_v30  ;;  %11799 = vmatprep.subr.bf16.mxu1 %v13266_v31  ;;  %v13308_v29 = vld [vmem:[%s16704_s2 + $0x188] sm:$0xff]   ;;  %v13309_v30 = vld [vmem:[%s16704_s2 + $0x140] sm:$0xff]  }
  0x1e   :  { %v13310_v31 = vld [vmem:[%s16704_s2 + $0x1c0] sm:$0xff]  }
  0x20   :  { %11778 = vmatpush3.bf16.msra.mxu0 %v13267_v32  ;;  %11800 = vmatpush3.bf16.msra.mxu1 %v13268_v33  ;;  %v13311_v32 = vld [vmem:[%s16704_s2 + $0x100] sm:$0xff]  }
  0x21   :  { %11779 = vmatprep.subr.bf16.mxu0 %v13269_v34  ;;  %11801 = vmatprep.subr.bf16.mxu1 %v13270_v35  ;;  %v13312_v33 = vld [vmem:[%s16704_s2 + $0x180] sm:$0xff]   ;;  %v13976_v34 = vmov 0.0  }
  0x24   :  { %11780 = vmatpush3.bf16.msra.mxu0 %v13271_v36  ;;  %11802 = vmatpush3.bf16.msra.mxu1 %v13272_v37 }
  0x25   :  { %11781 = vmatprep.subr.bf16.mxu0 %v13273_v38  ;;  %11803 = vmatprep.subr.bf16.mxu1 %v13274_v39 }
  0x28   :  { %11782 = vmatpush3.bf16.msra.mxu0 %v13275_v40  ;;  %11804 = vmatpush3.bf16.msra.mxu1 %v13276_v41 }
  0x29   :  { %11783 = vmatprep.subr.bf16.mxu0 %v13277_v42  ;;  %11805 = vmatprep.subr.bf16.mxu1 %v13278_v43 }
  0x2c   :  { %11784 = vmatpush3.bf16.msra.mxu0 %v13279_v44  ;;  %11806 = vmatpush3.bf16.msra.mxu1 %v13280_v45  ;;  %v13314_v44 = vld [vmem:[%s16704_s2 + $0x2f8] sm:$0xff]  }
  0x2d   :  { %11813 = vmatprep.subr.bf16.mxu0 %v13281_v46  ;;  %11835 = vmatprep.subr.bf16.mxu1 %v13282_v47 }
  0xcf   :  { %v154_v48 = vpop.f32.mrf.mxu0  ;;  %v195_v49 = vpop.f32.mrf.mxu1 }
  0xd0   :  { %v202_v50 = vmul.f32 0.2, %v154_v48  ;;  %v204_v51 = vmul.f32 0.2, %v195_v49 }
  0xd1   :  { %v156_v52 = vpop.f32.mrf.mxu0  ;;  %v197_v53 = vpop.f32.mrf.mxu1 }
  0xd2   :  { %v203_v54 = vmul.f32 0.2, %v156_v52  ;;  %v205_v55 = vmul.f32 0.2, %v197_v53  ;;  %v206_v56 = vmax.f32 %v154_v48, %v202_v50  ;;  %v208_v57 = vmax.f32 %v195_v49, %v204_v51  ;;  %v13313_v48 = vld [vmem:[%s16705_s3] sm:$0xff]   ;;  %v13315_v49 = vld [vmem:[%s16704_s2 + $0x2b8] sm:$0xff]  }
  0xd3   :  { %v158_v58 = vpop.f32.mrf.mxu0  ;;  %v199_v59 = vpop.f32.mrf.mxu1  ;;  %v13316_v51 = vld [vmem:[%s16704_s2 + $0x2f0] sm:$0xff]  }
  0xd4   :  { %v207_v60 = vmax.f32 %v156_v52, %v203_v54  ;;  %v209_v61 = vmax.f32 %v197_v53, %v205_v55  ;;  %v14201_v6 = vpack.c.bf16 %v206_v56, %v206_v56  ;;  %v14203_v7 = vpack.c.bf16 %v208_v57, %v208_v57  ;;  %v13317_v52 = vld [vmem:[%s16704_s2 + $0x2b0] sm:$0xff]   ;;  %v13318_v53 = vld [vmem:[%s16704_s2 + $0x2e8] sm:$0xff]   ;;  %v13320_v55 = vld [vmem:[%s16704_s2 + $0x2e0] sm:$0xff]  }
  0xd5   :  { %v159_v0 = vpop.f32.mrf.mxu0  ;;  %v200_v1 = vpop.f32.mrf.mxu1  ;;  %v13319_v54 = vld [vmem:[%s16704_s2 + $0x2a8] sm:$0xff]   ;;  %v13321_v56 = vld [vmem:[%s16704_s2 + $0x2a0] sm:$0xff]   ;;  %v13322_v57 = vld [vmem:[%s16704_s2 + $0x2d8] sm:$0xff]  }
  0xd6   :  { %v14191_v2 = vpack.c.bf16 %v207_v60, %v207_v60  ;;  %v14193_v3 = vpack.c.bf16 %v209_v61, %v209_v61  ;;  %v13323_v58 = vld [vmem:[%s16704_s2 + $0x298] sm:$0xff]   ;;  %v13324_v59 = vld [vmem:[%s16704_s2 + $0x2d0] sm:$0xff]   ;;  %v13326_v61 = vld [vmem:[%s16704_s2 + $0x2c8] sm:$0xff]  }
  0xd7   :  { %v13325_v60 = vld [vmem:[%s16704_s2 + $0x290] sm:$0xff]   ;;  %v13327_v0 = vld [vmem:[%s16704_s2 + $0x288] sm:$0xff]   ;;  %v13328_v1 = vld [vmem:[%s16704_s2 + $0x2c0] sm:$0xff]  }
  0xd8   :  { %502 = vmatprep.mubr.bf16.mxu0 %v14191_v2  ;;  %542 = vmatprep.mubr.bf16.mxu1 %v14193_v3 }
  0xd9   :  { %503 = vmatmul.mubr.bf16.vlgmr.msra.gmra.mxu0 %v14201_v6  ;;  %543 = vmatmul.mubr.bf16.vlgmr.msra.gmra.mxu1 %v14203_v7 }
  0xda   :  { %11814 = vmatpush3.bf16.msra.mxu0 %v13283_v62  ;;  %11836 = vmatpush3.bf16.msra.mxu1 %v13284_v63 }
  0xdb   :  { %842 = vmatprep.mubr.bf16.mxu0 %v14191_v2  ;;  %882 = vmatprep.mubr.bf16.mxu1 %v14193_v3 }
  0xdc   :  { %11815 = vmatprep.subr.bf16.mxu0 %v13285_v4  ;;  %11837 = vmatprep.subr.bf16.mxu1 %v13286_v5 }
  0xde   :  { %11816 = vmatpush3.bf16.msra.mxu0 %v13287_v8  ;;  %11838 = vmatpush3.bf16.msra.mxu1 %v13288_v9 }
  0xdf   :  { %11817 = vmatprep.subr.bf16.mxu0 %v13289_v10  ;;  %11839 = vmatprep.subr.bf16.mxu1 %v13290_v11 }
  0xe2   :  { %11818 = vmatpush3.bf16.msra.mxu0 %v13291_v12  ;;  %11840 = vmatpush3.bf16.msra.mxu1 %v13292_v13  ;;  %v13329_v12 = vld [vmem:[%s16704_s2 + $0x280] sm:$0xff]  }
  0xe3   :  { %11819 = vmatprep.subr.bf16.mxu0 %v13293_v14  ;;  %11841 = vmatprep.subr.bf16.mxu1 %v13294_v15  ;;  %v13331_v14 = vld [vmem:[%s16704_s2 + $0x278] sm:$0xff]  }
  0xe4   :  { %v13333_v15 = vld [vmem:[%s16704_s2 + $0x378] sm:$0xff]  }
  0xe6   :  { %11820 = vmatpush3.bf16.msra.mxu0 %v13295_v16  ;;  %11842 = vmatpush3.bf16.msra.mxu1 %v13296_v17 }
  0xe7   :  { %11821 = vmatprep.subr.bf16.mxu0 %v13297_v18  ;;  %11843 = vmatprep.subr.bf16.mxu1 %v13298_v19  ;;  %v13330_v19 = vld [vmem:[%s16705_s3 + $0x8] sm:$0xff]  }
  0xea   :  { %11822 = vmatpush3.bf16.msra.mxu0 %v13299_v20  ;;  %11844 = vmatpush3.bf16.msra.mxu1 %v13300_v21  ;;  %v13332_v20 = vld [vmem:[%s16704_s2 + $0x238] sm:$0xff]  }
  0xeb   :  { %11823 = vmatprep.subr.bf16.mxu0 %v13301_v22  ;;  %11845 = vmatprep.subr.bf16.mxu1 %v13302_v23  ;;  %v13334_v22 = vld [vmem:[%s16704_s2 + $0x338] sm:$0xff]   ;;  %v13335_v23 = vld [vmem:[%s16704_s2 + $0x270] sm:$0xff]  }
  0xee   :  { %11824 = vmatpush3.bf16.msra.mxu0 %v13303_v24  ;;  %11846 = vmatpush3.bf16.msra.mxu1 %v13304_v25  ;;  %v13337_v24 = vld [vmem:[%s16704_s2 + $0x370] sm:$0xff]  }
  0xef   :  { %11825 = vmatprep.subr.bf16.mxu0 %v13305_v26  ;;  %11847 = vmatprep.subr.bf16.mxu1 %v13306_v27  ;;  %v13336_v25 = vld [vmem:[%s16704_s2 + $0x230] sm:$0xff]   ;;  %v13339_v27 = vld [vmem:[%s16704_s2 + $0x268] sm:$0xff]  }
  0xf0   :  { %v13338_v26 = vld [vmem:[%s16704_s2 + $0x330] sm:$0xff]  }
  0xf2   :  { %11826 = vmatpush3.bf16.msra.mxu0 %v13307_v28  ;;  %11848 = vmatpush3.bf16.msra.mxu1 %v13308_v29  ;;  %v13341_v28 = vld [vmem:[%s16704_s2 + $0x368] sm:$0xff]  }
  0xf3   :  { %11827 = vmatprep.subr.bf16.mxu0 %v13309_v30  ;;  %11849 = vmatprep.subr.bf16.mxu1 %v13310_v31  ;;  %v13340_v29 = vld [vmem:[%s16704_s2 + $0x228] sm:$0xff]   ;;  %v13343_v31 = vld [vmem:[%s16704_s2 + $0x260] sm:$0xff]  }
  0xf4   :  { %v13342_v30 = vld [vmem:[%s16704_s2 + $0x328] sm:$0xff]  }
  0xf6   :  { %11828 = vmatpush3.bf16.msra.mxu0 %v13311_v32  ;;  %11850 = vmatpush3.bf16.msra.mxu1 %v13312_v33  ;;  %v13345_v32 = vld [vmem:[%s16704_s2 + $0x360] sm:$0xff]  }
  0xf7   :  { %12708 = vmatprep.subr.bf16.mxu1 %v13976_v34  ;;  %12702 = vmatprep.subr.bf16.mxu0 %v13976_v34  ;;  %v13344_v33 = vld [vmem:[%s16704_s2 + $0x220] sm:$0xff]  }
  0xf9   :  { %843 = vmatmul.mubr.bf16.vlgmr.msra.gmra.mxu0 %v14201_v6  ;;  %883 = vmatmul.mubr.bf16.vlgmr.msra.gmra.mxu1 %v14203_v7 }
  0xfa   :  { %12710 = vmatprep.mubr.msk.bf16.mxu1 %vm13977_vm1, %v13976_v34  ;;  %12704 = vmatprep.mubr.msk.bf16.mxu0 %vm13977_vm1, %v13976_v34 }
 0x199   :  { %v11785_v35 = vpop.f32.mrf.mxu0  ;;  %v11807_v36 = vpop.f32.mrf.mxu1 }
 0x19b   :  { %v11786_v37 = vpop.f32.mrf.mxu0  ;;  %v11808_v38 = vpop.f32.mrf.mxu1 }
 0x19c   :  { %v11787_v39 = vadd.f32 %v11786_v37, %v11785_v35  ;;  %v11809_v40 = vadd.f32 %v11808_v38, %v11807_v36  ;;  %v13346_v35 = vld [vmem:[%s16704_s2 + $0x320] sm:$0xff]   ;;  %v13347_v36 = vld [vmem:[%s16704_s2 + $0x258] sm:$0xff]  }
 0x19d   :  { %v11788_v41 = vpop.f32.mrf.mxu0  ;;  %v11810_v42 = vpop.f32.mrf.mxu1  ;;  %v13349_v37 = vld [vmem:[%s16704_s2 + $0x358] sm:$0xff]  }
 0x19e   :  { %v545_v43 = vadd.f32 %v11809_v40, %v11787_v39  ;;  %v13348_v38 = vld [vmem:[%s16704_s2 + $0x218] sm:$0xff]   ;;  %v13351_v40 = vld [vmem:[%s16704_s2 + $0x250] sm:$0xff]  }
 0x19f   :  { %v11789_v45 = vpop.f32.mrf.mxu0  ;;  %v11811_v46 = vpop.f32.mrf.mxu1  ;;  %v13350_v39 = vld [vmem:[%s16704_s2 + $0x318] sm:$0xff]   ;;  %v13353_v41 = vld [vmem:[%s16704_s2 + $0x350] sm:$0xff]  }
 0x1a0   :  { %v550_v47 = vpack.c.bf16 %v545_v43, %v545_v43  ;;  %v13352_v42 = vld [vmem:[%s16704_s2 + $0x210] sm:$0xff]   ;;  %v13357_v45 = vld [vmem:[%s16704_s2 + $0x348] sm:$0xff]  }
 0x1a1   :  { %v13354_v43 = vld [vmem:[%s16704_s2 + $0x310] sm:$0xff]   ;;  %v13356_v46 = vld [vmem:[%s16704_s2 + $0x208] sm:$0xff]  }
 0x1a2   :  { %v957_v50 = vsel %vm903_vm2, %v550_v47, 0  ;;  %v13358_v47 = vld [vmem:[%s16704_s2 + $0x308] sm:$0xff]  }
 0x1a3   :  { %12709 = vmatpush3.bf16.msra.mxu1 %v957_v50  ;;  %v13360_v50 = vld [vmem:[%s16704_s2 + $0x200] sm:$0xff]  }
 0x1a4   :  { %11883 = vmatprep.subr.bf16.mxu1 %v13314_v44  ;;  %v13355_v44 = vld [vmem:[%s16704_s2 + $0x248] sm:$0xff]  }
 0x1a6   :  { %12711 = vmatmul.mubr.msk.bf16.vlgmr.msra.gmra.mxu1 %vm899_vm3, %v13313_v48  ;;  %v13359_v48 = vld [vmem:[%s16704_s2 + $0x240] sm:$0xff]  }
 0x1a7   :  { %11884 = vmatpush3.bf16.msra.mxu1 %v13315_v49  ;;  %1329 = vmatprep.mubr.bf16.mxu1 %v14193_v3  ;;  %v13361_v49 = vld [vmem:[%s16704_s2 + $0x340] sm:$0xff]  }
 0x1a8   :  { %11885 = vmatprep.subr.bf16.mxu1 %v13316_v51  ;;  %v13362_v51 = vld [vmem:[%s16704_s2 + $0x300] sm:$0xff]  }
 0x1ab   :  { %11886 = vmatpush3.bf16.msra.mxu1 %v13317_v52 }
 0x1ac   :  { %11887 = vmatprep.subr.bf16.mxu1 %v13318_v53 }
 0x1af   :  { %11888 = vmatpush3.bf16.msra.mxu1 %v13319_v54 }
 0x1b0   :  { %11889 = vmatprep.subr.bf16.mxu1 %v13320_v55 }
 0x1b3   :  { %11890 = vmatpush3.bf16.msra.mxu1 %v13321_v56 }
 0x1b4   :  { %11891 = vmatprep.subr.bf16.mxu1 %v13322_v57 }
 0x1b7   :  { %11892 = vmatpush3.bf16.msra.mxu1 %v13323_v58 }
 0x1b8   :  { %11893 = vmatprep.subr.bf16.mxu1 %v13324_v59 }
 0x1b9   :  { %v11829_v62 = vpop.f32.mrf.mxu0  ;;  %v11851_v63 = vpop.f32.mrf.mxu1 }
 0x1bb   :  { %v11830_v4 = vpop.f32.mrf.mxu0  ;;  %v11852_v5 = vpop.f32.mrf.mxu1  ;;  %11894 = vmatpush3.bf16.msra.mxu1 %v13325_v60 }
 0x1bc   :  { %v11831_v8 = vadd.f32 %v11830_v4, %v11829_v62  ;;  %v11853_v9 = vadd.f32 %v11852_v5, %v11851_v63  ;;  %11895 = vmatprep.subr.bf16.mxu1 %v13326_v61 }
 0x1bd   :  { %v11832_v10 = vpop.f32.mrf.mxu0  ;;  %v11854_v11 = vpop.f32.mrf.mxu1 }
 0x1be   :  { %v885_v13 = vadd.f32 %v11853_v9, %v11831_v8 }
 0x1bf   :  { %v11833_v16 = vpop.f32.mrf.mxu0  ;;  %v11855_v17 = vpop.f32.mrf.mxu1  ;;  %11896 = vmatpush3.bf16.msra.mxu1 %v13327_v0 }
 0x1c0   :  { %v890_v18 = vpack.c.bf16 %v885_v13, %v885_v13  ;;  %11897 = vmatprep.subr.bf16.mxu1 %v13328_v1 }
 0x1c2   :  { %v905_v21 = vsel %vm903_vm2, %v890_v18, 0 }
 0x1c3   :  { %12703 = vmatpush3.bf16.msra.mxu0 %v905_v21  ;;  %11898 = vmatpush3.bf16.msra.mxu1 %v13329_v12 }
 0x1c4   :  { %11861 = vmatprep.subr.bf16.mxu0 %v13331_v14  ;;  %11907 = vmatprep.subr.bf16.mxu1 %v13333_v15 }
 0x1c6   :  { %12705 = vmatmul.mubr.msk.bf16.vlgmr.msra.gmra.mxu0 %vm899_vm3, %v13330_v19  ;;  %1330 = vmatmul.mubr.bf16.vlgmr.msra.gmra.mxu1 %v14203_v7 }
 0x1c7   :  { %11862 = vmatpush3.bf16.msra.mxu0 %v13332_v20  ;;  %1289 = vmatprep.mubr.bf16.mxu0 %v14191_v2 }
 0x1c8   :  { %11908 = vmatpush3.bf16.msra.mxu1 %v13334_v22  ;;  %1684 = vmatprep.mubr.bf16.mxu1 %v14191_v2 }
 0x1c9   :  { %11863 = vmatprep.subr.bf16.mxu0 %v13335_v23  ;;  %11909 = vmatprep.subr.bf16.mxu1 %v13337_v24 }
 0x1cb   :  { %11864 = vmatpush3.bf16.msra.mxu0 %v13336_v25 }
 0x1cc   :  { %11910 = vmatpush3.bf16.msra.mxu1 %v13338_v26  ;;  %11865 = vmatprep.subr.bf16.mxu0 %v13339_v27 }
 0x1cd   :  { %11911 = vmatprep.subr.bf16.mxu1 %v13341_v28 }
 0x1cf   :  { %11866 = vmatpush3.bf16.msra.mxu0 %v13340_v29 }
 0x1d0   :  { %11912 = vmatpush3.bf16.msra.mxu1 %v13342_v30  ;;  %11867 = vmatprep.subr.bf16.mxu0 %v13343_v31 }
 0x1d1   :  { %11913 = vmatprep.subr.bf16.mxu1 %v13345_v32 }
 0x1d3   :  { %11868 = vmatpush3.bf16.msra.mxu0 %v13344_v33 }
 0x1d4   :  { %11914 = vmatpush3.bf16.msra.mxu1 %v13346_v35  ;;  %11869 = vmatprep.subr.bf16.mxu0 %v13347_v36 }
 0x1d5   :  { %11915 = vmatprep.subr.bf16.mxu1 %v13349_v37 }
 0x1d7   :  { %11870 = vmatpush3.bf16.msra.mxu0 %v13348_v38 }
 0x1d8   :  { %11916 = vmatpush3.bf16.msra.mxu1 %v13350_v39  ;;  %11871 = vmatprep.subr.bf16.mxu0 %v13351_v40 }
 0x1d9   :  { %11917 = vmatprep.subr.bf16.mxu1 %v13353_v41 }
 0x1db   :  { %11872 = vmatpush3.bf16.msra.mxu0 %v13352_v42 }
 0x1dc   :  { %11918 = vmatpush3.bf16.msra.mxu1 %v13354_v43  ;;  %11873 = vmatprep.subr.bf16.mxu0 %v13355_v44 }
 0x1dd   :  { %11919 = vmatprep.subr.bf16.mxu1 %v13357_v45 }
 0x1df   :  { %11874 = vmatpush3.bf16.msra.mxu0 %v13356_v46 }
 0x1e0   :  { %11920 = vmatpush3.bf16.msra.mxu1 %v13358_v47  ;;  %11875 = vmatprep.subr.bf16.mxu0 %v13359_v48 }
 0x1e1   :  { %11921 = vmatprep.subr.bf16.mxu1 %v13361_v49 }
 0x1e3   :  { %11876 = vmatpush3.bf16.msra.mxu0 %v13360_v50 }
 0x1e4   :  { %11922 = vmatpush3.bf16.msra.mxu1 %v13362_v51  ;;  %12714 = vmatprep.subr.bf16.mxu0 %v13976_v34 }
 0x1e5   :  { %12720 = vmatprep.subr.bf16.mxu1 %v13976_v34 }
 0x1e6   :  { %1290 = vmatmul.mubr.bf16.vlgmr.msra.gmra.mxu0 %v14201_v6 }
 0x1e7   :  { %1685 = vmatmul.mubr.bf16.vlgmr.msra.gmra.mxu1 %v14201_v6  ;;  %12716 = vmatprep.mubr.msk.bf16.mxu0 %vm13977_vm1, %v13976_v34 }
 0x1e8   :  { %12722 = vmatprep.mubr.msk.bf16.mxu1 %vm13977_vm1, %v13976_v34 }
 0x1e9   :  { %17 = vsyncpa [#allocation3], 0  ;;  %v13364_v19 = vld [vmem:[%s16704_s2 + $0x3f8] sm:$0xff]   ;;  %v13363_v21 = vld [vmem:[%s16705_s3 + $0x10] sm:$0xff]   ;;  %vm6823_vm4 = vcmask 130048   ;;  %vm9486_vm5 = vcmask 261120  }
 0x1ea   :  { %v13365_v22 = vld [vmem:[%s16704_s2 + $0x3b8] sm:$0xff]   ;;  %v13366_v23 = vld [vmem:[%s16704_s2 + $0x3f0] sm:$0xff]   ;;  %v13368_v25 = vld [vmem:[%s16704_s2 + $0x3e8] sm:$0xff]   ;;  %vm9711_vm6 = vcmask 8192  }
 0x1eb   :  { %v13367_v24 = vld [vmem:[%s16704_s2 + $0x3b0] sm:$0xff]   ;;  %v13369_v26 = vld [vmem:[%s16704_s2 + $0x3a8] sm:$0xff]   ;;  %v13370_v27 = vld [vmem:[%s16704_s2 + $0x3e0] sm:$0xff]  }
 0x1ec   :  { %v13371_v28 = vld [vmem:[%s16704_s2 + $0x3a0] sm:$0xff]   ;;  %v13372_v29 = vld [vmem:[%s16704_s2 + $0x3d8] sm:$0xff]   ;;  %v13374_v31 = vld [vmem:[%s16704_s2 + $0x3d0] sm:$0xff]  }
 0x1ed   :  { %v13373_v30 = vld [vmem:[%s16704_s2 + $0x398] sm:$0xff]   ;;  %v13375_v32 = vld [vmem:[%s16704_s2 + $0x390] sm:$0xff]   ;;  %v13376_v33 = vld [vmem:[%s16704_s2 + $0x3c8] sm:$0xff]  }
 0x1ee   :  { %v13377_v35 = vld [vmem:[%s16704_s2 + $0x388] sm:$0xff]   ;;  %v13378_v36 = vld [vmem:[%s16704_s2 + $0x3c0] sm:$0xff]   ;;  %v13380_v38 = vld [vmem:[%s16704_s2 + $0x478] sm:$0xff]  }
 0x1ef   :  { %v13379_v37 = vld [vmem:[%s16704_s2 + $0x380] sm:$0xff]   ;;  %v13381_v39 = vld [vmem:[%s16704_s2 + $0x438] sm:$0xff]   ;;  %v13382_v40 = vld [vmem:[%s16704_s2 + $0x470] sm:$0xff]  }
 0x1f0   :  { %v13383_v41 = vld [vmem:[%s16704_s2 + $0x430] sm:$0xff]   ;;  %v13384_v42 = vld [vmem:[%s16704_s2 + $0x468] sm:$0xff]   ;;  %v13386_v44 = vld [vmem:[%s16704_s2 + $0x460] sm:$0xff]  }
 0x1f1   :  { %v13385_v43 = vld [vmem:[%s16704_s2 + $0x428] sm:$0xff]   ;;  %v13387_v45 = vld [vmem:[%s16704_s2 + $0x420] sm:$0xff]   ;;  %v13388_v46 = vld [vmem:[%s16704_s2 + $0x458] sm:$0xff]  }
 0x1f2   :  { %v13389_v47 = vld [vmem:[%s16704_s2 + $0x418] sm:$0xff]   ;;  %v13390_v48 = vld [vmem:[%s16704_s2 + $0x450] sm:$0xff]   ;;  %v13392_v50 = vld [vmem:[%s16704_s2 + $0x448] sm:$0xff]  }
 0x1f3   :  { %v13391_v49 = vld [vmem:[%s16704_s2 + $0x410] sm:$0xff]   ;;  %v13393_v51 = vld [vmem:[%s16704_s2 + $0x408] sm:$0xff]  }
 0x266   :  { %v993_v52 = vpop.f32.mrf.mxu1 }
 0x268   :  { %v12712_v53 = vpop.f32.mrf.mxu1 }
 0x269   :  { %v13395_v53 = vld [vmem:[%s16704_s2 + $0x400] sm:$0xff]  }
 0x26a   :  { %v996_v54 = vpop.f32.mrf.mxu1 }
 0x26c   :  { %v12713_v55 = vpop.f32.mrf.mxu1 }
 0x286   :  { %v941_v56 = vpop.f32.mrf.mxu0  ;;  %v11899_v57 = vpop.f32.mrf.mxu1 }
 0x287   :  { %v14463_v58 = vadd.f32 %v993_v52, %v941_v56  ;;  %v13394_v52 = vld [vmem:[%s16704_s2 + $0x440] sm:$0xff]  }
 0x288   :  { %v12706_v59 = vpop.f32.mrf.mxu0  ;;  %v11900_v60 = vpop.f32.mrf.mxu1 }
 0x289   :  { %v11901_v9 = vadd.f32 %v11900_v60, %v11899_v57 }
 0x28a   :  { %v944_v61 = vpop.f32.mrf.mxu0  ;;  %v11902_v62 = vpop.f32.mrf.mxu1 }
 0x28b   :  { %v14465_v63 = vadd.f32 %v996_v54, %v944_v61 }
 0x28c   :  { %v12707_v0 = vpop.f32.mrf.mxu0  ;;  %v11903_v1 = vpop.f32.mrf.mxu1 }
 0x2a6   :  { %v11877_v4 = vpop.f32.mrf.mxu0 }
 0x2a7   :  { %v11923_v5 = vpop.f32.mrf.mxu1 }
 0x2a8   :  { %v11878_v8 = vpop.f32.mrf.mxu0 }
 0x2a9   :  { %v11879_v10 = vadd.f32 %v11878_v8, %v11877_v4  ;;  %v11924_v11 = vpop.f32.mrf.mxu1 }
 0x2aa   :  { %v14467_v12 = vadd.f32 %v11924_v11, %v11923_v5  ;;  %v11880_v13 = vpop.f32.mrf.mxu0  ;;  %v13399_v11 = vld [vmem:[%s16704_s2 + $0x4f0] sm:$0xff]  }
 0x2ab   :  { %v1332_v14 = vadd.f32 %v11901_v9, %v11879_v10  ;;  %v11926_v15 = vpop.f32.mrf.mxu1  ;;  %v13397_v9 = vld [vmem:[%s16704_s2 + $0x4f8] sm:$0xff]   ;;  %v13401_v13 = vld [vmem:[%s16704_s2 + $0x4e8] sm:$0xff]  }
 0x2ac   :  { %v11881_v16 = vpop.f32.mrf.mxu0  ;;  %v13398_v10 = vld [vmem:[%s16704_s2 + $0x4b8] sm:$0xff]   ;;  %v13403_v15 = vld [vmem:[%s16704_s2 + $0x4e0] sm:$0xff]  }
 0x2ad   :  { %v1337_v17 = vpack.c.bf16 %v1332_v14, %v1332_v14  ;;  %v11927_v18 = vpop.f32.mrf.mxu1  ;;  %v13402_v14 = vld [vmem:[%s16704_s2 + $0x4a8] sm:$0xff]   ;;  %v13404_v16 = vld [vmem:[%s16704_s2 + $0x4a0] sm:$0xff]  }
 0x2ae   :  { %v13406_v18 = vld [vmem:[%s16704_s2 + $0x498] sm:$0xff]  }
 0x2af   :  { %v1350_v20 = vsel %vm903_vm2, %v1337_v17, 0  ;;  %v13405_v17 = vld [vmem:[%s16704_s2 + $0x4d8] sm:$0xff]  }
 0x2b0   :  { %12715 = vmatpush3.bf16.msra.mxu0 %v1350_v20  ;;  %v13408_v20 = vld [vmem:[%s16704_s2 + $0x490] sm:$0xff]  }
 0x2b1   :  { %11929 = vmatprep.subr.bf16.mxu0 %v13364_v19  ;;  %v13407_v19 = vld [vmem:[%s16704_s2 + $0x4d0] sm:$0xff]  }
 0x2b3   :  { %12717 = vmatmul.mubr.msk.bf16.vlgmr.msra.gmra.mxu0 %vm899_vm3, %v13363_v21  ;;  %v13409_v21 = vld [vmem:[%s16704_s2 + $0x4c8] sm:$0xff]  }
 0x2b4   :  { %11930 = vmatpush3.bf16.msra.mxu0 %v13365_v22  ;;  %1724 = vmatprep.mubr.bf16.mxu0 %v14193_v3 }
 0x2b5   :  { %11931 = vmatprep.subr.bf16.mxu0 %v13366_v23 }
 0x2b8   :  { %11932 = vmatpush3.bf16.msra.mxu0 %v13367_v24  ;;  %v13410_v24 = vld [vmem:[%s16704_s2 + $0x488] sm:$0xff]  }
 0x2b9   :  { %11933 = vmatprep.subr.bf16.mxu0 %v13368_v25 }
 0x2bc   :  { %11934 = vmatpush3.bf16.msra.mxu0 %v13369_v26  ;;  %v13411_v26 = vld [vmem:[%s16704_s2 + $0x4c0] sm:$0xff]  }
 0x2bd   :  { %11935 = vmatprep.subr.bf16.mxu0 %v13370_v27 }
 0x2c0   :  { %11936 = vmatpush3.bf16.msra.mxu0 %v13371_v28 }
 0x2c1   :  { %11937 = vmatprep.subr.bf16.mxu0 %v13372_v29  ;;  %v13412_v29 = vld [vmem:[%s16704_s2 + $0x480] sm:$0xff]  }
 0x2c4   :  { %11938 = vmatpush3.bf16.msra.mxu0 %v13373_v30  ;;  %v13413_v30 = vld [vmem:[%s16704_s2 + $0x578] sm:$0xff]  }
 0x2c5   :  { %11939 = vmatprep.subr.bf16.mxu0 %v13374_v31  ;;  %v13414_v31 = vld [vmem:[%s16704_s2 + $0x538] sm:$0xff]  }
 0x2c8   :  { %11940 = vmatpush3.bf16.msra.mxu0 %v13375_v32  ;;  %v13415_v32 = vld [vmem:[%s16704_s2 + $0x570] sm:$0xff]  }
 0x2c9   :  { %11941 = vmatprep.subr.bf16.mxu0 %v13376_v33  ;;  %v13416_v33 = vld [vmem:[%s16704_s2 + $0x530] sm:$0xff]  }
 0x2cc   :  { %11942 = vmatpush3.bf16.msra.mxu0 %v13377_v35  ;;  %v13417_v35 = vld [vmem:[%s16704_s2 + $0x568] sm:$0xff]  }
 0x2cd   :  { %11943 = vmatprep.subr.bf16.mxu0 %v13378_v36  ;;  %v13418_v36 = vld [vmem:[%s16704_s2 + $0x528] sm:$0xff]  }
 0x2d0   :  { %11944 = vmatpush3.bf16.msra.mxu0 %v13379_v37  ;;  %v13419_v37 = vld [vmem:[%s16704_s2 + $0x560] sm:$0xff]  }
 0x2d1   :  { %11953 = vmatprep.subr.bf16.mxu0 %v13380_v38  ;;  %v13420_v38 = vld [vmem:[%s16704_s2 + $0x520] sm:$0xff]  }
 0x2d3   :  { %1725 = vmatmul.mubr.bf16.vlgmr.msra.gmra.mxu0 %v14203_v7 }
 0x2d4   :  { %11954 = vmatpush3.bf16.msra.mxu0 %v13381_v39  ;;  %2079 = vmatprep.mubr.bf16.mxu0 %v14191_v2  ;;  %v13421_v39 = vld [vmem:[%s16704_s2 + $0x558] sm:$0xff]  }
 0x2d5   :  { %11955 = vmatprep.subr.bf16.mxu0 %v13382_v40  ;;  %v13422_v40 = vld [vmem:[%s16704_s2 + $0x518] sm:$0xff]  }
 0x2d8   :  { %11956 = vmatpush3.bf16.msra.mxu0 %v13383_v41  ;;  %v13423_v41 = vld [vmem:[%s16704_s2 + $0x550] sm:$0xff]  }
 0x2d9   :  { %11957 = vmatprep.subr.bf16.mxu0 %v13384_v42  ;;  %v13424_v42 = vld [vmem:[%s16704_s2 + $0x510] sm:$0xff]  }
 0x2dc   :  { %11958 = vmatpush3.bf16.msra.mxu0 %v13385_v43  ;;  %v13425_v43 = vld [vmem:[%s16704_s2 + $0x548] sm:$0xff]  }
 0x2dd   :  { %11959 = vmatprep.subr.bf16.mxu0 %v13386_v44  ;;  %v13426_v44 = vld [vmem:[%s16704_s2 + $0x508] sm:$0xff]  }
 0x2e0   :  { %11960 = vmatpush3.bf16.msra.mxu0 %v13387_v45  ;;  %v13427_v45 = vld [vmem:[%s16704_s2 + $0x540] sm:$0xff]  }
 0x2e1   :  { %11961 = vmatprep.subr.bf16.mxu0 %v13388_v46  ;;  %v13428_v46 = vld [vmem:[%s16704_s2 + $0x500] sm:$0xff]  }
 0x2e4   :  { %11962 = vmatpush3.bf16.msra.mxu0 %v13389_v47 }
 0x2e5   :  { %11963 = vmatprep.subr.bf16.mxu0 %v13390_v48 }
 0x2e8   :  { %11964 = vmatpush3.bf16.msra.mxu0 %v13391_v49 }
 0x2e9   :  { %11965 = vmatprep.subr.bf16.mxu0 %v13392_v50 }
 0x2ec   :  { %11966 = vmatpush3.bf16.msra.mxu0 %v13393_v51 }
 0x2ed   :  { %11967 = vmatprep.subr.bf16.mxu0 %v13394_v52 }
 0x2f0   :  { %11968 = vmatpush3.bf16.msra.mxu0 %v13395_v53 }
 0x2f1   :  { %12726 = vmatprep.subr.bf16.mxu0 %v13976_v34 }
 0x2f3   :  { %2080 = vmatmul.mubr.bf16.vlgmr.msra.gmra.mxu0 %v14201_v6 }
 0x2f4   :  { %12728 = vmatprep.mubr.msk.bf16.mxu0 %vm13977_vm1, %v13976_v34 }
 0x373   :  { %v1386_v54 = vpop.f32.mrf.mxu0 }
 0x374   :  { %v14578_v55 = vadd.f32 %v1386_v54, %v14463_v58 }
 0x375   :  { %v12718_v56 = vpop.f32.mrf.mxu0 }
 0x377   :  { %v1389_v57 = vpop.f32.mrf.mxu0 }
 0x378   :  { %v14581_v59 = vadd.f32 %v1389_v57, %v14465_v63  ;;  %v13396_v63 = vld [vmem:[%s16705_s3 + $0x18] sm:$0xff]  }
 0x379   :  { %v12719_v60 = vpop.f32.mrf.mxu0 }
 0x393   :  { %v11945_v61 = vpop.f32.mrf.mxu0 }
 0x395   :  { %v11946_v62 = vpop.f32.mrf.mxu0 }
 0x396   :  { %v11947_v0 = vadd.f32 %v11946_v62, %v11945_v61 }
 0x397   :  { %v11948_v1 = vpop.f32.mrf.mxu0 }
 0x398   :  { %v1727_v4 = vadd.f32 %v11947_v0, %v14467_v12  ;;  %v13400_v12 = vld [vmem:[%s16704_s2 + $0x4b0] sm:$0xff]   ;;  %v13430_v0 = vld [vmem:[%s16704_s2 + $0x5f8] sm:$0xff]   ;;  %v13429_v1 = vld [vmem:[%s16705_s3 + $0x20] sm:$0xff]  }
 0x399   :  { %v11949_v5 = vpop.f32.mrf.mxu0 }
 0x39a   :  { %v1732_v8 = vpack.c.bf16 %v1727_v4, %v1727_v4  ;;  %v13432_v4 = vld [vmem:[%s16704_s2 + $0x5f0] sm:$0xff]  }
 0x39b   :  { %v13433_v5 = vld [vmem:[%s16704_s2 + $0x5b0] sm:$0xff]  }
 0x39c   :  { %v1745_v58 = vsel %vm903_vm2, %v1732_v8, 0  ;;  %v13434_v8 = vld [vmem:[%s16704_s2 + $0x5e8] sm:$0xff]  }
 0x39d   :  { %12721 = vmatpush3.bf16.msra.mxu1 %v1745_v58  ;;  %v13436_v58 = vld [vmem:[%s16704_s2 + $0x5e0] sm:$0xff]  }
 0x39e   :  { %11975 = vmatprep.subr.bf16.mxu1 %v13397_v9  ;;  %v13435_v9 = vld [vmem:[%s16704_s2 + $0x5a8] sm:$0xff]  }
 0x3a0   :  { %12723 = vmatmul.mubr.msk.bf16.vlgmr.msra.gmra.mxu1 %vm899_vm3, %v13396_v63  ;;  %v13437_v63 = vld [vmem:[%s16704_s2 + $0x5a0] sm:$0xff]  }
 0x3a1   :  { %11976 = vmatpush3.bf16.msra.mxu1 %v13398_v10  ;;  %2119 = vmatprep.mubr.bf16.mxu1 %v14193_v3  ;;  %v13438_v10 = vld [vmem:[%s16704_s2 + $0x5d8] sm:$0xff]  }
 0x3a2   :  { %11977 = vmatprep.subr.bf16.mxu1 %v13399_v11  ;;  %v13439_v11 = vld [vmem:[%s16704_s2 + $0x598] sm:$0xff]  }
 0x3a5   :  { %11978 = vmatpush3.bf16.msra.mxu1 %v13400_v12  ;;  %v13440_v12 = vld [vmem:[%s16704_s2 + $0x5d0] sm:$0xff]  }
 0x3a6   :  { %11979 = vmatprep.subr.bf16.mxu1 %v13401_v13  ;;  %v13441_v13 = vld [vmem:[%s16704_s2 + $0x590] sm:$0xff]  }
 0x3a9   :  { %11980 = vmatpush3.bf16.msra.mxu1 %v13402_v14  ;;  %v13442_v14 = vld [vmem:[%s16704_s2 + $0x5c8] sm:$0xff]  }
 0x3aa   :  { %11981 = vmatprep.subr.bf16.mxu1 %v13403_v15 }
 0x3ad   :  { %11982 = vmatpush3.bf16.msra.mxu1 %v13404_v16 }
 0x3ae   :  { %11983 = vmatprep.subr.bf16.mxu1 %v13405_v17  ;;  %v13443_v17 = vld [vmem:[%s16704_s2 + $0x588] sm:$0xff]  }
 0x3b1   :  { %11984 = vmatpush3.bf16.msra.mxu1 %v13406_v18 }
 0x3b2   :  { %11985 = vmatprep.subr.bf16.mxu1 %v13407_v19  ;;  %v13444_v19 = vld [vmem:[%s16704_s2 + $0x5c0] sm:$0xff]  }
 0x3b3   :  { %v11969_v22 = vpop.f32.mrf.mxu0 }
 0x3b5   :  { %v11970_v23 = vpop.f32.mrf.mxu0  ;;  %11986 = vmatpush3.bf16.msra.mxu1 %v13408_v20 }
 0x3b6   :  { %v11971_v25 = vadd.f32 %v11970_v23, %v11969_v22  ;;  %11987 = vmatprep.subr.bf16.mxu1 %v13409_v21  ;;  %v13445_v22 = vld [vmem:[%s16704_s2 + $0x580] sm:$0xff]   ;;  %v13446_v23 = vld [vmem:[%s16704_s2 + $0x678] sm:$0xff]  }
 0x3b7   :  { %v11972_v27 = vpop.f32.mrf.mxu0 }
 0x3b8   :  { %v13450_v27 = vld [vmem:[%s16704_s2 + $0x668] sm:$0xff]  }
 0x3b9   :  { %v11973_v28 = vpop.f32.mrf.mxu0  ;;  %11988 = vmatpush3.bf16.msra.mxu1 %v13410_v24  ;;  %v13447_v24 = vld [vmem:[%s16704_s2 + $0x638] sm:$0xff]  }
 0x3ba   :  { %11989 = vmatprep.subr.bf16.mxu1 %v13411_v26  ;;  %v13449_v26 = vld [vmem:[%s16704_s2 + $0x630] sm:$0xff]   ;;  %v13451_v28 = vld [vmem:[%s16704_s2 + $0x628] sm:$0xff]  }
 0x3bd   :  { %11990 = vmatpush3.bf16.msra.mxu1 %v13412_v29  ;;  %v13452_v29 = vld [vmem:[%s16704_s2 + $0x660] sm:$0xff]  }
 0x3be   :  { %11999 = vmatprep.subr.bf16.mxu1 %v13413_v30  ;;  %v13453_v30 = vld [vmem:[%s16704_s2 + $0x620] sm:$0xff]  }
 0x3c0   :  { %2120 = vmatmul.mubr.bf16.vlgmr.msra.gmra.mxu1 %v14203_v7 }
 0x3c1   :  { %12000 = vmatpush3.bf16.msra.mxu1 %v13414_v31  ;;  %2474 = vmatprep.mubr.bf16.mxu1 %v14191_v2  ;;  %v13454_v31 = vld [vmem:[%s16704_s2 + $0x658] sm:$0xff]  }
 0x3c2   :  { %12001 = vmatprep.subr.bf16.mxu1 %v13415_v32  ;;  %v13455_v32 = vld [vmem:[%s16704_s2 + $0x618] sm:$0xff]  }
 0x3c5   :  { %12002 = vmatpush3.bf16.msra.mxu1 %v13416_v33  ;;  %v13456_v33 = vld [vmem:[%s16704_s2 + $0x650] sm:$0xff]  }
 0x3c6   :  { %12003 = vmatprep.subr.bf16.mxu1 %v13417_v35  ;;  %v13457_v35 = vld [vmem:[%s16704_s2 + $0x610] sm:$0xff]  }
 0x3c9   :  { %12004 = vmatpush3.bf16.msra.mxu1 %v13418_v36  ;;  %v13458_v36 = vld [vmem:[%s16704_s2 + $0x648] sm:$0xff]  }
 0x3ca   :  { %12005 = vmatprep.subr.bf16.mxu1 %v13419_v37  ;;  %v13459_v37 = vld [vmem:[%s16704_s2 + $0x608] sm:$0xff]  }
 0x3cd   :  { %12006 = vmatpush3.bf16.msra.mxu1 %v13420_v38  ;;  %v13460_v38 = vld [vmem:[%s16704_s2 + $0x640] sm:$0xff]  }
 0x3ce   :  { %12007 = vmatprep.subr.bf16.mxu1 %v13421_v39  ;;  %v13461_v39 = vld [vmem:[%s16704_s2 + $0x600] sm:$0xff]  }
 0x3d1   :  { %12008 = vmatpush3.bf16.msra.mxu1 %v13422_v40 }
 0x3d2   :  { %12009 = vmatprep.subr.bf16.mxu1 %v13423_v41 }
 0x3d5   :  { %12010 = vmatpush3.bf16.msra.mxu1 %v13424_v42 }
 0x3d6   :  { %12011 = vmatprep.subr.bf16.mxu1 %v13425_v43 }
 0x3d9   :  { %12012 = vmatpush3.bf16.msra.mxu1 %v13426_v44 }
 0x3da   :  { %12013 = vmatprep.subr.bf16.mxu1 %v13427_v45 }
 0x3dd   :  { %12014 = vmatpush3.bf16.msra.mxu1 %v13428_v46 }
 0x3de   :  { %12732 = vmatprep.subr.bf16.mxu1 %v13976_v34 }
 0x3e0   :  { %2475 = vmatmul.mubr.bf16.vlgmr.msra.gmra.mxu1 %v14201_v6 }
 0x3e1   :  { %12734 = vmatprep.mubr.msk.bf16.mxu1 %vm13977_vm1, %v13976_v34 }
 0x460   :  { %v1781_v47 = vpop.f32.mrf.mxu1 }
 0x461   :  { %v14693_v48 = vadd.f32 %v1781_v47, %v14578_v55 }
 0x462   :  { %v12724_v49 = vpop.f32.mrf.mxu1 }
 0x464   :  { %v1784_v50 = vpop.f32.mrf.mxu1 }
 0x465   :  { %v14696_v51 = vadd.f32 %v1784_v50, %v14581_v59  ;;  %v13431_v59 = vld [vmem:[%s16704_s2 + $0x5b8] sm:$0xff]  }
 0x466   :  { %v12725_v52 = vpop.f32.mrf.mxu1 }
 0x480   :  { %v11991_v53 = vpop.f32.mrf.mxu1 }
 0x482   :  { %v11992_v54 = vpop.f32.mrf.mxu1 }
 0x483   :  { %v11993_v56 = vadd.f32 %v11992_v54, %v11991_v53 }
 0x484   :  { %v11994_v57 = vpop.f32.mrf.mxu1 }
 0x485   :  { %v2122_v60 = vadd.f32 %v11993_v56, %v11971_v25  ;;  %v13448_v25 = vld [vmem:[%s16704_s2 + $0x670] sm:$0xff]   ;;  %v13463_v56 = vld [vmem:[%s16704_s2 + $0x6f8] sm:$0xff]   ;;  %v13462_v57 = vld [vmem:[%s16705_s3 + $0x28] sm:$0xff]  }
 0x486   :  { %v11995_v61 = vpop.f32.mrf.mxu1 }
 0x487   :  { %v2127_v62 = vpack.c.bf16 %v2122_v60, %v2122_v60  ;;  %v13465_v60 = vld [vmem:[%s16704_s2 + $0x6f0] sm:$0xff]  }
 0x488   :  { %v13466_v61 = vld [vmem:[%s16704_s2 + $0x6b0] sm:$0xff]  }
 0x489   :  { %v2140_v55 = vsel %vm903_vm2, %v2127_v62, 0  ;;  %v13467_v62 = vld [vmem:[%s16704_s2 + $0x6e8] sm:$0xff]  }
 0x48a   :  { %12727 = vmatpush3.bf16.msra.mxu0 %v2140_v55  ;;  %v13469_v55 = vld [vmem:[%s16704_s2 + $0x6e0] sm:$0xff]  }
 0x48b   :  { %12021 = vmatprep.subr.bf16.mxu0 %v13430_v0  ;;  %v13468_v0 = vld [vmem:[%s16704_s2 + $0x6a8] sm:$0xff]  }
 0x48d   :  { %12729 = vmatmul.mubr.msk.bf16.vlgmr.msra.gmra.mxu0 %vm899_vm3, %v13429_v1  ;;  %v13470_v1 = vld [vmem:[%s16704_s2 + $0x6a0] sm:$0xff]  }
 0x48e   :  { %12022 = vmatpush3.bf16.msra.mxu0 %v13431_v59  ;;  %2514 = vmatprep.mubr.bf16.mxu0 %v14193_v3  ;;  %v13471_v59 = vld [vmem:[%s16704_s2 + $0x6d8] sm:$0xff]  }
 0x48f   :  { %12023 = vmatprep.subr.bf16.mxu0 %v13432_v4  ;;  %v13472_v4 = vld [vmem:[%s16704_s2 + $0x698] sm:$0xff]  }
 0x492   :  { %12024 = vmatpush3.bf16.msra.mxu0 %v13433_v5  ;;  %v13473_v5 = vld [vmem:[%s16704_s2 + $0x6d0] sm:$0xff]  }
 0x493   :  { %12025 = vmatprep.subr.bf16.mxu0 %v13434_v8  ;;  %v13474_v8 = vld [vmem:[%s16704_s2 + $0x690] sm:$0xff]  }
 0x496   :  { %12026 = vmatpush3.bf16.msra.mxu0 %v13435_v9  ;;  %v13475_v9 = vld [vmem:[%s16704_s2 + $0x6c8] sm:$0xff]  }
 0x497   :  { %12027 = vmatprep.subr.bf16.mxu0 %v13436_v58 }
 0x49a   :  { %12028 = vmatpush3.bf16.msra.mxu0 %v13437_v63 }
 0x49b   :  { %12029 = vmatprep.subr.bf16.mxu0 %v13438_v10  ;;  %v13476_v10 = vld [vmem:[%s16704_s2 + $0x688] sm:$0xff]  }
 0x49e   :  { %12030 = vmatpush3.bf16.msra.mxu0 %v13439_v11 }
 0x49f   :  { %12031 = vmatprep.subr.bf16.mxu0 %v13440_v12  ;;  %v13477_v12 = vld [vmem:[%s16704_s2 + $0x6c0] sm:$0xff]  }
 0x4a0   :  { %v12015_v15 = vpop.f32.mrf.mxu1 }
 0x4a2   :  { %v12016_v16 = vpop.f32.mrf.mxu1  ;;  %12032 = vmatpush3.bf16.msra.mxu0 %v13441_v13 }
 0x4a3   :  { %v12017_v18 = vadd.f32 %v12016_v16, %v12015_v15  ;;  %12033 = vmatprep.subr.bf16.mxu0 %v13442_v14  ;;  %v13478_v15 = vld [vmem:[%s16704_s2 + $0x680] sm:$0xff]   ;;  %v13479_v16 = vld [vmem:[%s16704_s2 + $0x778] sm:$0xff]  }
 0x4a4   :  { %v12018_v20 = vpop.f32.mrf.mxu1 }
 0x4a5   :  { %v13483_v20 = vld [vmem:[%s16704_s2 + $0x768] sm:$0xff]  }
 0x4a6   :  { %v12019_v21 = vpop.f32.mrf.mxu1  ;;  %12034 = vmatpush3.bf16.msra.mxu0 %v13443_v17  ;;  %v13480_v17 = vld [vmem:[%s16704_s2 + $0x738] sm:$0xff]  }
 0x4a7   :  { %12035 = vmatprep.subr.bf16.mxu0 %v13444_v19  ;;  %v13482_v19 = vld [vmem:[%s16704_s2 + $0x730] sm:$0xff]   ;;  %v13484_v21 = vld [vmem:[%s16704_s2 + $0x728] sm:$0xff]  }
 0x4aa   :  { %12036 = vmatpush3.bf16.msra.mxu0 %v13445_v22  ;;  %v13485_v22 = vld [vmem:[%s16704_s2 + $0x760] sm:$0xff]  }
 0x4ab   :  { %12045 = vmatprep.subr.bf16.mxu0 %v13446_v23  ;;  %v13486_v23 = vld [vmem:[%s16704_s2 + $0x720] sm:$0xff]  }
 0x4ad   :  { %2515 = vmatmul.mubr.bf16.vlgmr.msra.gmra.mxu0 %v14203_v7 }
 0x4ae   :  { %12046 = vmatpush3.bf16.msra.mxu0 %v13447_v24  ;;  %2869 = vmatprep.mubr.bf16.mxu0 %v14191_v2  ;;  %v13487_v24 = vld [vmem:[%s16704_s2 + $0x758] sm:$0xff]  }
 0x4af   :  { %12047 = vmatprep.subr.bf16.mxu0 %v13448_v25  ;;  %v13488_v25 = vld [vmem:[%s16704_s2 + $0x718] sm:$0xff]  }
 0x4b2   :  { %12048 = vmatpush3.bf16.msra.mxu0 %v13449_v26  ;;  %v13489_v26 = vld [vmem:[%s16704_s2 + $0x750] sm:$0xff]  }
 0x4b3   :  { %12049 = vmatprep.subr.bf16.mxu0 %v13450_v27  ;;  %v13490_v27 = vld [vmem:[%s16704_s2 + $0x710] sm:$0xff]  }
 0x4b6   :  { %12050 = vmatpush3.bf16.msra.mxu0 %v13451_v28  ;;  %v13491_v28 = vld [vmem:[%s16704_s2 + $0x748] sm:$0xff]  }
 0x4b7   :  { %12051 = vmatprep.subr.bf16.mxu0 %v13452_v29  ;;  %v13492_v29 = vld [vmem:[%s16704_s2 + $0x708] sm:$0xff]  }
 0x4ba   :  { %12052 = vmatpush3.bf16.msra.mxu0 %v13453_v30  ;;  %v13493_v30 = vld [vmem:[%s16704_s2 + $0x740] sm:$0xff]  }
 0x4bb   :  { %12053 = vmatprep.subr.bf16.mxu0 %v13454_v31  ;;  %v13494_v31 = vld [vmem:[%s16704_s2 + $0x700] sm:$0xff]  }
 0x4be   :  { %12054 = vmatpush3.bf16.msra.mxu0 %v13455_v32 }
 0x4bf   :  { %12055 = vmatprep.subr.bf16.mxu0 %v13456_v33 }
 0x4c2   :  { %12056 = vmatpush3.bf16.msra.mxu0 %v13457_v35 }
 0x4c3   :  { %12057 = vmatprep.subr.bf16.mxu0 %v13458_v36 }
 0x4c6   :  { %12058 = vmatpush3.bf16.msra.mxu0 %v13459_v37 }
 0x4c7   :  { %12059 = vmatprep.subr.bf16.mxu0 %v13460_v38 }
 0x4ca   :  { %12060 = vmatpush3.bf16.msra.mxu0 %v13461_v39 }
 0x4cb   :  { %12738 = vmatprep.subr.bf16.mxu0 %v13976_v34 }
 0x4cd   :  { %2870 = vmatmul.mubr.bf16.vlgmr.msra.gmra.mxu0 %v14201_v6 }
 0x4ce   :  { %12740 = vmatprep.mubr.msk.bf16.mxu0 %vm13977_vm1, %v13976_v34 }
 0x54d   :  { %v2176_v40 = vpop.f32.mrf.mxu0 }
 0x54e   :  { %v14807_v41 = vadd.f32 %v2176_v40, %v14693_v48 }
 0x54f   :  { %v12730_v42 = vpop.f32.mrf.mxu0 }
 0x551   :  { %v2179_v43 = vpop.f32.mrf.mxu0 }
 0x552   :  { %v14810_v44 = vadd.f32 %v2179_v43, %v14696_v51  ;;  %v13464_v51 = vld [vmem:[%s16704_s2 + $0x6b8] sm:$0xff]  }
 0x553   :  { %v12731_v45 = vpop.f32.mrf.mxu0 }
 0x56d   :  { %v12037_v46 = vpop.f32.mrf.mxu0 }
 0x56f   :  { %v12038_v47 = vpop.f32.mrf.mxu0 }
 0x570   :  { %v12039_v49 = vadd.f32 %v12038_v47, %v12037_v46 }
 0x571   :  { %v12040_v50 = vpop.f32.mrf.mxu0 }
 0x572   :  { %v2517_v52 = vadd.f32 %v12039_v49, %v12017_v18  ;;  %v13481_v18 = vld [vmem:[%s16704_s2 + $0x770] sm:$0xff]   ;;  %v13496_v49 = vld [vmem:[%s16704_s2 + $0x7f8] sm:$0xff]  }
 0x573   :  { %v12041_v53 = vpop.f32.mrf.mxu0  ;;  %v13495_v50 = vld [vmem:[%s16705_s3 + $0x30] sm:$0xff]  }
 0x574   :  { %v2522_v54 = vpack.c.bf16 %v2517_v52, %v2517_v52  ;;  %v13498_v52 = vld [vmem:[%s16704_s2 + $0x7f0] sm:$0xff]  }
 0x575   :  { %v13499_v53 = vld [vmem:[%s16704_s2 + $0x7b0] sm:$0xff]  }
 0x576   :  { %v2535_v48 = vsel %vm903_vm2, %v2522_v54, 0  ;;  %v13500_v54 = vld [vmem:[%s16704_s2 + $0x7e8] sm:$0xff]  }
 0x577   :  { %12733 = vmatpush3.bf16.msra.mxu1 %v2535_v48  ;;  %v13502_v48 = vld [vmem:[%s16704_s2 + $0x7e0] sm:$0xff]  }
 0x578   :  { %12067 = vmatprep.subr.bf16.mxu1 %v13463_v56  ;;  %v13501_v56 = vld [vmem:[%s16704_s2 + $0x7a8] sm:$0xff]  }
 0x57a   :  { %12735 = vmatmul.mubr.msk.bf16.vlgmr.msra.gmra.mxu1 %vm899_vm3, %v13462_v57  ;;  %v13503_v57 = vld [vmem:[%s16704_s2 + $0x7a0] sm:$0xff]  }
 0x57b   :  { %12068 = vmatpush3.bf16.msra.mxu1 %v13464_v51  ;;  %2909 = vmatprep.mubr.bf16.mxu1 %v14193_v3  ;;  %v13504_v51 = vld [vmem:[%s16704_s2 + $0x7d8] sm:$0xff]  }
 0x57c   :  { %12069 = vmatprep.subr.bf16.mxu1 %v13465_v60  ;;  %v13505_v60 = vld [vmem:[%s16704_s2 + $0x798] sm:$0xff]  }
 0x57f   :  { %12070 = vmatpush3.bf16.msra.mxu1 %v13466_v61  ;;  %v13506_v61 = vld [vmem:[%s16704_s2 + $0x7d0] sm:$0xff]  }
 0x580   :  { %12071 = vmatprep.subr.bf16.mxu1 %v13467_v62  ;;  %v13507_v62 = vld [vmem:[%s16704_s2 + $0x790] sm:$0xff]  }
 0x583   :  { %12072 = vmatpush3.bf16.msra.mxu1 %v13468_v0  ;;  %v13508_v0 = vld [vmem:[%s16704_s2 + $0x7c8] sm:$0xff]  }
 0x584   :  { %12073 = vmatprep.subr.bf16.mxu1 %v13469_v55 }
 0x587   :  { %12074 = vmatpush3.bf16.msra.mxu1 %v13470_v1 }
 0x588   :  { %12075 = vmatprep.subr.bf16.mxu1 %v13471_v59  ;;  %v13509_v59 = vld [vmem:[%s16704_s2 + $0x788] sm:$0xff]  }
 0x58b   :  { %12076 = vmatpush3.bf16.msra.mxu1 %v13472_v4 }
 0x58c   :  { %12077 = vmatprep.subr.bf16.mxu1 %v13473_v5  ;;  %v13510_v5 = vld [vmem:[%s16704_s2 + $0x7c0] sm:$0xff]  }
 0x58d   :  { %v12061_v58 = vpop.f32.mrf.mxu0 }
 0x58f   :  { %v12062_v63 = vpop.f32.mrf.mxu0  ;;  %12078 = vmatpush3.bf16.msra.mxu1 %v13474_v8 }
 0x590   :  { %v12063_v11 = vadd.f32 %v12062_v63, %v12061_v58  ;;  %12079 = vmatprep.subr.bf16.mxu1 %v13475_v9  ;;  %v13511_v58 = vld [vmem:[%s16704_s2 + $0x780] sm:$0xff]   ;;  %v13512_v63 = vld [vmem:[%s16704_s2 + $0x878] sm:$0xff]  }
 0x591   :  { %v12064_v13 = vpop.f32.mrf.mxu0 }
 0x592   :  { %v13516_v13 = vld [vmem:[%s16704_s2 + $0x868] sm:$0xff]  }
 0x593   :  { %v12065_v14 = vpop.f32.mrf.mxu0  ;;  %12080 = vmatpush3.bf16.msra.mxu1 %v13476_v10  ;;  %v13513_v10 = vld [vmem:[%s16704_s2 + $0x838] sm:$0xff]  }
 0x594   :  { %12081 = vmatprep.subr.bf16.mxu1 %v13477_v12  ;;  %v13515_v12 = vld [vmem:[%s16704_s2 + $0x830] sm:$0xff]   ;;  %v13517_v14 = vld [vmem:[%s16704_s2 + $0x828] sm:$0xff]  }
 0x597   :  { %12082 = vmatpush3.bf16.msra.mxu1 %v13478_v15  ;;  %v13518_v15 = vld [vmem:[%s16704_s2 + $0x860] sm:$0xff]  }
 0x598   :  { %12091 = vmatprep.subr.bf16.mxu1 %v13479_v16  ;;  %v13519_v16 = vld [vmem:[%s16704_s2 + $0x820] sm:$0xff]  }
 0x59a   :  { %2910 = vmatmul.mubr.bf16.vlgmr.msra.gmra.mxu1 %v14203_v7 }
 0x59b   :  { %12092 = vmatpush3.bf16.msra.mxu1 %v13480_v17  ;;  %3264 = vmatprep.mubr.bf16.mxu1 %v14191_v2  ;;  %v13520_v17 = vld [vmem:[%s16704_s2 + $0x858] sm:$0xff]  }
 0x59c   :  { %12093 = vmatprep.subr.bf16.mxu1 %v13481_v18  ;;  %v13521_v18 = vld [vmem:[%s16704_s2 + $0x818] sm:$0xff]  }
 0x59f   :  { %12094 = vmatpush3.bf16.msra.mxu1 %v13482_v19  ;;  %v13522_v19 = vld [vmem:[%s16704_s2 + $0x850] sm:$0xff]  }
 0x5a0   :  { %12095 = vmatprep.subr.bf16.mxu1 %v13483_v20  ;;  %v13523_v20 = vld [vmem:[%s16704_s2 + $0x810] sm:$0xff]  }
 0x5a3   :  { %12096 = vmatpush3.bf16.msra.mxu1 %v13484_v21  ;;  %v13524_v21 = vld [vmem:[%s16704_s2 + $0x848] sm:$0xff]  }
 0x5a4   :  { %12097 = vmatprep.subr.bf16.mxu1 %v13485_v22  ;;  %v13525_v22 = vld [vmem:[%s16704_s2 + $0x808] sm:$0xff]  }
 0x5a7   :  { %12098 = vmatpush3.bf16.msra.mxu1 %v13486_v23  ;;  %v13526_v23 = vld [vmem:[%s16704_s2 + $0x840] sm:$0xff]  }
 0x5a8   :  { %12099 = vmatprep.subr.bf16.mxu1 %v13487_v24  ;;  %v13527_v24 = vld [vmem:[%s16704_s2 + $0x800] sm:$0xff]  }
 0x5ab   :  { %12100 = vmatpush3.bf16.msra.mxu1 %v13488_v25 }
 0x5ac   :  { %12101 = vmatprep.subr.bf16.mxu1 %v13489_v26 }
 0x5af   :  { %12102 = vmatpush3.bf16.msra.mxu1 %v13490_v27 }
 0x5b0   :  { %12103 = vmatprep.subr.bf16.mxu1 %v13491_v28 }
 0x5b3   :  { %12104 = vmatpush3.bf16.msra.mxu1 %v13492_v29 }
 0x5b4   :  { %12105 = vmatprep.subr.bf16.mxu1 %v13493_v30 }
 0x5b7   :  { %12106 = vmatpush3.bf16.msra.mxu1 %v13494_v31 }
 0x5b8   :  { %12744 = vmatprep.subr.bf16.mxu1 %v13976_v34 }
 0x5ba   :  { %3265 = vmatmul.mubr.bf16.vlgmr.msra.gmra.mxu1 %v14201_v6 }
 0x5bb   :  { %12746 = vmatprep.mubr.msk.bf16.mxu1 %vm13977_vm1, %v13976_v34 }
 0x63a   :  { %v2571_v32 = vpop.f32.mrf.mxu1 }
 0x63b   :  { %v14921_v33 = vadd.f32 %v2571_v32, %v14807_v41 }
 0x63c   :  { %v12736_v35 = vpop.f32.mrf.mxu1 }
 0x63e   :  { %v2574_v36 = vpop.f32.mrf.mxu1 }
 0x63f   :  { %v14924_v37 = vadd.f32 %v2574_v36, %v14810_v44  ;;  %v13497_v44 = vld [vmem:[%s16704_s2 + $0x7b8] sm:$0xff]  }
 0x640   :  { %v12737_v38 = vpop.f32.mrf.mxu1 }
 0x65a   :  { %v12083_v39 = vpop.f32.mrf.mxu1 }
 0x65c   :  { %v12084_v40 = vpop.f32.mrf.mxu1 }
 0x65d   :  { %v12085_v42 = vadd.f32 %v12084_v40, %v12083_v39 }
 0x65e   :  { %v12086_v43 = vpop.f32.mrf.mxu1 }
 0x65f   :  { %v2912_v45 = vadd.f32 %v12085_v42, %v12063_v11  ;;  %v13514_v11 = vld [vmem:[%s16704_s2 + $0x870] sm:$0xff]   ;;  %v13529_v42 = vld [vmem:[%s16704_s2 + $0x8f8] sm:$0xff]  }
 0x660   :  { %v12087_v46 = vpop.f32.mrf.mxu1  ;;  %v13528_v43 = vld [vmem:[%s16705_s3 + $0x38] sm:$0xff]  }
 0x661   :  { %v2917_v47 = vpack.c.bf16 %v2912_v45, %v2912_v45  ;;  %v13531_v45 = vld [vmem:[%s16704_s2 + $0x8f0] sm:$0xff]  }
 0x662   :  { %v13532_v46 = vld [vmem:[%s16704_s2 + $0x8b0] sm:$0xff]  }
 0x663   :  { %v2930_v41 = vsel %vm903_vm2, %v2917_v47, 0  ;;  %v13533_v47 = vld [vmem:[%s16704_s2 + $0x8e8] sm:$0xff]  }
 0x664   :  { %12739 = vmatpush3.bf16.msra.mxu0 %v2930_v41  ;;  %v13535_v41 = vld [vmem:[%s16704_s2 + $0x8e0] sm:$0xff]  }
 0x665   :  { %12113 = vmatprep.subr.bf16.mxu0 %v13496_v49  ;;  %v13534_v49 = vld [vmem:[%s16704_s2 + $0x8a8] sm:$0xff]  }
 0x667   :  { %12741 = vmatmul.mubr.msk.bf16.vlgmr.msra.gmra.mxu0 %vm899_vm3, %v13495_v50  ;;  %v13536_v50 = vld [vmem:[%s16704_s2 + $0x8a0] sm:$0xff]  }
 0x668   :  { %12114 = vmatpush3.bf16.msra.mxu0 %v13497_v44  ;;  %3304 = vmatprep.mubr.bf16.mxu0 %v14193_v3  ;;  %v13537_v44 = vld [vmem:[%s16704_s2 + $0x8d8] sm:$0xff]  }
 0x669   :  { %12115 = vmatprep.subr.bf16.mxu0 %v13498_v52  ;;  %v13538_v52 = vld [vmem:[%s16704_s2 + $0x898] sm:$0xff]  }
 0x66c   :  { %12116 = vmatpush3.bf16.msra.mxu0 %v13499_v53  ;;  %v13539_v53 = vld [vmem:[%s16704_s2 + $0x8d0] sm:$0xff]  }
 0x66d   :  { %12117 = vmatprep.subr.bf16.mxu0 %v13500_v54  ;;  %v13540_v54 = vld [vmem:[%s16704_s2 + $0x890] sm:$0xff]  }
 0x670   :  { %12118 = vmatpush3.bf16.msra.mxu0 %v13501_v56  ;;  %v13541_v56 = vld [vmem:[%s16704_s2 + $0x8c8] sm:$0xff]  }
 0x671   :  { %12119 = vmatprep.subr.bf16.mxu0 %v13502_v48 }
 0x674   :  { %12120 = vmatpush3.bf16.msra.mxu0 %v13503_v57 }
 0x675   :  { %12121 = vmatprep.subr.bf16.mxu0 %v13504_v51  ;;  %v13542_v51 = vld [vmem:[%s16704_s2 + $0x888] sm:$0xff]  }
 0x678   :  { %12122 = vmatpush3.bf16.msra.mxu0 %v13505_v60  ;;  %v13543_v60 = vld [vmem:[%s16704_s2 + $0x8c0] sm:$0xff]  }
 0x679   :  { %12123 = vmatprep.subr.bf16.mxu0 %v13506_v61 }
 0x67a   :  { %v12107_v55 = vpop.f32.mrf.mxu1 }
 0x67c   :  { %v12108_v1 = vpop.f32.mrf.mxu1  ;;  %12124 = vmatpush3.bf16.msra.mxu0 %v13507_v62 }
 0x67d   :  { %v12109_v4 = vadd.f32 %v12108_v1, %v12107_v55  ;;  %12125 = vmatprep.subr.bf16.mxu0 %v13508_v0  ;;  %v13544_v0 = vld [vmem:[%s16704_s2 + $0x880] sm:$0xff]   ;;  %v13545_v55 = vld [vmem:[%s16704_s2 + $0x978] sm:$0xff]  }
 0x67e   :  { %v12110_v8 = vpop.f32.mrf.mxu1  ;;  %v13546_v1 = vld [vmem:[%s16704_s2 + $0x938] sm:$0xff]  }
 0x67f   :  { %v13550_v8 = vld [vmem:[%s16704_s2 + $0x928] sm:$0xff]  }
 0x680   :  { %v12111_v9 = vpop.f32.mrf.mxu1  ;;  %12126 = vmatpush3.bf16.msra.mxu0 %v13509_v59  ;;  %v13547_v59 = vld [vmem:[%s16704_s2 + $0x970] sm:$0xff]  }
 0x681   :  { %12127 = vmatprep.subr.bf16.mxu0 %v13510_v5  ;;  %v13549_v5 = vld [vmem:[%s16704_s2 + $0x968] sm:$0xff]   ;;  %v13551_v9 = vld [vmem:[%s16704_s2 + $0x960] sm:$0xff]  }
 0x684   :  { %12128 = vmatpush3.bf16.msra.mxu0 %v13511_v58  ;;  %v13552_v58 = vld [vmem:[%s16704_s2 + $0x920] sm:$0xff]  }
 0x685   :  { %12137 = vmatprep.subr.bf16.mxu0 %v13512_v63  ;;  %v13553_v63 = vld [vmem:[%s16704_s2 + $0x958] sm:$0xff]  }
 0x687   :  { %3305 = vmatmul.mubr.bf16.vlgmr.msra.gmra.mxu0 %v14203_v7 }
 0x688   :  { %12138 = vmatpush3.bf16.msra.mxu0 %v13513_v10  ;;  %3659 = vmatprep.mubr.bf16.mxu0 %v14191_v2  ;;  %v13554_v10 = vld [vmem:[%s16704_s2 + $0x918] sm:$0xff]  }
 0x689   :  { %12139 = vmatprep.subr.bf16.mxu0 %v13514_v11  ;;  %v13555_v11 = vld [vmem:[%s16704_s2 + $0x950] sm:$0xff]  }
 0x68c   :  { %12140 = vmatpush3.bf16.msra.mxu0 %v13515_v12  ;;  %v13556_v12 = vld [vmem:[%s16704_s2 + $0x910] sm:$0xff]  }
 0x68d   :  { %12141 = vmatprep.subr.bf16.mxu0 %v13516_v13  ;;  %v13557_v13 = vld [vmem:[%s16704_s2 + $0x948] sm:$0xff]  }
 0x690   :  { %12142 = vmatpush3.bf16.msra.mxu0 %v13517_v14  ;;  %v13558_v14 = vld [vmem:[%s16704_s2 + $0x908] sm:$0xff]  }
 0x691   :  { %12143 = vmatprep.subr.bf16.mxu0 %v13518_v15  ;;  %v13559_v15 = vld [vmem:[%s16704_s2 + $0x940] sm:$0xff]  }
 0x694   :  { %12144 = vmatpush3.bf16.msra.mxu0 %v13519_v16  ;;  %v13560_v16 = vld [vmem:[%s16704_s2 + $0x900] sm:$0xff]  }
 0x695   :  { %12145 = vmatprep.subr.bf16.mxu0 %v13520_v17 }
 0x698   :  { %12146 = vmatpush3.bf16.msra.mxu0 %v13521_v18 }
 0x699   :  { %12147 = vmatprep.subr.bf16.mxu0 %v13522_v19 }
 0x69c   :  { %12148 = vmatpush3.bf16.msra.mxu0 %v13523_v20 }
 0x69d   :  { %12149 = vmatprep.subr.bf16.mxu0 %v13524_v21 }
 0x6a0   :  { %12150 = vmatpush3.bf16.msra.mxu0 %v13525_v22 }
 0x6a1   :  { %12151 = vmatprep.subr.bf16.mxu0 %v13526_v23 }
 0x6a4   :  { %12152 = vmatpush3.bf16.msra.mxu0 %v13527_v24 }
 0x6a5   :  { %12750 = vmatprep.subr.bf16.mxu0 %v13976_v34 }
 0x6a7   :  { %3660 = vmatmul.mubr.bf16.vlgmr.msra.gmra.mxu0 %v14201_v6 }
 0x6a8   :  { %12752 = vmatprep.mubr.msk.bf16.mxu0 %vm13977_vm1, %v13976_v34 }
 0x727   :  { %v2966_v25 = vpop.f32.mrf.mxu0 }
 0x728   :  { %v15035_v26 = vadd.f32 %v2966_v25, %v14921_v33 }
 0x729   :  { %v12742_v27 = vpop.f32.mrf.mxu0 }
 0x72b   :  { %v2969_v28 = vpop.f32.mrf.mxu0 }
 0x72c   :  { %v15038_v29 = vadd.f32 %v2969_v28, %v14924_v37  ;;  %v13530_v37 = vld [vmem:[%s16704_s2 + $0x8b8] sm:$0xff]  }
 0x72d   :  { %v12743_v30 = vpop.f32.mrf.mxu0 }
 0x747   :  { %v12129_v31 = vpop.f32.mrf.mxu0 }
 0x749   :  { %v12130_v32 = vpop.f32.mrf.mxu0 }
 0x74a   :  { %v12131_v35 = vadd.f32 %v12130_v32, %v12129_v31 }
 0x74b   :  { %v12132_v36 = vpop.f32.mrf.mxu0 }
 0x74c   :  { %v3307_v38 = vadd.f32 %v12131_v35, %v12109_v4  ;;  %v13548_v4 = vld [vmem:[%s16704_s2 + $0x930] sm:$0xff]   ;;  %v13562_v35 = vld [vmem:[%s16704_s2 + $0x9f8] sm:$0xff]  }
 0x74d   :  { %v12133_v39 = vpop.f32.mrf.mxu0  ;;  %v13563_v36 = vld [vmem:[%s16704_s2 + $0x9b8] sm:$0xff]  }
 0x74e   :  { %v3312_v40 = vpack.c.bf16 %v3307_v38, %v3307_v38  ;;  %v13564_v38 = vld [vmem:[%s16704_s2 + $0x9f0] sm:$0xff]  }
 0x74f   :  { %v13565_v39 = vld [vmem:[%s16704_s2 + $0x9b0] sm:$0xff]  }
 0x750   :  { %v3325_v33 = vsel %vm903_vm2, %v3312_v40, 0  ;;  %v13566_v40 = vld [vmem:[%s16704_s2 + $0x9e8] sm:$0xff]  }
 0x751   :  { %12745 = vmatpush3.bf16.msra.mxu1 %v3325_v33  ;;  %v13568_v33 = vld [vmem:[%s16704_s2 + $0x9e0] sm:$0xff]  }
 0x752   :  { %12159 = vmatprep.subr.bf16.mxu1 %v13529_v42  ;;  %v13567_v42 = vld [vmem:[%s16704_s2 + $0x9a8] sm:$0xff]  }
 0x754   :  { %12747 = vmatmul.mubr.msk.bf16.vlgmr.msra.gmra.mxu1 %vm899_vm3, %v13528_v43  ;;  %v13569_v43 = vld [vmem:[%s16704_s2 + $0x9a0] sm:$0xff]  }
 0x755   :  { %12160 = vmatpush3.bf16.msra.mxu1 %v13530_v37  ;;  %3699 = vmatprep.mubr.bf16.mxu1 %v14193_v3  ;;  %v13570_v37 = vld [vmem:[%s16704_s2 + $0x9d8] sm:$0xff]  }
 0x756   :  { %12161 = vmatprep.subr.bf16.mxu1 %v13531_v45  ;;  %v13571_v45 = vld [vmem:[%s16704_s2 + $0x998] sm:$0xff]  }
 0x759   :  { %12162 = vmatpush3.bf16.msra.mxu1 %v13532_v46  ;;  %v13572_v46 = vld [vmem:[%s16704_s2 + $0x9d0] sm:$0xff]  }
 0x75a   :  { %12163 = vmatprep.subr.bf16.mxu1 %v13533_v47  ;;  %v13573_v47 = vld [vmem:[%s16704_s2 + $0x990] sm:$0xff]  }
 0x75d   :  { %12164 = vmatpush3.bf16.msra.mxu1 %v13534_v49  ;;  %v13574_v49 = vld [vmem:[%s16704_s2 + $0x9c8] sm:$0xff]  }
 0x75e   :  { %12165 = vmatprep.subr.bf16.mxu1 %v13535_v41 }
 0x761   :  { %12166 = vmatpush3.bf16.msra.mxu1 %v13536_v50 }
 0x762   :  { %12167 = vmatprep.subr.bf16.mxu1 %v13537_v44  ;;  %v13575_v44 = vld [vmem:[%s16704_s2 + $0x988] sm:$0xff]  }
 0x765   :  { %12168 = vmatpush3.bf16.msra.mxu1 %v13538_v52 }
 0x766   :  { %12169 = vmatprep.subr.bf16.mxu1 %v13539_v53  ;;  %v13576_v53 = vld [vmem:[%s16704_s2 + $0x9c0] sm:$0xff]  }
 0x767   :  { %v12153_v48 = vpop.f32.mrf.mxu0 }
 0x769   :  { %v12154_v57 = vpop.f32.mrf.mxu0  ;;  %12170 = vmatpush3.bf16.msra.mxu1 %v13540_v54 }
 0x76a   :  { %12171 = vmatprep.subr.bf16.mxu1 %v13541_v56  ;;  %v12155_v25 = vadd.f32 %v12154_v57, %v12153_v48  ;;  %v13577_v48 = vld [vmem:[%s16704_s2 + $0x980] sm:$0xff]   ;;  %v13578_v57 = vld [vmem:[%s16704_s2 + $0xa78] sm:$0xff]  }
 0x76b   :  { %v12156_v61 = vpop.f32.mrf.mxu0 }
 0x76c   :  { %v13581_v61 = vld [vmem:[%s16704_s2 + $0xa30] sm:$0xff]  }
 0x76d   :  { %v12157_v62 = vpop.f32.mrf.mxu0  ;;  %12172 = vmatpush3.bf16.msra.mxu1 %v13542_v51  ;;  %v13579_v51 = vld [vmem:[%s16704_s2 + $0xa38] sm:$0xff]  }
 0x76e   :  { %12173 = vmatprep.subr.bf16.mxu1 %v13543_v60  ;;  %v13580_v60 = vld [vmem:[%s16704_s2 + $0xa70] sm:$0xff]   ;;  %v13582_v62 = vld [vmem:[%s16704_s2 + $0xa68] sm:$0xff]  }
 0x771   :  { %12174 = vmatpush3.bf16.msra.mxu1 %v13544_v0  ;;  %v13583_v0 = vld [vmem:[%s16704_s2 + $0xa28] sm:$0xff]  }
 0x772   :  { %12183 = vmatprep.subr.bf16.mxu1 %v13545_v55  ;;  %v13584_v55 = vld [vmem:[%s16704_s2 + $0xa60] sm:$0xff]  }
 0x774   :  { %3700 = vmatmul.mubr.bf16.vlgmr.msra.gmra.mxu1 %v14203_v7 }
 0x775   :  { %12184 = vmatpush3.bf16.msra.mxu1 %v13546_v1  ;;  %4054 = vmatprep.mubr.bf16.mxu1 %v14191_v2  ;;  %v13585_v1 = vld [vmem:[%s16704_s2 + $0xa20] sm:$0xff]  }
 0x776   :  { %12185 = vmatprep.subr.bf16.mxu1 %v13547_v59  ;;  %v13586_v59 = vld [vmem:[%s16704_s2 + $0xa58] sm:$0xff]  }
 0x779   :  { %12186 = vmatpush3.bf16.msra.mxu1 %v13548_v4  ;;  %v13587_v4 = vld [vmem:[%s16704_s2 + $0xa18] sm:$0xff]  }
 0x77a   :  { %12187 = vmatprep.subr.bf16.mxu1 %v13549_v5  ;;  %v13588_v5 = vld [vmem:[%s16704_s2 + $0xa50] sm:$0xff]  }
 0x77d   :  { %12188 = vmatpush3.bf16.msra.mxu1 %v13550_v8  ;;  %v13589_v8 = vld [vmem:[%s16704_s2 + $0xa10] sm:$0xff]  }
 0x77e   :  { %12189 = vmatprep.subr.bf16.mxu1 %v13551_v9  ;;  %v13590_v9 = vld [vmem:[%s16704_s2 + $0xa48] sm:$0xff]  }
 0x781   :  { %12190 = vmatpush3.bf16.msra.mxu1 %v13552_v58  ;;  %v13591_v58 = vld [vmem:[%s16704_s2 + $0xa08] sm:$0xff]  }
 0x782   :  { %12191 = vmatprep.subr.bf16.mxu1 %v13553_v63  ;;  %v13592_v63 = vld [vmem:[%s16704_s2 + $0xa40] sm:$0xff]  }
 0x785   :  { %12192 = vmatpush3.bf16.msra.mxu1 %v13554_v10  ;;  %v13593_v10 = vld [vmem:[%s16704_s2 + $0xa00] sm:$0xff]  }
 0x786   :  { %12193 = vmatprep.subr.bf16.mxu1 %v13555_v11 }
 0x789   :  { %12194 = vmatpush3.bf16.msra.mxu1 %v13556_v12 }
 0x78a   :  { %12195 = vmatprep.subr.bf16.mxu1 %v13557_v13 }
 0x78d   :  { %12196 = vmatpush3.bf16.msra.mxu1 %v13558_v14 }
 0x78e   :  { %12197 = vmatprep.subr.bf16.mxu1 %v13559_v15 }
 0x791   :  { %12198 = vmatpush3.bf16.msra.mxu1 %v13560_v16 }
 0x792   :  { %12756 = vmatprep.subr.bf16.mxu1 %v13976_v34 }
 0x794   :  { %4055 = vmatmul.mubr.bf16.vlgmr.msra.gmra.mxu1 %v14201_v6 }
 0x795   :  { %12758 = vmatprep.mubr.msk.bf16.mxu1 %vm13977_vm1, %v13976_v34 }
 0x814   :  { %v3361_v17 = vpop.f32.mrf.mxu1 }
 0x815   :  { %v15149_v18 = vadd.f32 %v3361_v17, %v15035_v26 }
 0x816   :  { %v12748_v19 = vpop.f32.mrf.mxu1 }
 0x818   :  { %v3364_v20 = vpop.f32.mrf.mxu1 }
 0x819   :  { %v15152_v21 = vadd.f32 %v3364_v20, %v15038_v29  ;;  %v13561_v29 = vld [vmem:[%s16705_s3 + $0x40] sm:$0xff]  }
 0x81a   :  { %v12749_v22 = vpop.f32.mrf.mxu1 }
 0x834   :  { %v12175_v23 = vpop.f32.mrf.mxu1 }
 0x836   :  { %v12176_v24 = vpop.f32.mrf.mxu1 }
 0x837   :  { %v12177_v27 = vadd.f32 %v12176_v24, %v12175_v23 }
 0x838   :  { %v12178_v28 = vpop.f32.mrf.mxu1 }
 0x839   :  { %v3702_v30 = vadd.f32 %v12177_v27, %v12155_v25  ;;  %v13595_v27 = vld [vmem:[%s16704_s2 + $0xaf8] sm:$0xff]   ;;  %v13594_v28 = vld [vmem:[%s16705_s3 + $0x48] sm:$0xff]  }
 0x83a   :  { %v12179_v31 = vpop.f32.mrf.mxu1 }
 0x83b   :  { %v3707_v32 = vpack.c.bf16 %v3702_v30, %v3702_v30  ;;  %v13597_v30 = vld [vmem:[%s16704_s2 + $0xaf0] sm:$0xff]  }
 0x83c   :  { %v13598_v31 = vld [vmem:[%s16704_s2 + $0xab0] sm:$0xff]  }
 0x83d   :  { %v3720_v26 = vsel %vm903_vm2, %v3707_v32, 0  ;;  %v13599_v32 = vld [vmem:[%s16704_s2 + $0xae8] sm:$0xff]  }
 0x83e   :  { %12751 = vmatpush3.bf16.msra.mxu0 %v3720_v26  ;;  %v13601_v26 = vld [vmem:[%s16704_s2 + $0xae0] sm:$0xff]  }
 0x83f   :  { %12205 = vmatprep.subr.bf16.mxu0 %v13562_v35  ;;  %v13600_v35 = vld [vmem:[%s16704_s2 + $0xaa8] sm:$0xff]  }
 0x841   :  { %12753 = vmatmul.mubr.msk.bf16.vlgmr.msra.gmra.mxu0 %vm899_vm3, %v13561_v29  ;;  %v13602_v29 = vld [vmem:[%s16704_s2 + $0xaa0] sm:$0xff]  }
 0x842   :  { %12206 = vmatpush3.bf16.msra.mxu0 %v13563_v36  ;;  %4094 = vmatprep.mubr.bf16.mxu0 %v14193_v3  ;;  %v13603_v36 = vld [vmem:[%s16704_s2 + $0xad8] sm:$0xff]  }
 0x843   :  { %12207 = vmatprep.subr.bf16.mxu0 %v13564_v38  ;;  %v13604_v38 = vld [vmem:[%s16704_s2 + $0xa98] sm:$0xff]  }
 0x846   :  { %12208 = vmatpush3.bf16.msra.mxu0 %v13565_v39  ;;  %v13605_v39 = vld [vmem:[%s16704_s2 + $0xad0] sm:$0xff]  }
 0x847   :  { %12209 = vmatprep.subr.bf16.mxu0 %v13566_v40  ;;  %v13606_v40 = vld [vmem:[%s16704_s2 + $0xa90] sm:$0xff]  }
 0x84a   :  { %12210 = vmatpush3.bf16.msra.mxu0 %v13567_v42  ;;  %v13607_v42 = vld [vmem:[%s16704_s2 + $0xac8] sm:$0xff]  }
 0x84b   :  { %12211 = vmatprep.subr.bf16.mxu0 %v13568_v33 }
 0x84e   :  { %12212 = vmatpush3.bf16.msra.mxu0 %v13569_v43 }
 0x84f   :  { %12213 = vmatprep.subr.bf16.mxu0 %v13570_v37  ;;  %v13608_v37 = vld [vmem:[%s16704_s2 + $0xa88] sm:$0xff]  }
 0x852   :  { %12214 = vmatpush3.bf16.msra.mxu0 %v13571_v45 }
 0x853   :  { %12215 = vmatprep.subr.bf16.mxu0 %v13572_v46  ;;  %v13609_v46 = vld [vmem:[%s16704_s2 + $0xac0] sm:$0xff]  }
 0x854   :  { %v12199_v41 = vpop.f32.mrf.mxu1 }
 0x856   :  { %v12200_v50 = vpop.f32.mrf.mxu1  ;;  %12216 = vmatpush3.bf16.msra.mxu0 %v13573_v47 }
 0x857   :  { %v12201_v52 = vadd.f32 %v12200_v50, %v12199_v41  ;;  %12217 = vmatprep.subr.bf16.mxu0 %v13574_v49  ;;  %v13610_v41 = vld [vmem:[%s16704_s2 + $0xa80] sm:$0xff]   ;;  %v13611_v50 = vld [vmem:[%s16704_s2 + $0xb78] sm:$0xff]  }
 0x858   :  { %v12202_v54 = vpop.f32.mrf.mxu1 }
 0x859   :  { %v13615_v54 = vld [vmem:[%s16704_s2 + $0xb68] sm:$0xff]  }
 0x85a   :  { %v12203_v56 = vpop.f32.mrf.mxu1  ;;  %12218 = vmatpush3.bf16.msra.mxu0 %v13575_v44  ;;  %v13612_v44 = vld [vmem:[%s16704_s2 + $0xb38] sm:$0xff]  }
 0x85b   :  { %12219 = vmatprep.subr.bf16.mxu0 %v13576_v53  ;;  %v13614_v53 = vld [vmem:[%s16704_s2 + $0xb30] sm:$0xff]   ;;  %v13616_v56 = vld [vmem:[%s16704_s2 + $0xb28] sm:$0xff]  }
 0x85e   :  { %12220 = vmatpush3.bf16.msra.mxu0 %v13577_v48  ;;  %v13617_v48 = vld [vmem:[%s16704_s2 + $0xb60] sm:$0xff]  }
 0x85f   :  { %12229 = vmatprep.subr.bf16.mxu0 %v13578_v57  ;;  %v13618_v57 = vld [vmem:[%s16704_s2 + $0xb20] sm:$0xff]  }
 0x861   :  { %4095 = vmatmul.mubr.bf16.vlgmr.msra.gmra.mxu0 %v14203_v7 }
 0x862   :  { %12230 = vmatpush3.bf16.msra.mxu0 %v13579_v51  ;;  %4449 = vmatprep.mubr.bf16.mxu0 %v14191_v2  ;;  %v13619_v51 = vld [vmem:[%s16704_s2 + $0xb58] sm:$0xff]  }
 0x863   :  { %12231 = vmatprep.subr.bf16.mxu0 %v13580_v60  ;;  %v13620_v60 = vld [vmem:[%s16704_s2 + $0xb18] sm:$0xff]  }
 0x866   :  { %12232 = vmatpush3.bf16.msra.mxu0 %v13581_v61  ;;  %v13621_v61 = vld [vmem:[%s16704_s2 + $0xb50] sm:$0xff]  }
 0x867   :  { %12233 = vmatprep.subr.bf16.mxu0 %v13582_v62  ;;  %v13622_v62 = vld [vmem:[%s16704_s2 + $0xb10] sm:$0xff]  }
 0x86a   :  { %12234 = vmatpush3.bf16.msra.mxu0 %v13583_v0  ;;  %v13623_v0 = vld [vmem:[%s16704_s2 + $0xb48] sm:$0xff]  }
 0x86b   :  { %12235 = vmatprep.subr.bf16.mxu0 %v13584_v55  ;;  %v13624_v55 = vld [vmem:[%s16704_s2 + $0xb08] sm:$0xff]  }
 0x86e   :  { %12236 = vmatpush3.bf16.msra.mxu0 %v13585_v1  ;;  %v13625_v1 = vld [vmem:[%s16704_s2 + $0xb40] sm:$0xff]  }
 0x86f   :  { %12237 = vmatprep.subr.bf16.mxu0 %v13586_v59  ;;  %v13626_v59 = vld [vmem:[%s16704_s2 + $0xb00] sm:$0xff]  }
 0x872   :  { %12238 = vmatpush3.bf16.msra.mxu0 %v13587_v4 }
 0x873   :  { %12239 = vmatprep.subr.bf16.mxu0 %v13588_v5 }
 0x876   :  { %12240 = vmatpush3.bf16.msra.mxu0 %v13589_v8 }
 0x877   :  { %12241 = vmatprep.subr.bf16.mxu0 %v13590_v9 }
 0x87a   :  { %12242 = vmatpush3.bf16.msra.mxu0 %v13591_v58 }
 0x87b   :  { %12243 = vmatprep.subr.bf16.mxu0 %v13592_v63 }
 0x87e   :  { %12244 = vmatpush3.bf16.msra.mxu0 %v13593_v10 }
 0x87f   :  { %12762 = vmatprep.subr.bf16.mxu0 %v13976_v34 }
 0x881   :  { %4450 = vmatmul.mubr.bf16.vlgmr.msra.gmra.mxu0 %v14201_v6 }
 0x882   :  { %12764 = vmatprep.mubr.msk.bf16.mxu0 %vm13977_vm1, %v13976_v34 }
 0x901   :  { %v3756_v11 = vpop.f32.mrf.mxu0 }
 0x902   :  { %v15263_v12 = vadd.f32 %v3756_v11, %v15149_v18 }
 0x903   :  { %v12754_v13 = vpop.f32.mrf.mxu0 }
 0x905   :  { %v3759_v14 = vpop.f32.mrf.mxu0 }
 0x906   :  { %v15266_v15 = vadd.f32 %v3759_v14, %v15152_v21  ;;  %v13596_v21 = vld [vmem:[%s16704_s2 + $0xab8] sm:$0xff]  }
 0x907   :  { %v12755_v16 = vpop.f32.mrf.mxu0 }
 0x921   :  { %v12221_v17 = vpop.f32.mrf.mxu0 }
 0x923   :  { %v12222_v19 = vpop.f32.mrf.mxu0 }
 0x924   :  { %v12223_v20 = vadd.f32 %v12222_v19, %v12221_v17 }
 0x925   :  { %v12224_v22 = vpop.f32.mrf.mxu0 }
 0x926   :  { %v4097_v23 = vadd.f32 %v12223_v20, %v12201_v52  ;;  %v13613_v52 = vld [vmem:[%s16704_s2 + $0xb70] sm:$0xff]   ;;  %v13628_v20 = vld [vmem:[%s16704_s2 + $0xbf8] sm:$0xff]  }
 0x927   :  { %v12225_v24 = vpop.f32.mrf.mxu0  ;;  %v13627_v22 = vld [vmem:[%s16705_s3 + $0x50] sm:$0xff]  }
 0x928   :  { %v4102_v25 = vpack.c.bf16 %v4097_v23, %v4097_v23  ;;  %v13630_v23 = vld [vmem:[%s16704_s2 + $0xbf0] sm:$0xff]  }
 0x929   :  { %v13631_v24 = vld [vmem:[%s16704_s2 + $0xbb0] sm:$0xff]  }
 0x92a   :  { %v4115_v18 = vsel %vm903_vm2, %v4102_v25, 0  ;;  %v13632_v25 = vld [vmem:[%s16704_s2 + $0xbe8] sm:$0xff]  }
 0x92b   :  { %12757 = vmatpush3.bf16.msra.mxu1 %v4115_v18  ;;  %v13634_v18 = vld [vmem:[%s16704_s2 + $0xbe0] sm:$0xff]  }
 0x92c   :  { %12251 = vmatprep.subr.bf16.mxu1 %v13595_v27  ;;  %v13633_v27 = vld [vmem:[%s16704_s2 + $0xba8] sm:$0xff]  }
 0x92e   :  { %12759 = vmatmul.mubr.msk.bf16.vlgmr.msra.gmra.mxu1 %vm899_vm3, %v13594_v28  ;;  %v13635_v28 = vld [vmem:[%s16704_s2 + $0xba0] sm:$0xff]  }
 0x92f   :  { %12252 = vmatpush3.bf16.msra.mxu1 %v13596_v21  ;;  %4489 = vmatprep.mubr.bf16.mxu1 %v14193_v3  ;;  %v13636_v21 = vld [vmem:[%s16704_s2 + $0xbd8] sm:$0xff]  }
 0x930   :  { %12253 = vmatprep.subr.bf16.mxu1 %v13597_v30  ;;  %v13637_v30 = vld [vmem:[%s16704_s2 + $0xb98] sm:$0xff]  }
 0x933   :  { %12254 = vmatpush3.bf16.msra.mxu1 %v13598_v31  ;;  %v13638_v31 = vld [vmem:[%s16704_s2 + $0xbd0] sm:$0xff]  }
 0x934   :  { %12255 = vmatprep.subr.bf16.mxu1 %v13599_v32  ;;  %v13639_v32 = vld [vmem:[%s16704_s2 + $0xb90] sm:$0xff]  }
 0x937   :  { %12256 = vmatpush3.bf16.msra.mxu1 %v13600_v35  ;;  %v13640_v35 = vld [vmem:[%s16704_s2 + $0xbc8] sm:$0xff]  }
 0x938   :  { %12257 = vmatprep.subr.bf16.mxu1 %v13601_v26 }
 0x93b   :  { %12258 = vmatpush3.bf16.msra.mxu1 %v13602_v29 }
 0x93c   :  { %12259 = vmatprep.subr.bf16.mxu1 %v13603_v36  ;;  %v13641_v36 = vld [vmem:[%s16704_s2 + $0xb88] sm:$0xff]  }
 0x93f   :  { %12260 = vmatpush3.bf16.msra.mxu1 %v13604_v38 }
 0x940   :  { %12261 = vmatprep.subr.bf16.mxu1 %v13605_v39  ;;  %v13642_v39 = vld [vmem:[%s16704_s2 + $0xbc0] sm:$0xff]  }
 0x941   :  { %v12245_v33 = vpop.f32.mrf.mxu0 }
 0x943   :  { %v12246_v43 = vpop.f32.mrf.mxu0  ;;  %12262 = vmatpush3.bf16.msra.mxu1 %v13606_v40 }
 0x944   :  { %v12247_v45 = vadd.f32 %v12246_v43, %v12245_v33  ;;  %12263 = vmatprep.subr.bf16.mxu1 %v13607_v42  ;;  %v13643_v33 = vld [vmem:[%s16704_s2 + $0xb80] sm:$0xff]   ;;  %v13644_v43 = vld [vmem:[%s16704_s2 + $0xc78] sm:$0xff]  }
 0x945   :  { %v12248_v47 = vpop.f32.mrf.mxu0 }
 0x946   :  { %v13648_v47 = vld [vmem:[%s16704_s2 + $0xc68] sm:$0xff]  }
 0x947   :  { %v12249_v49 = vpop.f32.mrf.mxu0  ;;  %12264 = vmatpush3.bf16.msra.mxu1 %v13608_v37  ;;  %v13645_v37 = vld [vmem:[%s16704_s2 + $0xc38] sm:$0xff]  }
 0x948   :  { %12265 = vmatprep.subr.bf16.mxu1 %v13609_v46  ;;  %v13647_v46 = vld [vmem:[%s16704_s2 + $0xc30] sm:$0xff]   ;;  %v13649_v49 = vld [vmem:[%s16704_s2 + $0xc28] sm:$0xff]  }
 0x94b   :  { %12266 = vmatpush3.bf16.msra.mxu1 %v13610_v41  ;;  %v13650_v41 = vld [vmem:[%s16704_s2 + $0xc60] sm:$0xff]  }
 0x94c   :  { %12275 = vmatprep.subr.bf16.mxu1 %v13611_v50  ;;  %v13651_v50 = vld [vmem:[%s16704_s2 + $0xc20] sm:$0xff]  }
 0x94e   :  { %4490 = vmatmul.mubr.bf16.vlgmr.msra.gmra.mxu1 %v14203_v7 }
 0x94f   :  { %12276 = vmatpush3.bf16.msra.mxu1 %v13612_v44  ;;  %4844 = vmatprep.mubr.bf16.mxu1 %v14191_v2  ;;  %v13652_v44 = vld [vmem:[%s16704_s2 + $0xc58] sm:$0xff]  }
 0x950   :  { %12277 = vmatprep.subr.bf16.mxu1 %v13613_v52  ;;  %v13653_v52 = vld [vmem:[%s16704_s2 + $0xc18] sm:$0xff]  }
 0x953   :  { %12278 = vmatpush3.bf16.msra.mxu1 %v13614_v53  ;;  %v13654_v53 = vld [vmem:[%s16704_s2 + $0xc50] sm:$0xff]  }
 0x954   :  { %12279 = vmatprep.subr.bf16.mxu1 %v13615_v54  ;;  %v13655_v54 = vld [vmem:[%s16704_s2 + $0xc10] sm:$0xff]  }
 0x957   :  { %12280 = vmatpush3.bf16.msra.mxu1 %v13616_v56  ;;  %v13656_v56 = vld [vmem:[%s16704_s2 + $0xc48] sm:$0xff]  }
 0x958   :  { %12281 = vmatprep.subr.bf16.mxu1 %v13617_v48  ;;  %v13657_v48 = vld [vmem:[%s16704_s2 + $0xc08] sm:$0xff]  }
 0x95b   :  { %12282 = vmatpush3.bf16.msra.mxu1 %v13618_v57  ;;  %v13658_v57 = vld [vmem:[%s16704_s2 + $0xc40] sm:$0xff]  }
 0x95c   :  { %12283 = vmatprep.subr.bf16.mxu1 %v13619_v51  ;;  %v13659_v51 = vld [vmem:[%s16704_s2 + $0xc00] sm:$0xff]  }
 0x95f   :  { %12284 = vmatpush3.bf16.msra.mxu1 %v13620_v60 }
 0x960   :  { %12285 = vmatprep.subr.bf16.mxu1 %v13621_v61 }
 0x963   :  { %12286 = vmatpush3.bf16.msra.mxu1 %v13622_v62 }
 0x964   :  { %12287 = vmatprep.subr.bf16.mxu1 %v13623_v0 }
 0x967   :  { %12288 = vmatpush3.bf16.msra.mxu1 %v13624_v55 }
 0x968   :  { %12289 = vmatprep.subr.bf16.mxu1 %v13625_v1 }
 0x96b   :  { %12290 = vmatpush3.bf16.msra.mxu1 %v13626_v59 }
 0x96c   :  { %12768 = vmatprep.subr.bf16.mxu1 %v13976_v34 }
 0x96e   :  { %4845 = vmatmul.mubr.bf16.vlgmr.msra.gmra.mxu1 %v14201_v6 }
 0x96f   :  { %12770 = vmatprep.mubr.msk.bf16.mxu1 %vm13977_vm1, %v13976_v34 }
 0x9ee   :  { %v4151_v4 = vpop.f32.mrf.mxu1 }
 0x9ef   :  { %v15377_v5 = vadd.f32 %v4151_v4, %v15263_v12 }
 0x9f0   :  { %v12760_v8 = vpop.f32.mrf.mxu1 }
 0x9f2   :  { %v4154_v9 = vpop.f32.mrf.mxu1 }
 0x9f3   :  { %v15380_v58 = vadd.f32 %v4154_v9, %v15266_v15  ;;  %v13629_v15 = vld [vmem:[%s16704_s2 + $0xbb8] sm:$0xff]  }
 0x9f4   :  { %v12761_v63 = vpop.f32.mrf.mxu1 }
 0xa0e   :  { %v12267_v10 = vpop.f32.mrf.mxu1 }
 0xa10   :  { %v12268_v11 = vpop.f32.mrf.mxu1 }
 0xa11   :  { %v12269_v13 = vadd.f32 %v12268_v11, %v12267_v10 }
 0xa12   :  { %v12270_v14 = vpop.f32.mrf.mxu1 }
 0xa13   :  { %v4492_v16 = vadd.f32 %v12269_v13, %v12247_v45  ;;  %v13646_v45 = vld [vmem:[%s16704_s2 + $0xc70] sm:$0xff]   ;;  %v13661_v13 = vld [vmem:[%s16704_s2 + $0xcf8] sm:$0xff]  }
 0xa14   :  { %v12271_v17 = vpop.f32.mrf.mxu1  ;;  %v13660_v14 = vld [vmem:[%s16705_s3 + $0x58] sm:$0xff]  }
 0xa15   :  { %v4497_v19 = vpack.c.bf16 %v4492_v16, %v4492_v16  ;;  %v13663_v16 = vld [vmem:[%s16704_s2 + $0xcf0] sm:$0xff]  }
 0xa16   :  { %v13664_v17 = vld [vmem:[%s16704_s2 + $0xcb0] sm:$0xff]  }
 0xa17   :  { %v4510_v12 = vsel %vm903_vm2, %v4497_v19, 0  ;;  %v13665_v19 = vld [vmem:[%s16704_s2 + $0xce8] sm:$0xff]  }
 0xa18   :  { %12763 = vmatpush3.bf16.msra.mxu0 %v4510_v12  ;;  %v13667_v12 = vld [vmem:[%s16704_s2 + $0xce0] sm:$0xff]  }
 0xa19   :  { %12297 = vmatprep.subr.bf16.mxu0 %v13628_v20  ;;  %v13666_v20 = vld [vmem:[%s16704_s2 + $0xca8] sm:$0xff]  }
 0xa1b   :  { %12765 = vmatmul.mubr.msk.bf16.vlgmr.msra.gmra.mxu0 %vm899_vm3, %v13627_v22  ;;  %v13668_v22 = vld [vmem:[%s16704_s2 + $0xca0] sm:$0xff]  }
 0xa1c   :  { %12298 = vmatpush3.bf16.msra.mxu0 %v13629_v15  ;;  %4884 = vmatprep.mubr.bf16.mxu0 %v14193_v3  ;;  %v13669_v15 = vld [vmem:[%s16704_s2 + $0xcd8] sm:$0xff]  }
 0xa1d   :  { %12299 = vmatprep.subr.bf16.mxu0 %v13630_v23  ;;  %v13670_v23 = vld [vmem:[%s16704_s2 + $0xc98] sm:$0xff]  }
 0xa20   :  { %12300 = vmatpush3.bf16.msra.mxu0 %v13631_v24  ;;  %v13671_v24 = vld [vmem:[%s16704_s2 + $0xcd0] sm:$0xff]  }
 0xa21   :  { %12301 = vmatprep.subr.bf16.mxu0 %v13632_v25  ;;  %v13672_v25 = vld [vmem:[%s16704_s2 + $0xc90] sm:$0xff]  }
 0xa24   :  { %12302 = vmatpush3.bf16.msra.mxu0 %v13633_v27  ;;  %v13673_v27 = vld [vmem:[%s16704_s2 + $0xcc8] sm:$0xff]  }
 0xa25   :  { %12303 = vmatprep.subr.bf16.mxu0 %v13634_v18 }
 0xa28   :  { %12304 = vmatpush3.bf16.msra.mxu0 %v13635_v28 }
 0xa29   :  { %12305 = vmatprep.subr.bf16.mxu0 %v13636_v21  ;;  %v13674_v21 = vld [vmem:[%s16704_s2 + $0xc88] sm:$0xff]  }
 0xa2c   :  { %12306 = vmatpush3.bf16.msra.mxu0 %v13637_v30 }
 0xa2d   :  { %12307 = vmatprep.subr.bf16.mxu0 %v13638_v31  ;;  %v13675_v31 = vld [vmem:[%s16704_s2 + $0xcc0] sm:$0xff]  }
 0xa2e   :  { %v12291_v26 = vpop.f32.mrf.mxu1 }
 0xa30   :  { %v12292_v29 = vpop.f32.mrf.mxu1  ;;  %12308 = vmatpush3.bf16.msra.mxu0 %v13639_v32 }
 0xa31   :  { %v12293_v38 = vadd.f32 %v12292_v29, %v12291_v26  ;;  %12309 = vmatprep.subr.bf16.mxu0 %v13640_v35  ;;  %v13676_v26 = vld [vmem:[%s16704_s2 + $0xc80] sm:$0xff]   ;;  %v13677_v29 = vld [vmem:[%s16704_s2 + $0xd78] sm:$0xff]  }
 0xa32   :  { %v12294_v40 = vpop.f32.mrf.mxu1 }
 0xa33   :  { %v13681_v40 = vld [vmem:[%s16704_s2 + $0xd68] sm:$0xff]  }
 0xa34   :  { %v12295_v42 = vpop.f32.mrf.mxu1  ;;  %12310 = vmatpush3.bf16.msra.mxu0 %v13641_v36  ;;  %v13678_v36 = vld [vmem:[%s16704_s2 + $0xd38] sm:$0xff]  }
 0xa35   :  { %12311 = vmatprep.subr.bf16.mxu0 %v13642_v39  ;;  %v13680_v39 = vld [vmem:[%s16704_s2 + $0xd30] sm:$0xff]   ;;  %v13682_v42 = vld [vmem:[%s16704_s2 + $0xd28] sm:$0xff]  }
 0xa38   :  { %12312 = vmatpush3.bf16.msra.mxu0 %v13643_v33  ;;  %v13683_v33 = vld [vmem:[%s16704_s2 + $0xd60] sm:$0xff]  }
 0xa39   :  { %12321 = vmatprep.subr.bf16.mxu0 %v13644_v43  ;;  %v13684_v43 = vld [vmem:[%s16704_s2 + $0xd20] sm:$0xff]  }
 0xa3b   :  { %4885 = vmatmul.mubr.bf16.vlgmr.msra.gmra.mxu0 %v14203_v7 }
 0xa3c   :  { %12322 = vmatpush3.bf16.msra.mxu0 %v13645_v37  ;;  %5239 = vmatprep.mubr.bf16.mxu0 %v14191_v2  ;;  %v13685_v37 = vld [vmem:[%s16704_s2 + $0xd58] sm:$0xff]  }
 0xa3d   :  { %12323 = vmatprep.subr.bf16.mxu0 %v13646_v45  ;;  %v13686_v45 = vld [vmem:[%s16704_s2 + $0xd18] sm:$0xff]  }
 0xa40   :  { %12324 = vmatpush3.bf16.msra.mxu0 %v13647_v46  ;;  %v13687_v46 = vld [vmem:[%s16704_s2 + $0xd50] sm:$0xff]  }
 0xa41   :  { %12325 = vmatprep.subr.bf16.mxu0 %v13648_v47  ;;  %v13688_v47 = vld [vmem:[%s16704_s2 + $0xd10] sm:$0xff]  }
 0xa44   :  { %12326 = vmatpush3.bf16.msra.mxu0 %v13649_v49  ;;  %v13689_v49 = vld [vmem:[%s16704_s2 + $0xd48] sm:$0xff]  }
 0xa45   :  { %12327 = vmatprep.subr.bf16.mxu0 %v13650_v41  ;;  %v13690_v41 = vld [vmem:[%s16704_s2 + $0xd08] sm:$0xff]  }
 0xa48   :  { %12328 = vmatpush3.bf16.msra.mxu0 %v13651_v50  ;;  %v13691_v50 = vld [vmem:[%s16704_s2 + $0xd40] sm:$0xff]  }
 0xa49   :  { %12329 = vmatprep.subr.bf16.mxu0 %v13652_v44  ;;  %v13692_v44 = vld [vmem:[%s16704_s2 + $0xd00] sm:$0xff]  }
 0xa4c   :  { %12330 = vmatpush3.bf16.msra.mxu0 %v13653_v52 }
 0xa4d   :  { %12331 = vmatprep.subr.bf16.mxu0 %v13654_v53 }
 0xa50   :  { %12332 = vmatpush3.bf16.msra.mxu0 %v13655_v54 }
 0xa51   :  { %12333 = vmatprep.subr.bf16.mxu0 %v13656_v56 }
 0xa54   :  { %12334 = vmatpush3.bf16.msra.mxu0 %v13657_v48 }
 0xa55   :  { %12335 = vmatprep.subr.bf16.mxu0 %v13658_v57 }
 0xa58   :  { %12336 = vmatpush3.bf16.msra.mxu0 %v13659_v51 }
 0xa59   :  { %12774 = vmatprep.subr.bf16.mxu0 %v13976_v34 }
 0xa5b   :  { %5240 = vmatmul.mubr.bf16.vlgmr.msra.gmra.mxu0 %v14201_v6 }
 0xa5c   :  { %12776 = vmatprep.mubr.msk.bf16.mxu0 %vm13977_vm1, %v13976_v34 }
 0xadb   :  { %v4546_v60 = vpop.f32.mrf.mxu0 }
 0xadc   :  { %v15491_v61 = vadd.f32 %v4546_v60, %v15377_v5 }
 0xadd   :  { %v12766_v62 = vpop.f32.mrf.mxu0 }
 0xadf   :  { %v4549_v0 = vpop.f32.mrf.mxu0 }
 0xae0   :  { %v15494_v55 = vadd.f32 %v4549_v0, %v15380_v58  ;;  %v13662_v58 = vld [vmem:[%s16704_s2 + $0xcb8] sm:$0xff]  }
 0xae1   :  { %v12767_v1 = vpop.f32.mrf.mxu0 }
 0xafb   :  { %v12313_v59 = vpop.f32.mrf.mxu0 }
 0xafd   :  { %v12314_v4 = vpop.f32.mrf.mxu0 }
 0xafe   :  { %v12315_v8 = vadd.f32 %v12314_v4, %v12313_v59 }
 0xaff   :  { %v12316_v9 = vpop.f32.mrf.mxu0 }
 0xb00   :  { %v4887_v63 = vadd.f32 %v12315_v8, %v12293_v38  ;;  %v13679_v38 = vld [vmem:[%s16704_s2 + $0xd70] sm:$0xff]   ;;  %v13694_v8 = vld [vmem:[%s16704_s2 + $0xdf8] sm:$0xff]   ;;  %v13693_v9 = vld [vmem:[%s16705_s3 + $0x60] sm:$0xff]  }
 0xb01   :  { %v12317_v10 = vpop.f32.mrf.mxu0 }
 0xb02   :  { %v4892_v11 = vpack.c.bf16 %v4887_v63, %v4887_v63  ;;  %v13696_v63 = vld [vmem:[%s16704_s2 + $0xdf0] sm:$0xff]  }
 0xb03   :  { %v13697_v10 = vld [vmem:[%s16704_s2 + $0xdb0] sm:$0xff]  }
 0xb04   :  { %v4905_v5 = vsel %vm903_vm2, %v4892_v11, 0  ;;  %v13698_v11 = vld [vmem:[%s16704_s2 + $0xde8] sm:$0xff]  }
 0xb05   :  { %12769 = vmatpush3.bf16.msra.mxu1 %v4905_v5  ;;  %v13700_v5 = vld [vmem:[%s16704_s2 + $0xde0] sm:$0xff]  }
 0xb06   :  { %12343 = vmatprep.subr.bf16.mxu1 %v13661_v13  ;;  %v13699_v13 = vld [vmem:[%s16704_s2 + $0xda8] sm:$0xff]  }
 0xb08   :  { %12771 = vmatmul.mubr.msk.bf16.vlgmr.msra.gmra.mxu1 %vm899_vm3, %v13660_v14  ;;  %v13701_v14 = vld [vmem:[%s16704_s2 + $0xda0] sm:$0xff]  }
 0xb09   :  { %12344 = vmatpush3.bf16.msra.mxu1 %v13662_v58  ;;  %5279 = vmatprep.mubr.bf16.mxu1 %v14193_v3  ;;  %v13702_v58 = vld [vmem:[%s16704_s2 + $0xdd8] sm:$0xff]  }
 0xb0a   :  { %12345 = vmatprep.subr.bf16.mxu1 %v13663_v16  ;;  %v13703_v16 = vld [vmem:[%s16704_s2 + $0xd98] sm:$0xff]  }
 0xb0d   :  { %12346 = vmatpush3.bf16.msra.mxu1 %v13664_v17  ;;  %v13704_v17 = vld [vmem:[%s16704_s2 + $0xdd0] sm:$0xff]  }
 0xb0e   :  { %12347 = vmatprep.subr.bf16.mxu1 %v13665_v19  ;;  %v13705_v19 = vld [vmem:[%s16704_s2 + $0xd90] sm:$0xff]  }
 0xb11   :  { %12348 = vmatpush3.bf16.msra.mxu1 %v13666_v20  ;;  %v13706_v20 = vld [vmem:[%s16704_s2 + $0xdc8] sm:$0xff]  }
 0xb12   :  { %12349 = vmatprep.subr.bf16.mxu1 %v13667_v12 }
 0xb15   :  { %12350 = vmatpush3.bf16.msra.mxu1 %v13668_v22 }
 0xb16   :  { %12351 = vmatprep.subr.bf16.mxu1 %v13669_v15  ;;  %v13707_v15 = vld [vmem:[%s16704_s2 + $0xd88] sm:$0xff]  }
 0xb19   :  { %12352 = vmatpush3.bf16.msra.mxu1 %v13670_v23 }
 0xb1a   :  { %12353 = vmatprep.subr.bf16.mxu1 %v13671_v24  ;;  %v13708_v24 = vld [vmem:[%s16704_s2 + $0xdc0] sm:$0xff]  }
 0xb1b   :  { %v12337_v18 = vpop.f32.mrf.mxu0 }
 0xb1d   :  { %v12338_v28 = vpop.f32.mrf.mxu0  ;;  %12354 = vmatpush3.bf16.msra.mxu1 %v13672_v25 }
 0xb1e   :  { %v12339_v30 = vadd.f32 %v12338_v28, %v12337_v18  ;;  %12355 = vmatprep.subr.bf16.mxu1 %v13673_v27  ;;  %v13709_v18 = vld [vmem:[%s16704_s2 + $0xd80] sm:$0xff]   ;;  %v13710_v28 = vld [vmem:[%s16704_s2 + $0xe78] sm:$0xff]  }
 0xb1f   :  { %v12340_v32 = vpop.f32.mrf.mxu0 }
 0xb20   :  { %v13714_v32 = vld [vmem:[%s16704_s2 + $0xe68] sm:$0xff]  }
 0xb21   :  { %v12341_v35 = vpop.f32.mrf.mxu0  ;;  %12356 = vmatpush3.bf16.msra.mxu1 %v13674_v21  ;;  %v13711_v21 = vld [vmem:[%s16704_s2 + $0xe38] sm:$0xff]  }
 0xb22   :  { %12357 = vmatprep.subr.bf16.mxu1 %v13675_v31  ;;  %v13713_v31 = vld [vmem:[%s16704_s2 + $0xe30] sm:$0xff]   ;;  %v13715_v35 = vld [vmem:[%s16704_s2 + $0xe28] sm:$0xff]  }
 0xb25   :  { %12358 = vmatpush3.bf16.msra.mxu1 %v13676_v26  ;;  %v13716_v26 = vld [vmem:[%s16704_s2 + $0xe60] sm:$0xff]  }
 0xb26   :  { %12367 = vmatprep.subr.bf16.mxu1 %v13677_v29  ;;  %v13717_v29 = vld [vmem:[%s16704_s2 + $0xe20] sm:$0xff]  }
 0xb28   :  { %5280 = vmatmul.mubr.bf16.vlgmr.msra.gmra.mxu1 %v14203_v7 }
 0xb29   :  { %12368 = vmatpush3.bf16.msra.mxu1 %v13678_v36  ;;  %5634 = vmatprep.mubr.bf16.mxu1 %v14191_v2  ;;  %v13718_v36 = vld [vmem:[%s16704_s2 + $0xe58] sm:$0xff]  }
 0xb2a   :  { %12369 = vmatprep.subr.bf16.mxu1 %v13679_v38  ;;  %v13719_v38 = vld [vmem:[%s16704_s2 + $0xe18] sm:$0xff]  }
 0xb2d   :  { %12370 = vmatpush3.bf16.msra.mxu1 %v13680_v39  ;;  %v13720_v39 = vld [vmem:[%s16704_s2 + $0xe50] sm:$0xff]  }
 0xb2e   :  { %12371 = vmatprep.subr.bf16.mxu1 %v13681_v40  ;;  %v13721_v40 = vld [vmem:[%s16704_s2 + $0xe10] sm:$0xff]  }
 0xb31   :  { %12372 = vmatpush3.bf16.msra.mxu1 %v13682_v42  ;;  %v13722_v42 = vld [vmem:[%s16704_s2 + $0xe48] sm:$0xff]  }
 0xb32   :  { %12373 = vmatprep.subr.bf16.mxu1 %v13683_v33  ;;  %v13723_v33 = vld [vmem:[%s16704_s2 + $0xe08] sm:$0xff]  }
 0xb35   :  { %12374 = vmatpush3.bf16.msra.mxu1 %v13684_v43  ;;  %v13724_v43 = vld [vmem:[%s16704_s2 + $0xe40] sm:$0xff]  }
 0xb36   :  { %12375 = vmatprep.subr.bf16.mxu1 %v13685_v37  ;;  %v13725_v37 = vld [vmem:[%s16704_s2 + $0xe00] sm:$0xff]  }
 0xb39   :  { %12376 = vmatpush3.bf16.msra.mxu1 %v13686_v45 }
 0xb3a   :  { %12377 = vmatprep.subr.bf16.mxu1 %v13687_v46 }
 0xb3d   :  { %12378 = vmatpush3.bf16.msra.mxu1 %v13688_v47 }
 0xb3e   :  { %12379 = vmatprep.subr.bf16.mxu1 %v13689_v49 }
 0xb41   :  { %12380 = vmatpush3.bf16.msra.mxu1 %v13690_v41 }
 0xb42   :  { %12381 = vmatprep.subr.bf16.mxu1 %v13691_v50 }
 0xb45   :  { %12382 = vmatpush3.bf16.msra.mxu1 %v13692_v44 }
 0xb46   :  { %12780 = vmatprep.subr.bf16.mxu1 %v13976_v34 }
 0xb48   :  { %5635 = vmatmul.mubr.bf16.vlgmr.msra.gmra.mxu1 %v14201_v6 }
 0xb49   :  { %12782 = vmatprep.mubr.msk.bf16.mxu1 %vm13977_vm1, %v13976_v34 }
 0xbc8   :  { %v4941_v52 = vpop.f32.mrf.mxu1 }
 0xbc9   :  { %v15605_v53 = vadd.f32 %v4941_v52, %v15491_v61 }
 0xbca   :  { %v12772_v54 = vpop.f32.mrf.mxu1 }
 0xbcc   :  { %v4944_v56 = vpop.f32.mrf.mxu1 }
 0xbcd   :  { %v15608_v48 = vadd.f32 %v4944_v56, %v15494_v55  ;;  %v13695_v55 = vld [vmem:[%s16704_s2 + $0xdb8] sm:$0xff]  }
 0xbce   :  { %v12773_v57 = vpop.f32.mrf.mxu1 }
 0xbe8   :  { %v12359_v51 = vpop.f32.mrf.mxu1 }
 0xbea   :  { %v12360_v60 = vpop.f32.mrf.mxu1 }
 0xbeb   :  { %v12361_v62 = vadd.f32 %v12360_v60, %v12359_v51 }
 0xbec   :  { %v12362_v0 = vpop.f32.mrf.mxu1 }
 0xbed   :  { %v5282_v1 = vadd.f32 %v12361_v62, %v12339_v30  ;;  %v13712_v30 = vld [vmem:[%s16704_s2 + $0xe70] sm:$0xff]   ;;  %v13727_v62 = vld [vmem:[%s16704_s2 + $0xef8] sm:$0xff]   ;;  %v13726_v0 = vld [vmem:[%s16705_s3 + $0x68] sm:$0xff]  }
 0xbee   :  { %v12363_v59 = vpop.f32.mrf.mxu1 }
 0xbef   :  { %v5287_v4 = vpack.c.bf16 %v5282_v1, %v5282_v1  ;;  %v13729_v1 = vld [vmem:[%s16704_s2 + $0xef0] sm:$0xff]  }
 0xbf0   :  { %v13730_v59 = vld [vmem:[%s16704_s2 + $0xeb0] sm:$0xff]  }
 0xbf1   :  { %v5300_v61 = vsel %vm903_vm2, %v5287_v4, 0  ;;  %v13731_v4 = vld [vmem:[%s16704_s2 + $0xee8] sm:$0xff]  }
 0xbf2   :  { %12775 = vmatpush3.bf16.msra.mxu0 %v5300_v61  ;;  %v13733_v61 = vld [vmem:[%s16704_s2 + $0xee0] sm:$0xff]  }
 0xbf3   :  { %12389 = vmatprep.subr.bf16.mxu0 %v13694_v8  ;;  %v13732_v8 = vld [vmem:[%s16704_s2 + $0xea8] sm:$0xff]  }
 0xbf5   :  { %12777 = vmatmul.mubr.msk.bf16.vlgmr.msra.gmra.mxu0 %vm899_vm3, %v13693_v9  ;;  %v13734_v9 = vld [vmem:[%s16704_s2 + $0xea0] sm:$0xff]  }
 0xbf6   :  { %12390 = vmatpush3.bf16.msra.mxu0 %v13695_v55  ;;  %5674 = vmatprep.mubr.bf16.mxu0 %v14193_v3  ;;  %v13735_v55 = vld [vmem:[%s16704_s2 + $0xed8] sm:$0xff]  }
 0xbf7   :  { %12391 = vmatprep.subr.bf16.mxu0 %v13696_v63  ;;  %v13736_v63 = vld [vmem:[%s16704_s2 + $0xe98] sm:$0xff]  }
 0xbfa   :  { %12392 = vmatpush3.bf16.msra.mxu0 %v13697_v10  ;;  %v13737_v10 = vld [vmem:[%s16704_s2 + $0xed0] sm:$0xff]  }
 0xbfb   :  { %12393 = vmatprep.subr.bf16.mxu0 %v13698_v11  ;;  %v13738_v11 = vld [vmem:[%s16704_s2 + $0xe90] sm:$0xff]  }
 0xbfe   :  { %12394 = vmatpush3.bf16.msra.mxu0 %v13699_v13  ;;  %v13739_v13 = vld [vmem:[%s16704_s2 + $0xec8] sm:$0xff]  }
 0xbff   :  { %12395 = vmatprep.subr.bf16.mxu0 %v13700_v5 }
 0xc02   :  { %12396 = vmatpush3.bf16.msra.mxu0 %v13701_v14 }
 0xc03   :  { %12397 = vmatprep.subr.bf16.mxu0 %v13702_v58  ;;  %v13740_v58 = vld [vmem:[%s16704_s2 + $0xe88] sm:$0xff]  }
 0xc06   :  { %12398 = vmatpush3.bf16.msra.mxu0 %v13703_v16 }
 0xc07   :  { %12399 = vmatprep.subr.bf16.mxu0 %v13704_v17  ;;  %v13741_v17 = vld [vmem:[%s16704_s2 + $0xec0] sm:$0xff]  }
 0xc08   :  { %v12383_v12 = vpop.f32.mrf.mxu1 }
 0xc0a   :  { %v12384_v22 = vpop.f32.mrf.mxu1  ;;  %12400 = vmatpush3.bf16.msra.mxu0 %v13705_v19 }
 0xc0b   :  { %v12385_v23 = vadd.f32 %v12384_v22, %v12383_v12  ;;  %12401 = vmatprep.subr.bf16.mxu0 %v13706_v20  ;;  %v13742_v12 = vld [vmem:[%s16704_s2 + $0xe80] sm:$0xff]   ;;  %v13743_v22 = vld [vmem:[%s16704_s2 + $0xf78] sm:$0xff]  }
 0xc0c   :  { %v12386_v25 = vpop.f32.mrf.mxu1 }
 0xc0d   :  { %v13747_v25 = vld [vmem:[%s16704_s2 + $0xf68] sm:$0xff]  }
 0xc0e   :  { %v12387_v27 = vpop.f32.mrf.mxu1  ;;  %12402 = vmatpush3.bf16.msra.mxu0 %v13707_v15  ;;  %v13744_v15 = vld [vmem:[%s16704_s2 + $0xf38] sm:$0xff]  }
 0xc0f   :  { %12403 = vmatprep.subr.bf16.mxu0 %v13708_v24  ;;  %v13746_v24 = vld [vmem:[%s16704_s2 + $0xf30] sm:$0xff]   ;;  %v13748_v27 = vld [vmem:[%s16704_s2 + $0xf28] sm:$0xff]  }
 0xc12   :  { %12404 = vmatpush3.bf16.msra.mxu0 %v13709_v18  ;;  %v13749_v18 = vld [vmem:[%s16704_s2 + $0xf60] sm:$0xff]  }
 0xc13   :  { %12413 = vmatprep.subr.bf16.mxu0 %v13710_v28  ;;  %v13751_v28 = vld [vmem:[%s16704_s2 + $0xf58] sm:$0xff]  }
 0xc15   :  { %5675 = vmatmul.mubr.bf16.vlgmr.msra.gmra.mxu0 %v14203_v7 }
 0xc16   :  { %12414 = vmatpush3.bf16.msra.mxu0 %v13711_v21  ;;  %6029 = vmatprep.mubr.bf16.mxu0 %v14191_v2  ;;  %v13752_v21 = vld [vmem:[%s16704_s2 + $0xf18] sm:$0xff]  }
 0xc17   :  { %12415 = vmatprep.subr.bf16.mxu0 %v13712_v30  ;;  %v13753_v30 = vld [vmem:[%s16704_s2 + $0xf50] sm:$0xff]  }
 0xc1a   :  { %12416 = vmatpush3.bf16.msra.mxu0 %v13713_v31  ;;  %v13754_v31 = vld [vmem:[%s16704_s2 + $0xf10] sm:$0xff]  }
 0xc1b   :  { %12417 = vmatprep.subr.bf16.mxu0 %v13714_v32  ;;  %v13755_v32 = vld [vmem:[%s16704_s2 + $0xf48] sm:$0xff]  }
 0xc1e   :  { %12418 = vmatpush3.bf16.msra.mxu0 %v13715_v35  ;;  %v13756_v35 = vld [vmem:[%s16704_s2 + $0xf08] sm:$0xff]  }
 0xc1f   :  { %12419 = vmatprep.subr.bf16.mxu0 %v13716_v26  ;;  %v13757_v26 = vld [vmem:[%s16704_s2 + $0xf40] sm:$0xff]  }
 0xc22   :  { %12420 = vmatpush3.bf16.msra.mxu0 %v13717_v29  ;;  %v13758_v29 = vld [vmem:[%s16704_s2 + $0xf00] sm:$0xff]  }
 0xc23   :  { %12421 = vmatprep.subr.bf16.mxu0 %v13718_v36 }
 0xc26   :  { %12422 = vmatpush3.bf16.msra.mxu0 %v13719_v38 }
 0xc27   :  { %12423 = vmatprep.subr.bf16.mxu0 %v13720_v39 }
 0xc2a   :  { %12424 = vmatpush3.bf16.msra.mxu0 %v13721_v40 }
 0xc2b   :  { %12425 = vmatprep.subr.bf16.mxu0 %v13722_v42 }
 0xc2e   :  { %12426 = vmatpush3.bf16.msra.mxu0 %v13723_v33 }
 0xc2f   :  { %12427 = vmatprep.subr.bf16.mxu0 %v13724_v43 }
 0xc32   :  { %12428 = vmatpush3.bf16.msra.mxu0 %v13725_v37 }
 0xc33   :  { %12786 = vmatprep.subr.bf16.mxu0 %v13976_v34 }
 0xc35   :  { %6030 = vmatmul.mubr.bf16.vlgmr.msra.gmra.mxu0 %v14201_v6 }
 0xc36   :  { %12788 = vmatprep.mubr.msk.bf16.mxu0 %vm13977_vm1, %v13976_v34 }
 0xcb5   :  { %v5336_v45 = vpop.f32.mrf.mxu0 }
 0xcb6   :  { %v15719_v46 = vadd.f32 %v5336_v45, %v15605_v53 }
 0xcb7   :  { %v12778_v47 = vpop.f32.mrf.mxu0 }
 0xcb9   :  { %v5339_v49 = vpop.f32.mrf.mxu0 }
 0xcba   :  { %v15722_v41 = vadd.f32 %v5339_v49, %v15608_v48  ;;  %v13728_v48 = vld [vmem:[%s16704_s2 + $0xeb8] sm:$0xff]  }
 0xcbb   :  { %v12779_v50 = vpop.f32.mrf.mxu0 }
 0xcd5   :  { %v12405_v44 = vpop.f32.mrf.mxu0 }
 0xcd7   :  { %v12406_v52 = vpop.f32.mrf.mxu0 }
 0xcd8   :  { %v12407_v54 = vadd.f32 %v12406_v52, %v12405_v44 }
 0xcd9   :  { %v12408_v56 = vpop.f32.mrf.mxu0 }
 0xcda   :  { %v5677_v57 = vadd.f32 %v12407_v54, %v12385_v23  ;;  %v13745_v23 = vld [vmem:[%s16704_s2 + $0xf70] sm:$0xff]  }
 0xcdb   :  { %v12409_v51 = vpop.f32.mrf.mxu0  ;;  %v13762_v54 = vld [vmem:[%s16704_s2 + $0xff0] sm:$0xff]  }
 0xcdc   :  { %v5682_v60 = vpack.c.bf16 %v5677_v57, %v5677_v57  ;;  %v13763_v56 = vld [vmem:[%s16704_s2 + $0xfb0] sm:$0xff]   ;;  %v13764_v57 = vld [vmem:[%s16704_s2 + $0xfe8] sm:$0xff]  }
 0xcdd   :  { %v13765_v51 = vld [vmem:[%s16704_s2 + $0xfa8] sm:$0xff]  }
 0xcde   :  { %v5695_v53 = vsel %vm903_vm2, %v5682_v60, 0  ;;  %v13766_v60 = vld [vmem:[%s16704_s2 + $0xfe0] sm:$0xff]  }
 0xcdf   :  { %12781 = vmatpush3.bf16.msra.mxu1 %v5695_v53  ;;  %v13769_v53 = vld [vmem:[%s16704_s2 + $0xf98] sm:$0xff]  }
 0xce0   :  { %12435 = vmatprep.subr.bf16.mxu1 %v13727_v62  ;;  %v13768_v62 = vld [vmem:[%s16704_s2 + $0xfd8] sm:$0xff]  }
 0xce2   :  { %12783 = vmatmul.mubr.msk.bf16.vlgmr.msra.gmra.mxu1 %vm899_vm3, %v13726_v0  ;;  %v13770_v0 = vld [vmem:[%s16704_s2 + $0xfd0] sm:$0xff]  }
 0xce3   :  { %12436 = vmatpush3.bf16.msra.mxu1 %v13728_v48  ;;  %6069 = vmatprep.mubr.bf16.mxu1 %v14193_v3  ;;  %v13771_v48 = vld [vmem:[%s16704_s2 + $0xf90] sm:$0xff]  }
 0xce4   :  { %12437 = vmatprep.subr.bf16.mxu1 %v13729_v1  ;;  %v13772_v1 = vld [vmem:[%s16704_s2 + $0xfc8] sm:$0xff]  }
 0xce7   :  { %12438 = vmatpush3.bf16.msra.mxu1 %v13730_v59 }
 0xce8   :  { %12439 = vmatprep.subr.bf16.mxu1 %v13731_v4 }
 0xceb   :  { %12440 = vmatpush3.bf16.msra.mxu1 %v13732_v8  ;;  %v13773_v8 = vld [vmem:[%s16704_s2 + $0xf88] sm:$0xff]  }
 0xcec   :  { %12441 = vmatprep.subr.bf16.mxu1 %v13733_v61 }
 0xcef   :  { %12442 = vmatpush3.bf16.msra.mxu1 %v13734_v9  ;;  %v13774_v9 = vld [vmem:[%s16704_s2 + $0xfc0] sm:$0xff]  }
 0xcf0   :  { %12443 = vmatprep.subr.bf16.mxu1 %v13735_v55 }
 0xcf3   :  { %12444 = vmatpush3.bf16.msra.mxu1 %v13736_v63 }
 0xcf4   :  { %12445 = vmatprep.subr.bf16.mxu1 %v13737_v10  ;;  %v13775_v10 = vld [vmem:[%s16704_s2 + $0xf80] sm:$0xff]  }
 0xcf5   :  { %v12429_v5 = vpop.f32.mrf.mxu0 }
 0xcf7   :  { %v12430_v14 = vpop.f32.mrf.mxu0  ;;  %12446 = vmatpush3.bf16.msra.mxu1 %v13738_v11 }
 0xcf8   :  { %v12431_v16 = vadd.f32 %v12430_v14, %v12429_v5  ;;  %12447 = vmatprep.subr.bf16.mxu1 %v13739_v13 }
 0xcf9   :  { %v12432_v19 = vpop.f32.mrf.mxu0 }
 0xcfb   :  { %v12433_v20 = vpop.f32.mrf.mxu0  ;;  %12448 = vmatpush3.bf16.msra.mxu1 %v13740_v58 }
 0xcfc   :  { %12449 = vmatprep.subr.bf16.mxu1 %v13741_v17 }
 0xcff   :  { %12450 = vmatpush3.bf16.msra.mxu1 %v13742_v12 }
 0xd00   :  { %12459 = vmatprep.subr.bf16.mxu1 %v13743_v22 }
 0xd02   :  { %6070 = vmatmul.mubr.bf16.vlgmr.msra.gmra.mxu1 %v14203_v7 }
 0xd03   :  { %12460 = vmatpush3.bf16.msra.mxu1 %v13744_v15  ;;  %6424 = vmatprep.mubr.bf16.mxu1 %v14191_v2  ;;  %v13750_v2 = vld [vmem:[%s16704_s2 + $0xf20] sm:$0xff]  }
 0xd04   :  { %12461 = vmatprep.subr.bf16.mxu1 %v13745_v23 }
 0xd07   :  { %12462 = vmatpush3.bf16.msra.mxu1 %v13746_v24 }
 0xd08   :  { %12463 = vmatprep.subr.bf16.mxu1 %v13747_v25 }
 0xd0b   :  { %12464 = vmatpush3.bf16.msra.mxu1 %v13748_v27 }
 0xd0c   :  { %12465 = vmatprep.subr.bf16.mxu1 %v13749_v18 }
 0xd0f   :  { %12466 = vmatpush3.bf16.msra.mxu1 %v13750_v2 }
 0xd10   :  { %12467 = vmatprep.subr.bf16.mxu1 %v13751_v28 }
 0xd13   :  { %12468 = vmatpush3.bf16.msra.mxu1 %v13752_v21 }
 0xd14   :  { %12469 = vmatprep.subr.bf16.mxu1 %v13753_v30 }
 0xd17   :  { %12470 = vmatpush3.bf16.msra.mxu1 %v13754_v31 }
 0xd18   :  { %12471 = vmatprep.subr.bf16.mxu1 %v13755_v32  ;;  %v13777_v32 = vld [vmem:[%s16708_s6 + $0x38] sm:$0xff]  }
 0xd1b   :  { %12472 = vmatpush3.bf16.msra.mxu1 %v13756_v35  ;;  %v13778_v35 = vld [vmem:[%s16708_s6 + $0x78] sm:$0xff]  }
 0xd1c   :  { %12473 = vmatprep.subr.bf16.mxu1 %v13757_v26  ;;  %v13779_v26 = vld [vmem:[%s16708_s6 + $0x30] sm:$0xff]  }
 0xd1f   :  { %12474 = vmatpush3.bf16.msra.mxu1 %v13758_v29  ;;  %v13780_v29 = vld [vmem:[%s16708_s6 + $0x70] sm:$0xff]  }
 0xd20   :  { %12792 = vmatprep.subr.bf16.mxu1 %v13976_v34 }
 0xd22   :  { %6425 = vmatmul.mubr.bf16.vlgmr.msra.gmra.mxu1 %v14201_v6  ;;  %v13760_v6 = vld [vmem:[%s16704_s2 + $0xff8] sm:$0xff]  }
 0xd23   :  { %12794 = vmatprep.mubr.msk.bf16.mxu1 %vm13977_vm1, %v13976_v34 }
 0xda2   :  { %v5731_v36 = vpop.f32.mrf.mxu1 }
 0xda3   :  { %v5738_v38 = vadd.f32 %v5731_v36, %v15719_v46  ;;  %v13759_v46 = vld [vmem:[%s16705_s3 + $0x70] sm:$0xff]   ;;  %v13781_v36 = vld [vmem:[%s16708_s6 + $0x28] sm:$0xff]  }
 0xda4   :  { %v12784_v39 = vpop.f32.mrf.mxu1 }
 0xda6   :  { %v5734_v40 = vpop.f32.mrf.mxu1 }
 0xda7   :  { %v5739_v42 = vadd.f32 %v5734_v40, %v15722_v41  ;;  %v13761_v41 = vld [vmem:[%s16704_s2 + $0xfb8] sm:$0xff]  }
 0xda8   :  { %v12785_v33 = vpop.f32.mrf.mxu1 }
 0xdc2   :  { %v12451_v43 = vpop.f32.mrf.mxu1 }
 0xdc4   :  { %v12452_v37 = vpop.f32.mrf.mxu1 }
 0xdc5   :  { %v12453_v45 = vadd.f32 %v12452_v37, %v12451_v43 }
 0xdc6   :  { %v12454_v47 = vpop.f32.mrf.mxu1 }
 0xdc7   :  { %v6072_v49 = vadd.f32 %v12453_v45, %v12431_v16 }
 0xdc8   :  { %v12455_v50 = vpop.f32.mrf.mxu1 }
 0xdc9   :  { %v6077_v44 = vpack.c.bf16 %v6072_v49, %v6072_v49 }
 0xdcb   :  { %v6090_v52 = vsel %vm903_vm2, %v6077_v44, 0 }
 0xdcc   :  { %12787 = vmatpush3.bf16.msra.mxu0 %v6090_v52 }
 0xdcd   :  { %12481 = vmatprep.subr.bf16.mxu0 %v13760_v6 }
 0xdcf   :  { %12789 = vmatmul.mubr.msk.bf16.vlgmr.msra.gmra.mxu0 %vm899_vm3, %v13759_v46 }
 0xdd0   :  { %12482 = vmatpush3.bf16.msra.mxu0 %v13761_v41  ;;  %6464 = vmatprep.mubr.bf16.mxu0 %v14193_v3  ;;  %v13767_v3 = vld [vmem:[%s16704_s2 + $0xfa0] sm:$0xff]  }
 0xdd1   :  { %12483 = vmatprep.subr.bf16.mxu0 %v13762_v54  ;;  %v6530_v41 = vld [vmem:[%s16706_s4] sm:$0xff] }
 0xdd2   :  { %v13783_v54 = vld [vmem:[%s16708_s6 + $0x20] sm:$0xff]  }
 0xdd4   :  { %12484 = vmatpush3.bf16.msra.mxu0 %v13763_v56  ;;  %v13784_v56 = vld [vmem:[%s16708_s6 + $0x60] sm:$0xff]  }
 0xdd5   :  { %12485 = vmatprep.subr.bf16.mxu0 %v13764_v57 }
 0xdd8   :  { %12486 = vmatpush3.bf16.msra.mxu0 %v13765_v51 }
 0xdd9   :  { %12487 = vmatprep.subr.bf16.mxu0 %v13766_v60  ;;  %v6531_v60 = vld [vmem:[%s16706_s4 + $0x8] sm:$0xff] }
 0xddc   :  { %12488 = vmatpush3.bf16.msra.mxu0 %v13767_v3  ;;  %v13785_v3 = vld [vmem:[%s16708_s6 + $0x18] sm:$0xff]  }
 0xddd   :  { %12489 = vmatprep.subr.bf16.mxu0 %v13768_v62  ;;  %v13786_v62 = vld [vmem:[%s16708_s6 + $0x58] sm:$0xff]  }
 0xde0   :  { %12490 = vmatpush3.bf16.msra.mxu0 %v13769_v53 }
 0xde1   :  { %12491 = vmatprep.subr.bf16.mxu0 %v13770_v0 }
 0xde2   :  { %v12475_v59 = vpop.f32.mrf.mxu1 }
 0xde4   :  { %v12476_v4 = vpop.f32.mrf.mxu1  ;;  %12492 = vmatpush3.bf16.msra.mxu0 %v13771_v48 }
 0xde5   :  { %v12477_v61 = vadd.f32 %v12476_v4, %v12475_v59  ;;  %12493 = vmatprep.subr.bf16.mxu0 %v13772_v1  ;;  %v6532_v1 = vld [vmem:[%s16707_s5] sm:$0xff]  ;;  %v13787_v59 = vld [vmem:[%s16708_s6 + $0x10] sm:$0xff]  }
 0xde6   :  { %v12478_v55 = vpop.f32.mrf.mxu1  ;;  %v13788_v4 = vld [vmem:[%s16708_s6 + $0x50] sm:$0xff]  }
 0xde7   :  { %v13789_v55 = vld [vmem:[%s16708_s6 + $0x8] sm:$0xff]  }
 0xde8   :  { %v12479_v63 = vpop.f32.mrf.mxu1  ;;  %12494 = vmatpush3.bf16.msra.mxu0 %v13773_v8 }
 0xde9   :  { %12495 = vmatprep.subr.bf16.mxu0 %v13774_v9  ;;  %v6533_v9 = vld [vmem:[%s16707_s5 + $0x8] sm:$0xff] }
 0xdea   :  { %v13790_v63 = vld [vmem:[%s16708_s6 + $0x48] sm:$0xff]  }
 0xdec   :  { %12496 = vmatpush3.bf16.msra.mxu0 %v13775_v10 }
 0xded   :  { %12798 = vmatprep.subr.bf16.mxu0 %v13976_v34 }
 0xdef   :  { %6465 = vmatmul.mubr.bf16.vlgmr.msra.gmra.mxu0 %v14203_v7  ;;  %v13776_v7 = vld [vmem:[%s16705_s3 + $0x78] sm:$0xff]  }
 0xdf0   :  { %12814 = vmatprep.mubr.msk.bf16.mxu0 %vm13977_vm1, %v13976_v34  ;;  %12799 = vmatpush3.bf16.msra.mxu0 %v13777_v32 }
 0xdf1   :  { %12800 = vmatprep.subr.bf16.mxu0 %v13976_v34 }
 0xdf4   :  { %12801 = vmatpush3.bf16.msra.mxu0 %v13779_v26 }
 0xdf5   :  { %12802 = vmatprep.subr.bf16.mxu0 %v13976_v34 }
 0xdf8   :  { %12803 = vmatpush3.bf16.msra.mxu0 %v13781_v36  ;;  %v13795_v36 = vld [vmem:[%s16709_s7 + $0x18] sm:$0xff]  }
 0xdf9   :  { %12804 = vmatprep.subr.bf16.mxu0 %v13976_v34 }
 0xdfc   :  { %12805 = vmatpush3.bf16.msra.mxu0 %v13783_v54 }
 0xdfd   :  { %12806 = vmatprep.subr.bf16.mxu0 %v13976_v34 }
 0xe00   :  { %12807 = vmatpush3.bf16.msra.mxu0 %v13785_v3 }
 0xe01   :  { %12808 = vmatprep.subr.bf16.mxu0 %v13976_v34 }
 0xe04   :  { %12809 = vmatpush3.bf16.msra.mxu0 %v13787_v59  ;;  %v13808_v59 = vld [vmem:[%s16708_s6 + $0xf0] sm:$0xff]  }
 0xe05   :  { %12810 = vmatprep.subr.bf16.mxu0 %v13976_v34 }
 0xe08   :  { %12811 = vmatpush3.bf16.msra.mxu0 %v13789_v55  ;;  %v13813_v55 = vld [vmem:[%s16708_s6 + $0xc8] sm:$0xff]  }
 0xe09   :  { %12812 = vmatprep.subr.bf16.mxu0 %v13976_v34 }
 0xe8f   :  { %v6126_v11 = vpop.f32.mrf.mxu0 }
 0xe90   :  { %v6133_v13 = vadd.f32 %v6126_v11, %v5738_v38  ;;  %v13782_v38 = vld [vmem:[%s16708_s6 + $0x68] sm:$0xff]   ;;  %v13791_v11 = vld [vmem:[%s16708_s6] sm:$0xff]  }
 0xe91   :  { %v12790_v5 = vpop.f32.mrf.mxu0  ;;  %12813 = vmatpush3.bf16.msra.mxu0 %v13791_v11 }
 0xe93   :  { %v6129_v14 = vpop.f32.mrf.mxu0 }
 0xe94   :  { %v6134_v58 = vadd.f32 %v6129_v14, %v5739_v42 }
 0xe95   :  { %v12791_v16 = vpop.f32.mrf.mxu0 }
 0xeaf   :  { %v12497_v17 = vpop.f32.mrf.mxu0 }
 0xeb1   :  { %v12498_v19 = vpop.f32.mrf.mxu0 }
 0xeb2   :  { %v12499_v20 = vadd.f32 %v12498_v19, %v12497_v17 }
 0xeb3   :  { %v12500_v12 = vpop.f32.mrf.mxu0 }
 0xeb4   :  { %v6467_v22 = vadd.f32 %v12499_v20, %v12477_v61 }
 0xeb5   :  { %v12501_v15 = vpop.f32.mrf.mxu0 }
 0xeb6   :  { %v6472_v23 = vpack.c.bf16 %v6467_v22, %v6467_v22 }
 0xeb8   :  { %v6485_v24 = vsel %vm903_vm2, %v6472_v23, 0 }
 0xeb9   :  { %12793 = vmatpush3.bf16.msra.mxu1 %v6485_v24 }
 0xeba   :  { %12818 = vmatprep.subr.bf16.mxu1 %v13976_v34 }
 0xebc   :  { %12795 = vmatmul.mubr.msk.bf16.vlgmr.msra.gmra.mxu1 %vm899_vm3, %v13776_v7 }
 0xebd   :  { %12834 = vmatprep.mubr.msk.bf16.mxu1 %vm13977_vm1, %v13976_v34  ;;  %12819 = vmatpush3.bf16.msra.mxu1 %v13778_v35 }
 0xebe   :  { %12820 = vmatprep.subr.bf16.mxu1 %v13976_v34 }
 0xec1   :  { %12821 = vmatpush3.bf16.msra.mxu1 %v13780_v29 }
 0xec2   :  { %12822 = vmatprep.subr.bf16.mxu1 %v13976_v34 }
 0xec5   :  { %12823 = vmatpush3.bf16.msra.mxu1 %v13782_v38  ;;  %v13796_v38 = vld [vmem:[%s16709_s7 + $0x8] sm:$0xff]  }
 0xec6   :  { %12824 = vmatprep.subr.bf16.mxu1 %v13976_v34 }
 0xec9   :  { %12825 = vmatpush3.bf16.msra.mxu1 %v13784_v56 }
 0xeca   :  { %12826 = vmatprep.subr.bf16.mxu1 %v13976_v34 }
 0xecd   :  { %12827 = vmatpush3.bf16.msra.mxu1 %v13786_v62 }
 0xece   :  { %12828 = vmatprep.subr.bf16.mxu1 %v13976_v34 }
 0xed1   :  { %12829 = vmatpush3.bf16.msra.mxu1 %v13788_v4  ;;  %v13809_v4 = vld [vmem:[%s16708_s6 + $0xe8] sm:$0xff]  }
 0xed2   :  { %12830 = vmatprep.subr.bf16.mxu1 %v13976_v34 }
 0xed5   :  { %12831 = vmatpush3.bf16.msra.mxu1 %v13790_v63  ;;  %v13814_v63 = vld [vmem:[%s16708_s6 + $0xc0] sm:$0xff]  }
 0xed6   :  { %12832 = vmatprep.subr.bf16.mxu1 %v13976_v34 }
 0xf7c   :  { %v6521_v25 = vpop.f32.mrf.mxu1 }
 0xf7d   :  { %v15900_v27 = vadd.f32 %v6521_v25, %v6133_v13  ;;  %v13792_v13 = vld [vmem:[%s16708_s6 + $0x40] sm:$0xff]   ;;  %v13793_v25 = vld [vmem:[%s16709_s7 + $0x10] sm:$0xff]  }
 0xf7e   :  { %v12796_v18 = vpop.f32.mrf.mxu1  ;;  %12833 = vmatpush3.bf16.msra.mxu1 %v13792_v13 }
 0xf7f   :  { %6534 = vadd.xlane.f32.xlu0 %v15900_v27  ;;  %v6540_v2 = vmul.f32 %v15900_v27, %v15900_v27 }
 0xf80   :  { %v6524_v28 = vpop.f32.mrf.mxu1 }
 0xf81   :  { %v15905_v21 = vadd.f32 %v6524_v28, %v6134_v58  ;;  %6542 = vadd.xlane.f32.xlu1 %v6540_v2 }
 0xf82   :  { %v12797_v30 = vpop.f32.mrf.mxu1 }
 0xf83   :  { %6536 = vadd.xlane.f32.xlu0 %v15905_v21  ;;  %v6541_v31 = vmul.f32 %v15905_v21, %v15905_v21 }
 0xf85   :  { %6544 = vadd.xlane.f32.xlu1 %v6541_v31 }
0x1008   :  { %v6535_v39 = vpop.xlane.xlu0 %6534 }
0x1009   :  { %v6538_v40 = vmul.f32 0.0078125, %v6535_v39  ;;  %v13797_v39 = vld [vmem:[%s16708_s6 + $0xb8] sm:$0xff]  }
0x100a   :  { %v6543_v42 = vpop.xlane.xlu1 %6542 }
0x100b   :  { %v6548_v33 = vmul.f32 %v6538_v40, %v6538_v40  ;;  %v6546_v43 = vmul.f32 0.0078125, %v6543_v42  ;;  %v13799_v42 = vld [vmem:[%s16708_s6 + $0xa8] sm:$0xff]  }
0x100c   :  { %v6537_v37 = vpop.xlane.xlu0 %6536 }
0x100d   :  { %v6550_v45 = vsub.f32 %v6546_v43, %v6548_v33  ;;  %v6539_v47 = vmul.f32 0.0078125, %v6537_v37  ;;  %v13800_v33 = vld [vmem:[%s16708_s6 + $0xa0] sm:$0xff]   ;;  %v13801_v43 = vld [vmem:[%s16708_s6 + $0x98] sm:$0xff]   ;;  %v13802_v37 = vld [vmem:[%s16708_s6 + $0x90] sm:$0xff]  }
0x100e   :  { %v6545_v49 = vpop.xlane.xlu1 %6544 }
0x100f   :  { %v6552_v50 = vadd.f32 1e-05, %v6550_v45  ;;  %v6549_v44 = vmul.f32 %v6539_v47, %v6539_v47  ;;  %v6547_v6 = vmul.f32 0.0078125, %v6545_v49  ;;  %v13803_v45 = vld [vmem:[%s16708_s6 + $0x88] sm:$0xff]   ;;  %v13805_v49 = vld [vmem:[%s16709_s7 + $0x20] sm:$0xff]  }
0x1011   :  { %13937 = vrsqrt.f32 %v6552_v50  ;;  %v6551_v52 = vsub.f32 %v6547_v6, %v6549_v44 }
0x1013   :  { %v6553_v46 = vadd.f32 1e-05, %v6551_v52 }
0x1015   :  { %13939 = vrsqrt.f32 %v6553_v46 }
0x101e   :  { %v13938_v57 = vpop.eup %13937 }
0x101f   :  { %v6556_v51 = vmul.f32 %v13938_v57, %v6530_v41 }
0x1021   :  { %6564 = vperm.xlu0 %13229, %v6556_v51   ;;  %v6558_v48 = vmul.f32 %v6556_v51, %v6538_v40  ;;  %v13798_v40 = vld [vmem:[%s16708_s6 + $0xb0] sm:$0xff]  }
0x1022   :  { %v13940_v53 = vpop.eup %13939 }
0x1023   :  { %v6557_v0 = vmul.f32 %v13940_v53, %v6531_v60  ;;  %v6560_v8 = vsub.f32 %v6532_v1, %v6558_v48  ;;  %v13806_v48 = vld [vmem:[%s16709_s7 + $0x28] sm:$0xff]   ;;  %v13807_v1 = vld [vmem:[%s16708_s6 + $0xf8] sm:$0xff]  }
0x1025   :  { %6569 = vperm.xlu1 %13230, %v6557_v0   ;;  %v6559_v61 = vmul.f32 %v6557_v0, %v6539_v47  ;;  %v13804_v47 = vld [vmem:[%s16708_s6 + $0x80] sm:$0xff]  }
0x1027   :  { %v6561_v10 = vsub.f32 %v6533_v9, %v6559_v61  ;;  %v13811_v61 = vld [vmem:[%s16708_s6 + $0xd8] sm:$0xff]   ;;  %v13812_v9 = vld [vmem:[%s16708_s6 + $0xd0] sm:$0xff]  }
0x1029   :  { %6576 = vperm.xlu1 %13230, %v6560_v8   ;;  %v13810_v8 = vld [vmem:[%s16708_s6 + $0xe0] sm:$0xff]  }
0x102d   :  { %6581 = vperm.xlu1 %13230, %v6561_v10   ;;  %v13815_v10 = vld [vmem:[%s16709_s7 + $0x30] sm:$0xff]  }
0x109c   :  { %v6565_v5 = vpop.permute.xlu0 %6564 }
0x109d   :  { %v6572_v58 = vmul.f32 %v6565_v5, %v15900_v27  ;;  %v13794_v27 = vld [vmem:[%s16709_s7] sm:$0xff]  }
0x10a0   :  { %v6570_v14 = vpop.permute.xlu1 %6569 }
0x10a1   :  { %v6573_v19 = vmul.f32 %v6570_v14, %v15905_v21 }
0x10a4   :  { %v6577_v16 = vpop.permute.xlu1 %6576 }
0x10a5   :  { %v6584_v17 = vadd.f32 %v6577_v16, %v6572_v58 }
0x10a7   :  { %v6586_v12 = vmul.f32 0.2, %v6584_v17 }
0x10a8   :  { %v6582_v20 = vpop.permute.xlu1 %6581 }
0x10a9   :  { %v6585_v22 = vadd.f32 %v6582_v20, %v6573_v19  ;;  %v6588_v23 = vmax.f32 %v6584_v17, %v6586_v12 }
0x10ab   :  { %v6587_v15 = vmul.f32 0.2, %v6585_v22 }
0x10ad   :  { %v6589_v24 = vmax.f32 %v6585_v22, %v6587_v15 }
0x10af   :  { %v15986_v7 = vpack.c.bf16 %v6589_v24, %v6588_v23 }
0x10b1   :  { %12815 = vmatmul.mubr.bf16.vlgmr.msra.gmra.mxu0 %v15986_v7  ;;  %12835 = vmatmul.mubr.bf16.vlgmr.msra.gmra.mxu1 %v15986_v7 }
0x10b2   :  { %12840 = vmatprep.mubr.msk.bf16.mxu0 %vm6823_vm4, %v13793_v25  ;;  %12846 = vmatprep.mubr.msk.bf16.mxu1 %vm6823_vm4, %v13794_v27  ;;  %v13816_v27 = vld [vmem:[%s16709_s7 + $0x38] sm:$0xff]  }
0x1171   :  { %v6689_v18 = vpop.f32.mrf.mxu0  ;;  %v6800_v2 = vpop.f32.mrf.mxu1 }
0x1173   :  { %v12816_v28 = vpop.f32.mrf.mxu0  ;;  %v12836_v21 = vpop.f32.mrf.mxu1 }
0x1174   :  { %v13819_v28 = vld [vmem:[%s16708_s6 + $0x128] sm:$0xff]   ;;  %v13820_v21 = vld [vmem:[%s16708_s6 + $0x120] sm:$0xff]  }
0x1175   :  { %v6692_v30 = vpop.f32.mrf.mxu0  ;;  %v6803_v31 = vpop.f32.mrf.mxu1 }
0x1176   :  { %v6696_v32 = vpack.c.bf16 %v6692_v30, %v6689_v18  ;;  %v6807_v35 = vpack.c.bf16 %v6803_v31, %v6800_v2  ;;  %v13817_v18 = vld [vmem:[%s16708_s6 + $0x138] sm:$0xff]   ;;  %v13818_v2 = vld [vmem:[%s16708_s6 + $0x130] sm:$0xff]  }
0x1177   :  { %v12817_v26 = vpop.f32.mrf.mxu0  ;;  %v12837_v29 = vpop.f32.mrf.mxu1  ;;  %v13821_v30 = vld [vmem:[%s16708_s6 + $0x118] sm:$0xff]   ;;  %v13822_v31 = vld [vmem:[%s16708_s6 + $0x110] sm:$0xff]  }
0x1178   :  { %12838 = vmatprep.subr.bf16.mxu0 %v6807_v35  ;;  %12844 = vmatprep.subr.bf16.mxu1 %v6696_v32  ;;  %v13825_v26 = vld [vmem:[%s16709_s7 + $0x40] sm:$0xff]  }
0x1179   :  { %12839 = vmatpush3.bf16.msra.mxu0 %v6807_v35  ;;  %12845 = vmatpush3.bf16.msra.mxu1 %v6696_v32  ;;  %v13823_v32 = vld [vmem:[%s16708_s6 + $0x108] sm:$0xff]   ;;  %v13824_v35 = vld [vmem:[%s16708_s6 + $0x100] sm:$0xff]  }
0x117a   :  { %12850 = vmatprep.subr.bf16.mxu0 %v13976_v34 }
0x117c   :  { %12841 = vmatmul.mubr.msk.bf16.vlgmr.msra.gmra.mxu0 %vm6823_vm4, %v13795_v36  ;;  %12847 = vmatmul.mubr.msk.bf16.vlgmr.msra.gmra.mxu1 %vm6823_vm4, %v13796_v38 }
0x117d   :  { %12851 = vmatpush3.bf16.msra.mxu0 %v13797_v39  ;;  %12866 = vmatprep.mubr.msk.bf16.mxu0 %vm13977_vm1, %v13976_v34 }
0x117e   :  { %12852 = vmatprep.subr.bf16.mxu0 %v13976_v34  ;;  %12872 = vmatprep.mubr.msk.bf16.mxu1 %vm6823_vm4, %v13805_v49 }
0x1181   :  { %12853 = vmatpush3.bf16.msra.mxu0 %v13798_v40 }
0x1182   :  { %12854 = vmatprep.subr.bf16.mxu0 %v13976_v34 }
0x1185   :  { %12855 = vmatpush3.bf16.msra.mxu0 %v13799_v42 }
0x1186   :  { %12856 = vmatprep.subr.bf16.mxu0 %v13976_v34 }
0x1189   :  { %12857 = vmatpush3.bf16.msra.mxu0 %v13800_v33 }
0x118a   :  { %12858 = vmatprep.subr.bf16.mxu0 %v13976_v34 }
0x118d   :  { %12859 = vmatpush3.bf16.msra.mxu0 %v13801_v43 }
0x118e   :  { %12860 = vmatprep.subr.bf16.mxu0 %v13976_v34 }
0x1191   :  { %12861 = vmatpush3.bf16.msra.mxu0 %v13802_v37 }
0x1192   :  { %12862 = vmatprep.subr.bf16.mxu0 %v13976_v34 }
0x1195   :  { %12863 = vmatpush3.bf16.msra.mxu0 %v13803_v45 }
0x1196   :  { %12864 = vmatprep.subr.bf16.mxu0 %v13976_v34 }
0x1199   :  { %12865 = vmatpush3.bf16.msra.mxu0 %v13804_v47 }
0x119c   :  { %12867 = vmatmul.mubr.bf16.vlgmr.msra.gmra.mxu0 %v15986_v7 }
0x119d   :  { %12898 = vmatprep.mubr.msk.bf16.mxu0 %vm6823_vm4, %v13815_v10  ;;  %v13836_v10 = vld [vmem:[%s16709_s7 + $0x58] sm:$0xff]  }
0x123c   :  { %v12842_v50 = vpop.f32.mrf.mxu0  ;;  %v12848_v44 = vpop.f32.mrf.mxu1 }
0x123d   :  { %v6938_v6 = vadd.f32 %v12848_v44, %v12842_v50  ;;  %v13826_v44 = vld [vmem:[%s16709_s7 + $0x48] sm:$0xff]  }
0x123e   :  { %v6864_v52 = vpop.f32.mrf.mxu0  ;;  %v6929_v46 = vpop.f32.mrf.mxu1 }
0x123f   :  { %v6930_v41 = vadd.f32 %v6929_v46, %v6864_v52  ;;  %v13828_v52 = vld [vmem:[%s16708_s6 + $0x170] sm:$0xff]   ;;  %v13829_v46 = vld [vmem:[%s16708_s6 + $0x168] sm:$0xff]  }
0x1240   :  { %v12843_v54 = vpop.f32.mrf.mxu0  ;;  %v12849_v56 = vpop.f32.mrf.mxu1 }
0x1241   :  { %v6941_v57 = vadd.f32 %v12849_v56, %v12843_v54  ;;  %v13831_v54 = vld [vmem:[%s16708_s6 + $0x158] sm:$0xff]   ;;  %v13832_v56 = vld [vmem:[%s16708_s6 + $0x150] sm:$0xff]  }
0x1242   :  { %v6867_v51 = vpop.f32.mrf.mxu0  ;;  %v6932_v11 = vpop.f32.mrf.mxu1 }
0x1243   :  { %v6933_v17 = vadd.f32 %v6932_v11, %v6867_v51  ;;  %v13834_v51 = vld [vmem:[%s16708_s6 + $0x140] sm:$0xff]   ;;  %v13837_v11 = vld [vmem:[%s16708_s6 + $0x1b8] sm:$0xff]  }
0x125c   :  { %v7043_v60 = vpop.f32.mrf.mxu0 }
0x125e   :  { %v12868_v3 = vpop.f32.mrf.mxu0 }
0x1260   :  { %v7046_v62 = vpop.f32.mrf.mxu0 }
0x1261   :  { %v7050_v53 = vpack.c.bf16 %v7046_v62, %v7043_v60  ;;  %v13835_v60 = vld [vmem:[%s16709_s7 + $0x50] sm:$0xff]  }
0x1262   :  { %v12869_v0 = vpop.f32.mrf.mxu0 }
0x1263   :  { %12870 = vmatprep.subr.bf16.mxu1 %v7050_v53 }
0x1264   :  { %12871 = vmatpush3.bf16.msra.mxu1 %v7050_v53 }
0x1265   :  { %12876 = vmatprep.subr.bf16.mxu1 %v13976_v34 }
0x1267   :  { %12873 = vmatmul.mubr.msk.bf16.vlgmr.msra.gmra.mxu1 %vm6823_vm4, %v13806_v48 }
0x1268   :  { %12877 = vmatpush3.bf16.msra.mxu1 %v13807_v1  ;;  %12892 = vmatprep.mubr.msk.bf16.mxu1 %vm13977_vm1, %v13976_v34 }
0x1269   :  { %12878 = vmatprep.subr.bf16.mxu1 %v13976_v34 }
0x126c   :  { %12879 = vmatpush3.bf16.msra.mxu1 %v13808_v59 }
0x126d   :  { %12880 = vmatprep.subr.bf16.mxu1 %v13976_v34 }
0x1270   :  { %12881 = vmatpush3.bf16.msra.mxu1 %v13809_v4 }
0x1271   :  { %12882 = vmatprep.subr.bf16.mxu1 %v13976_v34 }
0x1274   :  { %12883 = vmatpush3.bf16.msra.mxu1 %v13810_v8 }
0x1275   :  { %12884 = vmatprep.subr.bf16.mxu1 %v13976_v34 }
0x1278   :  { %12885 = vmatpush3.bf16.msra.mxu1 %v13811_v61 }
0x1279   :  { %12886 = vmatprep.subr.bf16.mxu1 %v13976_v34 }
0x127c   :  { %12887 = vmatpush3.bf16.msra.mxu1 %v13812_v9 }
0x127d   :  { %12888 = vmatprep.subr.bf16.mxu1 %v13976_v34 }
0x1280   :  { %12889 = vmatpush3.bf16.msra.mxu1 %v13813_v55 }
0x1281   :  { %12890 = vmatprep.subr.bf16.mxu1 %v13976_v34 }
0x1284   :  { %12891 = vmatpush3.bf16.msra.mxu1 %v13814_v63 }
0x1287   :  { %12893 = vmatmul.mubr.bf16.vlgmr.msra.gmra.mxu1 %v15986_v7 }
0x1288   :  { %12924 = vmatprep.mubr.msk.bf16.mxu1 %vm6823_vm4, %v13825_v26  ;;  %v13848_v26 = vld [vmem:[%s16708_s6 + $0x1f0] sm:$0xff]  }
0x1327   :  { %v12874_v13 = vpop.f32.mrf.mxu1 }
0x1328   :  { %v7123_v5 = vadd.f32 %v12874_v13, %v6938_v6  ;;  %v13827_v6 = vld [vmem:[%s16708_s6 + $0x178] sm:$0xff]   ;;  %v13838_v13 = vld [vmem:[%s16708_s6 + $0x1b0] sm:$0xff]  }
0x1329   :  { %v7106_v14 = vpop.f32.mrf.mxu1 }
0x132a   :  { %v7121_v58 = vadd.f32 %v7106_v14, %v6930_v41  ;;  %v13830_v41 = vld [vmem:[%s16708_s6 + $0x160] sm:$0xff]  }
0x132b   :  { %v12875_v16 = vpop.f32.mrf.mxu1  ;;  %v13840_v14 = vld [vmem:[%s16708_s6 + $0x1a0] sm:$0xff]  }
0x132c   :  { %v7124_v19 = vadd.f32 %v12875_v16, %v6941_v57  ;;  %v13833_v57 = vld [vmem:[%s16708_s6 + $0x148] sm:$0xff]   ;;  %v13842_v16 = vld [vmem:[%s16708_s6 + $0x190] sm:$0xff]  }
0x132d   :  { %v7109_v20 = vpop.f32.mrf.mxu1 }
0x132e   :  { %v7122_v12 = vadd.f32 %v7109_v20, %v6933_v17  ;;  %v13843_v17 = vld [vmem:[%s16708_s6 + $0x188] sm:$0xff]   ;;  %v13845_v20 = vld [vmem:[%s16709_s7 + $0x60] sm:$0xff]  }
0x1347   :  { %v7224_v22 = vpop.f32.mrf.mxu1 }
0x1349   :  { %v12894_v15 = vpop.f32.mrf.mxu1 }
0x134b   :  { %v7227_v23 = vpop.f32.mrf.mxu1 }
0x134c   :  { %v7231_v24 = vpack.c.bf16 %v7227_v23, %v7224_v22 }
0x134d   :  { %v12895_v25 = vpop.f32.mrf.mxu1 }
0x134e   :  { %12896 = vmatprep.subr.bf16.mxu0 %v7231_v24 }
0x134f   :  { %12897 = vmatpush3.bf16.msra.mxu0 %v7231_v24 }
0x1350   :  { %12902 = vmatprep.subr.bf16.mxu0 %v13976_v34 }
0x1352   :  { %12899 = vmatmul.mubr.msk.bf16.vlgmr.msra.gmra.mxu0 %vm6823_vm4, %v13816_v27 }
0x1353   :  { %12903 = vmatpush3.bf16.msra.mxu0 %v13817_v18  ;;  %12918 = vmatprep.mubr.msk.bf16.mxu0 %vm13977_vm1, %v13976_v34 }
0x1354   :  { %12904 = vmatprep.subr.bf16.mxu0 %v13976_v34 }
0x1357   :  { %12905 = vmatpush3.bf16.msra.mxu0 %v13818_v2 }
0x1358   :  { %12906 = vmatprep.subr.bf16.mxu0 %v13976_v34 }
0x135b   :  { %12907 = vmatpush3.bf16.msra.mxu0 %v13819_v28 }
0x135c   :  { %12908 = vmatprep.subr.bf16.mxu0 %v13976_v34 }
0x135f   :  { %12909 = vmatpush3.bf16.msra.mxu0 %v13820_v21 }
0x1360   :  { %12910 = vmatprep.subr.bf16.mxu0 %v13976_v34 }
0x1363   :  { %12911 = vmatpush3.bf16.msra.mxu0 %v13821_v30 }
0x1364   :  { %12912 = vmatprep.subr.bf16.mxu0 %v13976_v34 }
0x1367   :  { %12913 = vmatpush3.bf16.msra.mxu0 %v13822_v31 }
0x1368   :  { %12914 = vmatprep.subr.bf16.mxu0 %v13976_v34 }
0x136b   :  { %12915 = vmatpush3.bf16.msra.mxu0 %v13823_v32  ;;  %v13846_v32 = vld [vmem:[%s16709_s7 + $0x68] sm:$0xff]  }
0x136c   :  { %12916 = vmatprep.subr.bf16.mxu0 %v13976_v34 }
0x136f   :  { %12917 = vmatpush3.bf16.msra.mxu0 %v13824_v35  ;;  %v13847_v35 = vld [vmem:[%s16708_s6 + $0x1f8] sm:$0xff]  }
0x1372   :  { %12919 = vmatmul.mubr.bf16.vlgmr.msra.gmra.mxu0 %v15986_v7 }
0x1373   :  { %12950 = vmatprep.mubr.msk.bf16.mxu0 %vm6823_vm4, %v13835_v60  ;;  %v13858_v60 = vld [vmem:[%s16708_s6 + $0x230] sm:$0xff]  }
0x1412   :  { %v12900_v29 = vpop.f32.mrf.mxu0 }
0x1413   :  { %v7304_v36 = vadd.f32 %v12900_v29, %v7123_v5  ;;  %v13839_v5 = vld [vmem:[%s16708_s6 + $0x1a8] sm:$0xff]  }
0x1414   :  { %v7287_v38 = vpop.f32.mrf.mxu0  ;;  %v13849_v29 = vld [vmem:[%s16708_s6 + $0x1e8] sm:$0xff]  }
0x1415   :  { %v7302_v39 = vadd.f32 %v7287_v38, %v7121_v58  ;;  %v13841_v58 = vld [vmem:[%s16708_s6 + $0x198] sm:$0xff]  }
0x1416   :  { %v12901_v40 = vpop.f32.mrf.mxu0  ;;  %v13851_v38 = vld [vmem:[%s16708_s6 + $0x1d8] sm:$0xff]  }
0x1417   :  { %v7305_v42 = vadd.f32 %v12901_v40, %v7124_v19  ;;  %v13844_v19 = vld [vmem:[%s16708_s6 + $0x180] sm:$0xff]   ;;  %v13853_v40 = vld [vmem:[%s16708_s6 + $0x1c8] sm:$0xff]  }
0x1418   :  { %v7290_v33 = vpop.f32.mrf.mxu0 }
0x1419   :  { %v7303_v43 = vadd.f32 %v7290_v33, %v7122_v12  ;;  %v13855_v33 = vld [vmem:[%s16709_s7 + $0x70] sm:$0xff]  }
0x1432   :  { %v7405_v37 = vpop.f32.mrf.mxu0 }
0x1434   :  { %v12920_v45 = vpop.f32.mrf.mxu0 }
0x1436   :  { %v7408_v47 = vpop.f32.mrf.mxu0 }
0x1437   :  { %v7412_v49 = vpack.c.bf16 %v7408_v47, %v7405_v37 }
0x1438   :  { %v12921_v50 = vpop.f32.mrf.mxu0 }
0x1439   :  { %12922 = vmatprep.subr.bf16.mxu1 %v7412_v49 }
0x143a   :  { %12923 = vmatpush3.bf16.msra.mxu1 %v7412_v49 }
0x143b   :  { %12928 = vmatprep.subr.bf16.mxu1 %v13976_v34 }
0x143d   :  { %12925 = vmatmul.mubr.msk.bf16.vlgmr.msra.gmra.mxu1 %vm6823_vm4, %v13826_v44 }
0x143e   :  { %12929 = vmatpush3.bf16.msra.mxu1 %v13827_v6  ;;  %12944 = vmatprep.mubr.msk.bf16.mxu1 %vm13977_vm1, %v13976_v34 }
0x143f   :  { %12930 = vmatprep.subr.bf16.mxu1 %v13976_v34 }
0x1442   :  { %12931 = vmatpush3.bf16.msra.mxu1 %v13828_v52 }
0x1443   :  { %12932 = vmatprep.subr.bf16.mxu1 %v13976_v34 }
0x1446   :  { %12933 = vmatpush3.bf16.msra.mxu1 %v13829_v46 }
0x1447   :  { %12934 = vmatprep.subr.bf16.mxu1 %v13976_v34 }
0x144a   :  { %12935 = vmatpush3.bf16.msra.mxu1 %v13830_v41 }
0x144b   :  { %12936 = vmatprep.subr.bf16.mxu1 %v13976_v34 }
0x144e   :  { %12937 = vmatpush3.bf16.msra.mxu1 %v13831_v54 }
0x144f   :  { %12938 = vmatprep.subr.bf16.mxu1 %v13976_v34 }
0x1452   :  { %12939 = vmatpush3.bf16.msra.mxu1 %v13832_v56 }
0x1453   :  { %12940 = vmatprep.subr.bf16.mxu1 %v13976_v34 }
0x1456   :  { %12941 = vmatpush3.bf16.msra.mxu1 %v13833_v57  ;;  %v13856_v57 = vld [vmem:[%s16709_s7 + $0x78] sm:$0xff]  }
0x1457   :  { %12942 = vmatprep.subr.bf16.mxu1 %v13976_v34 }
0x145a   :  { %12943 = vmatpush3.bf16.msra.mxu1 %v13834_v51  ;;  %v13857_v51 = vld [vmem:[%s16708_s6 + $0x238] sm:$0xff]  }
0x145d   :  { %12945 = vmatmul.mubr.bf16.vlgmr.msra.gmra.mxu1 %v15986_v7 }
0x145e   :  { %12976 = vmatprep.mubr.msk.bf16.mxu1 %vm6823_vm4, %v13845_v20  ;;  %v13868_v20 = vld [vmem:[%s16708_s6 + $0x270] sm:$0xff]  }
0x14fd   :  { %v12926_v3 = vpop.f32.mrf.mxu1 }
0x14fe   :  { %v7485_v62 = vadd.f32 %v12926_v3, %v7304_v36  ;;  %v13850_v36 = vld [vmem:[%s16708_s6 + $0x1e0] sm:$0xff]   ;;  %v13859_v3 = vld [vmem:[%s16708_s6 + $0x228] sm:$0xff]  }
0x14ff   :  { %v7468_v53 = vpop.f32.mrf.mxu1 }
0x1500   :  { %v7483_v0 = vadd.f32 %v7468_v53, %v7302_v39  ;;  %v13852_v39 = vld [vmem:[%s16708_s6 + $0x1d0] sm:$0xff]   ;;  %v13861_v53 = vld [vmem:[%s16708_s6 + $0x218] sm:$0xff]  }
0x1501   :  { %v12927_v48 = vpop.f32.mrf.mxu1 }
0x1502   :  { %v7486_v1 = vadd.f32 %v12927_v48, %v7305_v42  ;;  %v13854_v42 = vld [vmem:[%s16708_s6 + $0x1c0] sm:$0xff]   ;;  %v13863_v48 = vld [vmem:[%s16708_s6 + $0x208] sm:$0xff]  }
0x1503   :  { %v7471_v59 = vpop.f32.mrf.mxu1 }
0x1504   :  { %v7484_v4 = vadd.f32 %v7471_v59, %v7303_v43  ;;  %v13865_v59 = vld [vmem:[%s16709_s7 + $0x80] sm:$0xff]  }
0x151d   :  { %v7586_v8 = vpop.f32.mrf.mxu1 }
0x151f   :  { %v12946_v61 = vpop.f32.mrf.mxu1 }
0x1521   :  { %v7589_v9 = vpop.f32.mrf.mxu1 }
0x1522   :  { %v7593_v55 = vpack.c.bf16 %v7589_v9, %v7586_v8 }
0x1523   :  { %v12947_v63 = vpop.f32.mrf.mxu1 }
0x1524   :  { %12948 = vmatprep.subr.bf16.mxu0 %v7593_v55 }
0x1525   :  { %12949 = vmatpush3.bf16.msra.mxu0 %v7593_v55 }
0x1526   :  { %12954 = vmatprep.subr.bf16.mxu0 %v13976_v34 }
0x1528   :  { %12951 = vmatmul.mubr.msk.bf16.vlgmr.msra.gmra.mxu0 %vm6823_vm4, %v13836_v10 }
0x1529   :  { %12955 = vmatpush3.bf16.msra.mxu0 %v13837_v11  ;;  %12970 = vmatprep.mubr.msk.bf16.mxu0 %vm13977_vm1, %v13976_v34 }
0x152a   :  { %12956 = vmatprep.subr.bf16.mxu0 %v13976_v34 }
0x152d   :  { %12957 = vmatpush3.bf16.msra.mxu0 %v13838_v13 }
0x152e   :  { %12958 = vmatprep.subr.bf16.mxu0 %v13976_v34 }
0x1531   :  { %12959 = vmatpush3.bf16.msra.mxu0 %v13839_v5 }
0x1532   :  { %12960 = vmatprep.subr.bf16.mxu0 %v13976_v34 }
0x1535   :  { %12961 = vmatpush3.bf16.msra.mxu0 %v13840_v14 }
0x1536   :  { %12962 = vmatprep.subr.bf16.mxu0 %v13976_v34 }
0x1539   :  { %12963 = vmatpush3.bf16.msra.mxu0 %v13841_v58 }
0x153a   :  { %12964 = vmatprep.subr.bf16.mxu0 %v13976_v34 }
0x153d   :  { %12965 = vmatpush3.bf16.msra.mxu0 %v13842_v16 }
0x153e   :  { %12966 = vmatprep.subr.bf16.mxu0 %v13976_v34 }
0x1541   :  { %12967 = vmatpush3.bf16.msra.mxu0 %v13843_v17  ;;  %v13866_v17 = vld [vmem:[%s16709_s7 + $0x88] sm:$0xff]  }
0x1542   :  { %12968 = vmatprep.subr.bf16.mxu0 %v13976_v34 }
0x1545   :  { %12969 = vmatpush3.bf16.msra.mxu0 %v13844_v19  ;;  %v13867_v19 = vld [vmem:[%s16708_s6 + $0x278] sm:$0xff]  }
0x1548   :  { %12971 = vmatmul.mubr.bf16.vlgmr.msra.gmra.mxu0 %v15986_v7 }
0x1549   :  { %13002 = vmatprep.mubr.msk.bf16.mxu0 %vm6823_vm4, %v13855_v33  ;;  %v13878_v33 = vld [vmem:[%s16708_s6 + $0x2b0] sm:$0xff]  }
0x15e8   :  { %v12952_v12 = vpop.f32.mrf.mxu0 }
0x15e9   :  { %v7666_v22 = vadd.f32 %v12952_v12, %v7485_v62  ;;  %v13860_v62 = vld [vmem:[%s16708_s6 + $0x220] sm:$0xff]   ;;  %v13869_v12 = vld [vmem:[%s16708_s6 + $0x268] sm:$0xff]  }
0x15ea   :  { %v7649_v15 = vpop.f32.mrf.mxu0 }
0x15eb   :  { %v7664_v23 = vadd.f32 %v7649_v15, %v7483_v0  ;;  %v13862_v0 = vld [vmem:[%s16708_s6 + $0x210] sm:$0xff]   ;;  %v13871_v15 = vld [vmem:[%s16708_s6 + $0x258] sm:$0xff]  }
0x15ec   :  { %v12953_v24 = vpop.f32.mrf.mxu0 }
0x15ed   :  { %v7667_v25 = vadd.f32 %v12953_v24, %v7486_v1  ;;  %v13864_v1 = vld [vmem:[%s16708_s6 + $0x200] sm:$0xff]   ;;  %v13873_v24 = vld [vmem:[%s16708_s6 + $0x248] sm:$0xff]  }
0x15ee   :  { %v7652_v27 = vpop.f32.mrf.mxu0 }
0x15ef   :  { %v7665_v18 = vadd.f32 %v7652_v27, %v7484_v4  ;;  %v13875_v27 = vld [vmem:[%s16709_s7 + $0x90] sm:$0xff]  }
0x1608   :  { %v7767_v2 = vpop.f32.mrf.mxu0 }
0x160a   :  { %v12972_v28 = vpop.f32.mrf.mxu0 }
0x160c   :  { %v7770_v21 = vpop.f32.mrf.mxu0 }
0x160d   :  { %v7774_v30 = vpack.c.bf16 %v7770_v21, %v7767_v2 }
0x160e   :  { %v12973_v31 = vpop.f32.mrf.mxu0 }
0x160f   :  { %12974 = vmatprep.subr.bf16.mxu1 %v7774_v30 }
0x1610   :  { %12975 = vmatpush3.bf16.msra.mxu1 %v7774_v30 }
0x1611   :  { %12980 = vmatprep.subr.bf16.mxu1 %v13976_v34 }
0x1613   :  { %12977 = vmatmul.mubr.msk.bf16.vlgmr.msra.gmra.mxu1 %vm6823_vm4, %v13846_v32 }
0x1614   :  { %12981 = vmatpush3.bf16.msra.mxu1 %v13847_v35  ;;  %12996 = vmatprep.mubr.msk.bf16.mxu1 %vm13977_vm1, %v13976_v34 }
0x1615   :  { %12982 = vmatprep.subr.bf16.mxu1 %v13976_v34 }
0x1618   :  { %12983 = vmatpush3.bf16.msra.mxu1 %v13848_v26 }
0x1619   :  { %12984 = vmatprep.subr.bf16.mxu1 %v13976_v34 }
0x161c   :  { %12985 = vmatpush3.bf16.msra.mxu1 %v13849_v29 }
0x161d   :  { %12986 = vmatprep.subr.bf16.mxu1 %v13976_v34 }
0x1620   :  { %12987 = vmatpush3.bf16.msra.mxu1 %v13850_v36 }
0x1621   :  { %12988 = vmatprep.subr.bf16.mxu1 %v13976_v34 }
0x1624   :  { %12989 = vmatpush3.bf16.msra.mxu1 %v13851_v38 }
0x1625   :  { %12990 = vmatprep.subr.bf16.mxu1 %v13976_v34 }
0x1628   :  { %12991 = vmatpush3.bf16.msra.mxu1 %v13852_v39 }
0x1629   :  { %12992 = vmatprep.subr.bf16.mxu1 %v13976_v34 }
0x162c   :  { %12993 = vmatpush3.bf16.msra.mxu1 %v13853_v40  ;;  %v13876_v40 = vld [vmem:[%s16709_s7 + $0x98] sm:$0xff]  }
0x162d   :  { %12994 = vmatprep.subr.bf16.mxu1 %v13976_v34 }
0x1630   :  { %12995 = vmatpush3.bf16.msra.mxu1 %v13854_v42  ;;  %v13877_v42 = vld [vmem:[%s16708_s6 + $0x2b8] sm:$0xff]  }
0x1633   :  { %12997 = vmatmul.mubr.bf16.vlgmr.msra.gmra.mxu1 %v15986_v7 }
0x1634   :  { %13028 = vmatprep.mubr.msk.bf16.mxu1 %vm6823_vm4, %v13865_v59  ;;  %v13888_v59 = vld [vmem:[%s16708_s6 + $0x2f0] sm:$0xff]  }
0x16d3   :  { %v12978_v43 = vpop.f32.mrf.mxu1 }
0x16d4   :  { %v7847_v37 = vadd.f32 %v12978_v43, %v7666_v22  ;;  %v13870_v22 = vld [vmem:[%s16708_s6 + $0x260] sm:$0xff]   ;;  %v13879_v43 = vld [vmem:[%s16708_s6 + $0x2a8] sm:$0xff]  }
0x16d5   :  { %v7830_v45 = vpop.f32.mrf.mxu1 }
0x16d6   :  { %v7845_v47 = vadd.f32 %v7830_v45, %v7664_v23  ;;  %v13872_v23 = vld [vmem:[%s16708_s6 + $0x250] sm:$0xff]   ;;  %v13881_v45 = vld [vmem:[%s16708_s6 + $0x298] sm:$0xff]  }
0x16d7   :  { %v12979_v49 = vpop.f32.mrf.mxu1 }
0x16d8   :  { %v7848_v50 = vadd.f32 %v12979_v49, %v7667_v25  ;;  %v13874_v25 = vld [vmem:[%s16708_s6 + $0x240] sm:$0xff]   ;;  %v13883_v49 = vld [vmem:[%s16708_s6 + $0x288] sm:$0xff]  }
0x16d9   :  { %v7833_v44 = vpop.f32.mrf.mxu1 }
0x16da   :  { %v7846_v6 = vadd.f32 %v7833_v44, %v7665_v18  ;;  %v13885_v44 = vld [vmem:[%s16709_s7 + $0xa0] sm:$0xff]  }
0x16f3   :  { %v7948_v52 = vpop.f32.mrf.mxu1 }
0x16f5   :  { %v12998_v46 = vpop.f32.mrf.mxu1 }
0x16f7   :  { %v7951_v41 = vpop.f32.mrf.mxu1 }
0x16f8   :  { %v7955_v54 = vpack.c.bf16 %v7951_v41, %v7948_v52 }
0x16f9   :  { %v12999_v56 = vpop.f32.mrf.mxu1 }
0x16fa   :  { %13000 = vmatprep.subr.bf16.mxu0 %v7955_v54 }
0x16fb   :  { %13001 = vmatpush3.bf16.msra.mxu0 %v7955_v54 }
0x16fc   :  { %13006 = vmatprep.subr.bf16.mxu0 %v13976_v34 }
0x16fe   :  { %13003 = vmatmul.mubr.msk.bf16.vlgmr.msra.gmra.mxu0 %vm6823_vm4, %v13856_v57 }
0x16ff   :  { %13007 = vmatpush3.bf16.msra.mxu0 %v13857_v51  ;;  %13022 = vmatprep.mubr.msk.bf16.mxu0 %vm13977_vm1, %v13976_v34 }
0x1700   :  { %13008 = vmatprep.subr.bf16.mxu0 %v13976_v34 }
0x1703   :  { %13009 = vmatpush3.bf16.msra.mxu0 %v13858_v60 }
0x1704   :  { %13010 = vmatprep.subr.bf16.mxu0 %v13976_v34 }
0x1707   :  { %13011 = vmatpush3.bf16.msra.mxu0 %v13859_v3 }
0x1708   :  { %13012 = vmatprep.subr.bf16.mxu0 %v13976_v34 }
0x170b   :  { %13013 = vmatpush3.bf16.msra.mxu0 %v13860_v62 }
0x170c   :  { %13014 = vmatprep.subr.bf16.mxu0 %v13976_v34 }
0x170f   :  { %13015 = vmatpush3.bf16.msra.mxu0 %v13861_v53 }
0x1710   :  { %13016 = vmatprep.subr.bf16.mxu0 %v13976_v34 }
0x1713   :  { %13017 = vmatpush3.bf16.msra.mxu0 %v13862_v0 }
0x1714   :  { %13018 = vmatprep.subr.bf16.mxu0 %v13976_v34 }
0x1717   :  { %13019 = vmatpush3.bf16.msra.mxu0 %v13863_v48  ;;  %v13886_v48 = vld [vmem:[%s16709_s7 + $0xa8] sm:$0xff]  }
0x1718   :  { %13020 = vmatprep.subr.bf16.mxu0 %v13976_v34 }
0x171b   :  { %13021 = vmatpush3.bf16.msra.mxu0 %v13864_v1  ;;  %v13887_v1 = vld [vmem:[%s16708_s6 + $0x2f8] sm:$0xff]  }
0x171e   :  { %13023 = vmatmul.mubr.bf16.vlgmr.msra.gmra.mxu0 %v15986_v7 }
0x171f   :  { %13054 = vmatprep.mubr.msk.bf16.mxu0 %vm6823_vm4, %v13875_v27  ;;  %v13898_v27 = vld [vmem:[%s16708_s6 + $0x330] sm:$0xff]  }
0x17be   :  { %v13004_v4 = vpop.f32.mrf.mxu0 }
0x17bf   :  { %v8028_v8 = vadd.f32 %v13004_v4, %v7847_v37  ;;  %v13880_v37 = vld [vmem:[%s16708_s6 + $0x2a0] sm:$0xff]   ;;  %v13889_v4 = vld [vmem:[%s16708_s6 + $0x2e8] sm:$0xff]  }
0x17c0   :  { %v8011_v61 = vpop.f32.mrf.mxu0 }
0x17c1   :  { %v8026_v9 = vadd.f32 %v8011_v61, %v7845_v47  ;;  %v13882_v47 = vld [vmem:[%s16708_s6 + $0x290] sm:$0xff]   ;;  %v13891_v61 = vld [vmem:[%s16708_s6 + $0x2d8] sm:$0xff]  }
0x17c2   :  { %v13005_v55 = vpop.f32.mrf.mxu0 }
0x17c3   :  { %v8029_v63 = vadd.f32 %v13005_v55, %v7848_v50  ;;  %v13884_v50 = vld [vmem:[%s16708_s6 + $0x280] sm:$0xff]   ;;  %v13893_v55 = vld [vmem:[%s16708_s6 + $0x2c8] sm:$0xff]  }
0x17c4   :  { %v8014_v10 = vpop.f32.mrf.mxu0 }
0x17c5   :  { %v8027_v11 = vadd.f32 %v8014_v10, %v7846_v6  ;;  %v13895_v10 = vld [vmem:[%s16709_s7 + $0xb0] sm:$0xff]  }
0x17de   :  { %v8129_v13 = vpop.f32.mrf.mxu0 }
0x17e0   :  { %v13024_v5 = vpop.f32.mrf.mxu0 }
0x17e2   :  { %v8132_v14 = vpop.f32.mrf.mxu0 }
0x17e3   :  { %v8136_v58 = vpack.c.bf16 %v8132_v14, %v8129_v13 }
0x17e4   :  { %v13025_v16 = vpop.f32.mrf.mxu0 }
0x17e5   :  { %13026 = vmatprep.subr.bf16.mxu1 %v8136_v58 }
0x17e6   :  { %13027 = vmatpush3.bf16.msra.mxu1 %v8136_v58 }
0x17e7   :  { %13032 = vmatprep.subr.bf16.mxu1 %v13976_v34 }
0x17e9   :  { %13029 = vmatmul.mubr.msk.bf16.vlgmr.msra.gmra.mxu1 %vm6823_vm4, %v13866_v17 }
0x17ea   :  { %13033 = vmatpush3.bf16.msra.mxu1 %v13867_v19  ;;  %13048 = vmatprep.mubr.msk.bf16.mxu1 %vm13977_vm1, %v13976_v34 }
0x17eb   :  { %13034 = vmatprep.subr.bf16.mxu1 %v13976_v34 }
0x17ee   :  { %13035 = vmatpush3.bf16.msra.mxu1 %v13868_v20 }
0x17ef   :  { %13036 = vmatprep.subr.bf16.mxu1 %v13976_v34 }
0x17f2   :  { %13037 = vmatpush3.bf16.msra.mxu1 %v13869_v12 }
0x17f3   :  { %13038 = vmatprep.subr.bf16.mxu1 %v13976_v34 }
0x17f6   :  { %13039 = vmatpush3.bf16.msra.mxu1 %v13870_v22 }
0x17f7   :  { %13040 = vmatprep.subr.bf16.mxu1 %v13976_v34 }
0x17fa   :  { %13041 = vmatpush3.bf16.msra.mxu1 %v13871_v15 }
0x17fb   :  { %13042 = vmatprep.subr.bf16.mxu1 %v13976_v34 }
0x17fe   :  { %13043 = vmatpush3.bf16.msra.mxu1 %v13872_v23 }
0x17ff   :  { %13044 = vmatprep.subr.bf16.mxu1 %v13976_v34 }
0x1802   :  { %13045 = vmatpush3.bf16.msra.mxu1 %v13873_v24  ;;  %v13896_v24 = vld [vmem:[%s16709_s7 + $0xb8] sm:$0xff]  }
0x1803   :  { %13046 = vmatprep.subr.bf16.mxu1 %v13976_v34 }
0x1806   :  { %13047 = vmatpush3.bf16.msra.mxu1 %v13874_v25  ;;  %v13897_v25 = vld [vmem:[%s16708_s6 + $0x338] sm:$0xff]  }
0x1809   :  { %13049 = vmatmul.mubr.bf16.vlgmr.msra.gmra.mxu1 %v15986_v7 }
0x180a   :  { %13080 = vmatprep.mubr.msk.bf16.mxu1 %vm6823_vm4, %v13885_v44  ;;  %v13908_v44 = vld [vmem:[%s16708_s6 + $0x370] sm:$0xff]  }
0x18a9   :  { %v13030_v18 = vpop.f32.mrf.mxu1 }
0x18aa   :  { %v8209_v2 = vadd.f32 %v13030_v18, %v8028_v8  ;;  %v13890_v8 = vld [vmem:[%s16708_s6 + $0x2e0] sm:$0xff]   ;;  %v13899_v18 = vld [vmem:[%s16708_s6 + $0x328] sm:$0xff]  }
0x18ab   :  { %v8192_v28 = vpop.f32.mrf.mxu1 }
0x18ac   :  { %v8207_v21 = vadd.f32 %v8192_v28, %v8026_v9  ;;  %v13892_v9 = vld [vmem:[%s16708_s6 + $0x2d0] sm:$0xff]   ;;  %v13901_v28 = vld [vmem:[%s16708_s6 + $0x318] sm:$0xff]  }
0x18ad   :  { %v13031_v30 = vpop.f32.mrf.mxu1 }
0x18ae   :  { %v8210_v31 = vadd.f32 %v13031_v30, %v8029_v63  ;;  %v13894_v63 = vld [vmem:[%s16708_s6 + $0x2c0] sm:$0xff]   ;;  %v13903_v30 = vld [vmem:[%s16708_s6 + $0x308] sm:$0xff]  }
0x18af   :  { %v8195_v32 = vpop.f32.mrf.mxu1 }
0x18b0   :  { %v8208_v35 = vadd.f32 %v8195_v32, %v8027_v11  ;;  %v13905_v32 = vld [vmem:[%s16709_s7 + $0xc0] sm:$0xff]  }
0x18c9   :  { %v8310_v26 = vpop.f32.mrf.mxu1 }
0x18cb   :  { %v13050_v29 = vpop.f32.mrf.mxu1 }
0x18cd   :  { %v8313_v36 = vpop.f32.mrf.mxu1 }
0x18ce   :  { %v8317_v38 = vpack.c.bf16 %v8313_v36, %v8310_v26 }
0x18cf   :  { %v13051_v39 = vpop.f32.mrf.mxu1 }
0x18d0   :  { %13052 = vmatprep.subr.bf16.mxu0 %v8317_v38 }
0x18d1   :  { %13053 = vmatpush3.bf16.msra.mxu0 %v8317_v38 }
0x18d2   :  { %13058 = vmatprep.subr.bf16.mxu0 %v13976_v34 }
0x18d4   :  { %13055 = vmatmul.mubr.msk.bf16.vlgmr.msra.gmra.mxu0 %vm6823_vm4, %v13876_v40 }
0x18d5   :  { %13059 = vmatpush3.bf16.msra.mxu0 %v13877_v42  ;;  %13074 = vmatprep.mubr.msk.bf16.mxu0 %vm13977_vm1, %v13976_v34 }
0x18d6   :  { %13060 = vmatprep.subr.bf16.mxu0 %v13976_v34 }
0x18d9   :  { %13061 = vmatpush3.bf16.msra.mxu0 %v13878_v33 }
0x18da   :  { %13062 = vmatprep.subr.bf16.mxu0 %v13976_v34 }
0x18dd   :  { %13063 = vmatpush3.bf16.msra.mxu0 %v13879_v43 }
0x18de   :  { %13064 = vmatprep.subr.bf16.mxu0 %v13976_v34 }
0x18e1   :  { %13065 = vmatpush3.bf16.msra.mxu0 %v13880_v37 }
0x18e2   :  { %13066 = vmatprep.subr.bf16.mxu0 %v13976_v34 }
0x18e5   :  { %13067 = vmatpush3.bf16.msra.mxu0 %v13881_v45 }
0x18e6   :  { %13068 = vmatprep.subr.bf16.mxu0 %v13976_v34 }
0x18e9   :  { %13069 = vmatpush3.bf16.msra.mxu0 %v13882_v47 }
0x18ea   :  { %13070 = vmatprep.subr.bf16.mxu0 %v13976_v34 }
0x18ed   :  { %13071 = vmatpush3.bf16.msra.mxu0 %v13883_v49  ;;  %v13906_v49 = vld [vmem:[%s16709_s7 + $0xc8] sm:$0xff]  }
0x18ee   :  { %13072 = vmatprep.subr.bf16.mxu0 %v13976_v34 }
0x18f1   :  { %13073 = vmatpush3.bf16.msra.mxu0 %v13884_v50  ;;  %v13907_v50 = vld [vmem:[%s16708_s6 + $0x378] sm:$0xff]  }
0x18f4   :  { %13075 = vmatmul.mubr.bf16.vlgmr.msra.gmra.mxu0 %v15986_v7 }
0x18f5   :  { %13106 = vmatprep.mubr.msk.bf16.mxu0 %vm6823_vm4, %v13895_v10  ;;  %v13918_v10 = vld [vmem:[%s16708_s6 + $0x3b0] sm:$0xff]  }
0x1994   :  { %v13056_v6 = vpop.f32.mrf.mxu0 }
0x1995   :  { %v8390_v52 = vadd.f32 %v13056_v6, %v8209_v2  ;;  %v13900_v2 = vld [vmem:[%s16708_s6 + $0x320] sm:$0xff]   ;;  %v13909_v6 = vld [vmem:[%s16708_s6 + $0x368] sm:$0xff]  }
0x1996   :  { %v8373_v46 = vpop.f32.mrf.mxu0 }
0x1997   :  { %v8388_v41 = vadd.f32 %v8373_v46, %v8207_v21  ;;  %v13902_v21 = vld [vmem:[%s16708_s6 + $0x310] sm:$0xff]   ;;  %v13911_v46 = vld [vmem:[%s16708_s6 + $0x358] sm:$0xff]  }
0x1998   :  { %v13057_v54 = vpop.f32.mrf.mxu0 }
0x1999   :  { %v8391_v56 = vadd.f32 %v13057_v54, %v8210_v31  ;;  %v13904_v31 = vld [vmem:[%s16708_s6 + $0x300] sm:$0xff]   ;;  %v13913_v54 = vld [vmem:[%s16708_s6 + $0x348] sm:$0xff]  }
0x199a   :  { %v8376_v57 = vpop.f32.mrf.mxu0 }
0x199b   :  { %v8389_v51 = vadd.f32 %v8376_v57, %v8208_v35  ;;  %v13915_v57 = vld [vmem:[%s16709_s7 + $0xd0] sm:$0xff]  }
0x19b4   :  { %v8491_v60 = vpop.f32.mrf.mxu0 }
0x19b6   :  { %v13076_v3 = vpop.f32.mrf.mxu0 }
0x19b8   :  { %v8494_v62 = vpop.f32.mrf.mxu0 }
0x19b9   :  { %v8498_v53 = vpack.c.bf16 %v8494_v62, %v8491_v60 }
0x19ba   :  { %v13077_v0 = vpop.f32.mrf.mxu0 }
0x19bb   :  { %13078 = vmatprep.subr.bf16.mxu1 %v8498_v53 }
0x19bc   :  { %13079 = vmatpush3.bf16.msra.mxu1 %v8498_v53 }
0x19bd   :  { %13084 = vmatprep.subr.bf16.mxu1 %v13976_v34 }
0x19bf   :  { %13081 = vmatmul.mubr.msk.bf16.vlgmr.msra.gmra.mxu1 %vm6823_vm4, %v13886_v48 }
0x19c0   :  { %13085 = vmatpush3.bf16.msra.mxu1 %v13887_v1  ;;  %13100 = vmatprep.mubr.msk.bf16.mxu1 %vm13977_vm1, %v13976_v34 }
0x19c1   :  { %13086 = vmatprep.subr.bf16.mxu1 %v13976_v34 }
0x19c4   :  { %13087 = vmatpush3.bf16.msra.mxu1 %v13888_v59 }
0x19c5   :  { %13088 = vmatprep.subr.bf16.mxu1 %v13976_v34 }
0x19c8   :  { %13089 = vmatpush3.bf16.msra.mxu1 %v13889_v4 }
0x19c9   :  { %13090 = vmatprep.subr.bf16.mxu1 %v13976_v34 }
0x19cc   :  { %13091 = vmatpush3.bf16.msra.mxu1 %v13890_v8 }
0x19cd   :  { %13092 = vmatprep.subr.bf16.mxu1 %v13976_v34 }
0x19d0   :  { %13093 = vmatpush3.bf16.msra.mxu1 %v13891_v61 }
0x19d1   :  { %13094 = vmatprep.subr.bf16.mxu1 %v13976_v34 }
0x19d4   :  { %13095 = vmatpush3.bf16.msra.mxu1 %v13892_v9 }
0x19d5   :  { %13096 = vmatprep.subr.bf16.mxu1 %v13976_v34 }
0x19d8   :  { %13097 = vmatpush3.bf16.msra.mxu1 %v13893_v55  ;;  %v13916_v55 = vld [vmem:[%s16709_s7 + $0xd8] sm:$0xff]  }
0x19d9   :  { %13098 = vmatprep.subr.bf16.mxu1 %v13976_v34 }
0x19dc   :  { %13099 = vmatpush3.bf16.msra.mxu1 %v13894_v63  ;;  %v13917_v63 = vld [vmem:[%s16708_s6 + $0x3b8] sm:$0xff]  }
0x19df   :  { %13101 = vmatmul.mubr.bf16.vlgmr.msra.gmra.mxu1 %v15986_v7 }
0x19e0   :  { %13132 = vmatprep.mubr.msk.bf16.mxu1 %vm6823_vm4, %v13905_v32  ;;  %v13928_v32 = vld [vmem:[%s16708_s6 + $0x3f0] sm:$0xff]  }
0x1a7f   :  { %v13082_v11 = vpop.f32.mrf.mxu1 }
0x1a80   :  { %v8571_v13 = vadd.f32 %v13082_v11, %v8390_v52  ;;  %v13910_v52 = vld [vmem:[%s16708_s6 + $0x360] sm:$0xff]   ;;  %v13919_v11 = vld [vmem:[%s16708_s6 + $0x3a8] sm:$0xff]  }
0x1a81   :  { %v8554_v5 = vpop.f32.mrf.mxu1 }
0x1a82   :  { %v8569_v14 = vadd.f32 %v8554_v5, %v8388_v41  ;;  %v13912_v41 = vld [vmem:[%s16708_s6 + $0x350] sm:$0xff]   ;;  %v13921_v5 = vld [vmem:[%s16708_s6 + $0x398] sm:$0xff]  }
0x1a83   :  { %v13083_v58 = vpop.f32.mrf.mxu1 }
0x1a84   :  { %v8572_v16 = vadd.f32 %v13083_v58, %v8391_v56  ;;  %v13914_v56 = vld [vmem:[%s16708_s6 + $0x340] sm:$0xff]   ;;  %v13923_v58 = vld [vmem:[%s16708_s6 + $0x388] sm:$0xff]  }
0x1a85   :  { %v8557_v17 = vpop.f32.mrf.mxu1 }
0x1a86   :  { %v8570_v19 = vadd.f32 %v8557_v17, %v8389_v51  ;;  %v13925_v17 = vld [vmem:[%s16709_s7 + $0xe0] sm:$0xff]  }
0x1a9f   :  { %v8672_v20 = vpop.f32.mrf.mxu1 }
0x1aa1   :  { %v13102_v12 = vpop.f32.mrf.mxu1 }
0x1aa3   :  { %v8675_v22 = vpop.f32.mrf.mxu1 }
0x1aa4   :  { %v8679_v15 = vpack.c.bf16 %v8675_v22, %v8672_v20 }
0x1aa5   :  { %v13103_v23 = vpop.f32.mrf.mxu1 }
0x1aa6   :  { %13104 = vmatprep.subr.bf16.mxu0 %v8679_v15 }
0x1aa7   :  { %13105 = vmatpush3.bf16.msra.mxu0 %v8679_v15 }
0x1aa8   :  { %13110 = vmatprep.subr.bf16.mxu0 %v13976_v34 }
0x1aaa   :  { %13107 = vmatmul.mubr.msk.bf16.vlgmr.msra.gmra.mxu0 %vm6823_vm4, %v13896_v24 }
0x1aab   :  { %13111 = vmatpush3.bf16.msra.mxu0 %v13897_v25  ;;  %13126 = vmatprep.mubr.msk.bf16.mxu0 %vm13977_vm1, %v13976_v34 }
0x1aac   :  { %13112 = vmatprep.subr.bf16.mxu0 %v13976_v34 }
0x1aaf   :  { %13113 = vmatpush3.bf16.msra.mxu0 %v13898_v27 }
0x1ab0   :  { %13114 = vmatprep.subr.bf16.mxu0 %v13976_v34 }
0x1ab3   :  { %13115 = vmatpush3.bf16.msra.mxu0 %v13899_v18 }
0x1ab4   :  { %13116 = vmatprep.subr.bf16.mxu0 %v13976_v34 }
0x1ab7   :  { %13117 = vmatpush3.bf16.msra.mxu0 %v13900_v2 }
0x1ab8   :  { %13118 = vmatprep.subr.bf16.mxu0 %v13976_v34 }
0x1abb   :  { %13119 = vmatpush3.bf16.msra.mxu0 %v13901_v28 }
0x1abc   :  { %13120 = vmatprep.subr.bf16.mxu0 %v13976_v34 }
0x1abf   :  { %13121 = vmatpush3.bf16.msra.mxu0 %v13902_v21 }
0x1ac0   :  { %13122 = vmatprep.subr.bf16.mxu0 %v13976_v34 }
0x1ac3   :  { %13123 = vmatpush3.bf16.msra.mxu0 %v13903_v30  ;;  %v13926_v30 = vld [vmem:[%s16709_s7 + $0xe8] sm:$0xff]  }
0x1ac4   :  { %13124 = vmatprep.subr.bf16.mxu0 %v13976_v34 }
0x1ac7   :  { %13125 = vmatpush3.bf16.msra.mxu0 %v13904_v31  ;;  %v13927_v31 = vld [vmem:[%s16708_s6 + $0x3f8] sm:$0xff]  }
0x1aca   :  { %13127 = vmatmul.mubr.bf16.vlgmr.msra.gmra.mxu0 %v15986_v7 }
0x1acb   :  { %13158 = vmatprep.mubr.msk.bf16.mxu0 %vm6823_vm4, %v13915_v57 }
0x1b6a   :  { %v13108_v35 = vpop.f32.mrf.mxu0 }
0x1b6b   :  { %v8752_v26 = vadd.f32 %v13108_v35, %v8571_v13  ;;  %v13920_v13 = vld [vmem:[%s16708_s6 + $0x3a0] sm:$0xff]   ;;  %v13929_v35 = vld [vmem:[%s16708_s6 + $0x3e8] sm:$0xff]  }
0x1b6c   :  { %v8735_v29 = vpop.f32.mrf.mxu0 }
0x1b6d   :  { %v8750_v36 = vadd.f32 %v8735_v29, %v8569_v14  ;;  %v13922_v14 = vld [vmem:[%s16708_s6 + $0x390] sm:$0xff]   ;;  %v13931_v29 = vld [vmem:[%s16708_s6 + $0x3d8] sm:$0xff]  }
0x1b6e   :  { %v13109_v38 = vpop.f32.mrf.mxu0 }
0x1b6f   :  { %v8753_v39 = vadd.f32 %v13109_v38, %v8572_v16  ;;  %v13924_v16 = vld [vmem:[%s16708_s6 + $0x380] sm:$0xff]   ;;  %v13933_v38 = vld [vmem:[%s16708_s6 + $0x3c8] sm:$0xff]  }
0x1b70   :  { %v8738_v40 = vpop.f32.mrf.mxu0 }
0x1b71   :  { %v8751_v42 = vadd.f32 %v8738_v40, %v8570_v19  ;;  %v13935_v40 = vld [vmem:[%s16709_s7 + $0xf0] sm:$0xff]  }
0x1b8a   :  { %v8853_v33 = vpop.f32.mrf.mxu0 }
0x1b8c   :  { %v13128_v43 = vpop.f32.mrf.mxu0 }
0x1b8e   :  { %v8856_v37 = vpop.f32.mrf.mxu0 }
0x1b8f   :  { %v8860_v45 = vpack.c.bf16 %v8856_v37, %v8853_v33 }
0x1b90   :  { %v13129_v47 = vpop.f32.mrf.mxu0 }
0x1b91   :  { %13130 = vmatprep.subr.bf16.mxu1 %v8860_v45 }
0x1b92   :  { %13131 = vmatpush3.bf16.msra.mxu1 %v8860_v45 }
0x1b93   :  { %13136 = vmatprep.subr.bf16.mxu1 %v13976_v34 }
0x1b95   :  { %13133 = vmatmul.mubr.msk.bf16.vlgmr.msra.gmra.mxu1 %vm6823_vm4, %v13906_v49 }
0x1b96   :  { %13137 = vmatpush3.bf16.msra.mxu1 %v13907_v50  ;;  %13152 = vmatprep.mubr.msk.bf16.mxu1 %vm13977_vm1, %v13976_v34 }
0x1b97   :  { %13138 = vmatprep.subr.bf16.mxu1 %v13976_v34 }
0x1b9a   :  { %13139 = vmatpush3.bf16.msra.mxu1 %v13908_v44 }
0x1b9b   :  { %13140 = vmatprep.subr.bf16.mxu1 %v13976_v34 }
0x1b9e   :  { %13141 = vmatpush3.bf16.msra.mxu1 %v13909_v6 }
0x1b9f   :  { %13142 = vmatprep.subr.bf16.mxu1 %v13976_v34 }
0x1ba2   :  { %13143 = vmatpush3.bf16.msra.mxu1 %v13910_v52 }
0x1ba3   :  { %13144 = vmatprep.subr.bf16.mxu1 %v13976_v34 }
0x1ba6   :  { %13145 = vmatpush3.bf16.msra.mxu1 %v13911_v46 }
0x1ba7   :  { %13146 = vmatprep.subr.bf16.mxu1 %v13976_v34 }
0x1baa   :  { %13147 = vmatpush3.bf16.msra.mxu1 %v13912_v41 }
0x1bab   :  { %13148 = vmatprep.subr.bf16.mxu1 %v13976_v34 }
0x1bae   :  { %13149 = vmatpush3.bf16.msra.mxu1 %v13913_v54 }
0x1baf   :  { %13150 = vmatprep.subr.bf16.mxu1 %v13976_v34 }
0x1bb2   :  { %13151 = vmatpush3.bf16.msra.mxu1 %v13914_v56 }
0x1bb5   :  { %13153 = vmatmul.mubr.bf16.vlgmr.msra.gmra.mxu1 %v15986_v7 }
0x1bb6   :  { %13184 = vmatprep.mubr.msk.bf16.mxu1 %vm6823_vm4, %v13925_v17 }
0x1c55   :  { %v13134_v51 = vpop.f32.mrf.mxu1 }
0x1c56   :  { %v8933_v60 = vadd.f32 %v13134_v51, %v8752_v26  ;;  %v13930_v26 = vld [vmem:[%s16708_s6 + $0x3e0] sm:$0xff]  }
0x1c57   :  { %v8916_v3 = vpop.f32.mrf.mxu1 }
0x1c58   :  { %v8931_v62 = vadd.f32 %v8916_v3, %v8750_v36  ;;  %v13932_v36 = vld [vmem:[%s16708_s6 + $0x3d0] sm:$0xff]  }
0x1c59   :  { %v13135_v53 = vpop.f32.mrf.mxu1 }
0x1c5a   :  { %v8934_v0 = vadd.f32 %v13135_v53, %v8753_v39  ;;  %v13934_v39 = vld [vmem:[%s16708_s6 + $0x3c0] sm:$0xff]  }
0x1c5b   :  { %v8919_v48 = vpop.f32.mrf.mxu1 }
0x1c5c   :  { %v8932_v1 = vadd.f32 %v8919_v48, %v8751_v42 }
0x1c75   :  { %v9034_v59 = vpop.f32.mrf.mxu1 }
0x1c77   :  { %v13154_v4 = vpop.f32.mrf.mxu1 }
0x1c79   :  { %v9037_v8 = vpop.f32.mrf.mxu1 }
0x1c7a   :  { %v9041_v61 = vpack.c.bf16 %v9037_v8, %v9034_v59 }
0x1c7b   :  { %v13155_v9 = vpop.f32.mrf.mxu1 }
0x1c7c   :  { %13156 = vmatprep.subr.bf16.mxu0 %v9041_v61 }
0x1c7d   :  { %13157 = vmatpush3.bf16.msra.mxu0 %v9041_v61 }
0x1c7e   :  { %13162 = vmatprep.subr.bf16.mxu0 %v13976_v34 }
0x1c80   :  { %13159 = vmatmul.mubr.msk.bf16.vlgmr.msra.gmra.mxu0 %vm6823_vm4, %v13916_v55 }
0x1c81   :  { %13163 = vmatpush3.bf16.msra.mxu0 %v13917_v63  ;;  %13178 = vmatprep.mubr.msk.bf16.mxu0 %vm13977_vm1, %v13976_v34 }
0x1c82   :  { %13164 = vmatprep.subr.bf16.mxu0 %v13976_v34 }
0x1c85   :  { %13165 = vmatpush3.bf16.msra.mxu0 %v13918_v10 }
0x1c86   :  { %13166 = vmatprep.subr.bf16.mxu0 %v13976_v34 }
0x1c89   :  { %13167 = vmatpush3.bf16.msra.mxu0 %v13919_v11 }
0x1c8a   :  { %13168 = vmatprep.subr.bf16.mxu0 %v13976_v34 }
0x1c8d   :  { %13169 = vmatpush3.bf16.msra.mxu0 %v13920_v13 }
0x1c8e   :  { %13170 = vmatprep.subr.bf16.mxu0 %v13976_v34 }
0x1c91   :  { %13171 = vmatpush3.bf16.msra.mxu0 %v13921_v5 }
0x1c92   :  { %13172 = vmatprep.subr.bf16.mxu0 %v13976_v34 }
0x1c95   :  { %13173 = vmatpush3.bf16.msra.mxu0 %v13922_v14 }
0x1c96   :  { %13174 = vmatprep.subr.bf16.mxu0 %v13976_v34 }
0x1c99   :  { %13175 = vmatpush3.bf16.msra.mxu0 %v13923_v58 }
0x1c9a   :  { %13176 = vmatprep.subr.bf16.mxu0 %v13976_v34 }
0x1c9d   :  { %13177 = vmatpush3.bf16.msra.mxu0 %v13924_v16 }
0x1ca0   :  { %13179 = vmatmul.mubr.bf16.vlgmr.msra.gmra.mxu0 %v15986_v7 }
0x1ca1   :  { %13210 = vmatprep.mubr.msk.bf16.mxu0 %vm6823_vm4, %v13935_v40  ;;  %v9478_v40 = vld [vmem:[%s16710_s8] sm:$0xff] }
0x1d40   :  { %v13160_v19 = vpop.f32.mrf.mxu0 }
0x1d41   :  { %v9114_v20 = vadd.f32 %v13160_v19, %v8933_v60 }
0x1d42   :  { %v9097_v12 = vpop.f32.mrf.mxu0 }
0x1d43   :  { %v9112_v22 = vadd.f32 %v9097_v12, %v8931_v62 }
0x1d44   :  { %v13161_v15 = vpop.f32.mrf.mxu0 }
0x1d45   :  { %v9115_v23 = vadd.f32 %v13161_v15, %v8934_v0 }
0x1d46   :  { %v9100_v24 = vpop.f32.mrf.mxu0 }
0x1d47   :  { %v9113_v25 = vadd.f32 %v9100_v24, %v8932_v1 }
0x1d60   :  { %v9215_v27 = vpop.f32.mrf.mxu0 }
0x1d62   :  { %v13180_v18 = vpop.f32.mrf.mxu0 }
0x1d64   :  { %v9218_v2 = vpop.f32.mrf.mxu0 }
0x1d65   :  { %v9222_v28 = vpack.c.bf16 %v9218_v2, %v9215_v27 }
0x1d66   :  { %v13181_v21 = vpop.f32.mrf.mxu0 }
0x1d67   :  { %13182 = vmatprep.subr.bf16.mxu1 %v9222_v28 }
0x1d68   :  { %13183 = vmatpush3.bf16.msra.mxu1 %v9222_v28 }
0x1d69   :  { %13188 = vmatprep.subr.bf16.mxu1 %v13976_v34 }
0x1d6b   :  { %13185 = vmatmul.mubr.msk.bf16.vlgmr.msra.gmra.mxu1 %vm6823_vm4, %v13926_v30 }
0x1d6c   :  { %13189 = vmatpush3.bf16.msra.mxu1 %v13927_v31  ;;  %13204 = vmatprep.mubr.msk.bf16.mxu1 %vm13977_vm1, %v13976_v34 }
0x1d6d   :  { %13190 = vmatprep.subr.bf16.mxu1 %v13976_v34 }
0x1d70   :  { %13191 = vmatpush3.bf16.msra.mxu1 %v13928_v32 }
0x1d71   :  { %13192 = vmatprep.subr.bf16.mxu1 %v13976_v34 }
0x1d74   :  { %13193 = vmatpush3.bf16.msra.mxu1 %v13929_v35 }
0x1d75   :  { %13194 = vmatprep.subr.bf16.mxu1 %v13976_v34 }
0x1d78   :  { %13195 = vmatpush3.bf16.msra.mxu1 %v13930_v26 }
0x1d79   :  { %13196 = vmatprep.subr.bf16.mxu1 %v13976_v34 }
0x1d7c   :  { %13197 = vmatpush3.bf16.msra.mxu1 %v13931_v29 }
0x1d7d   :  { %13198 = vmatprep.subr.bf16.mxu1 %v13976_v34 }
0x1d80   :  { %13199 = vmatpush3.bf16.msra.mxu1 %v13932_v36 }
0x1d81   :  { %13200 = vmatprep.subr.bf16.mxu1 %v13976_v34 }
0x1d84   :  { %13201 = vmatpush3.bf16.msra.mxu1 %v13933_v38 }
0x1d85   :  { %13202 = vmatprep.subr.bf16.mxu1 %v13976_v34 }
0x1d88   :  { %13203 = vmatpush3.bf16.msra.mxu1 %v13934_v39 }
0x1d8b   :  { %13205 = vmatmul.mubr.bf16.vlgmr.msra.gmra.mxu1 %v15986_v7  ;;  %v13936_v7 = vld [vmem:[%s16709_s7 + $0xf8] sm:$0xff]  }
0x1e2b   :  { %v13186_v42 = vpop.f32.mrf.mxu1 }
0x1e2c   :  { %v9295_v33 = vadd.f32 %v13186_v42, %v9114_v20 }
0x1e2d   :  { %v9278_v43 = vpop.f32.mrf.mxu1 }
0x1e2e   :  { %v9293_v37 = vadd.f32 %v9278_v43, %v9112_v22 }
0x1e2f   :  { %v13187_v45 = vpop.f32.mrf.mxu1 }
0x1e30   :  { %v9296_v47 = vadd.f32 %v13187_v45, %v9115_v23 }
0x1e31   :  { %v9281_v49 = vpop.f32.mrf.mxu1 }
0x1e32   :  { %v9294_v50 = vadd.f32 %v9281_v49, %v9113_v25 }
0x1e4b   :  { %v9396_v44 = vpop.f32.mrf.mxu1 }
0x1e4d   :  { %v13206_v6 = vpop.f32.mrf.mxu1 }
0x1e4e   :  { %v9481_v6 = vld [vmem:[%s16710_s8 + $0x18] sm:$0xff] }
0x1e4f   :  { %v9399_v52 = vpop.f32.mrf.mxu1 }
0x1e50   :  { %v9403_v46 = vpack.c.bf16 %v9399_v52, %v9396_v44  ;;  %v9483_v44 = vld [vmem:[%s16711_s9 + $0x8] sm:$0xff] }
0x1e51   :  { %v13207_v41 = vpop.f32.mrf.mxu1 }
0x1e52   :  { %13208 = vmatprep.subr.bf16.mxu0 %v9403_v46 }
0x1e53   :  { %13209 = vmatpush3.bf16.msra.mxu0 %v9403_v46 }
0x1e54   :  { %13214 = vmatprep.subr.mxu0 %v13976_v34 }
0x1e56   :  { %13211 = vmatmul.mubr.msk.bf16.vlgmr.msra.gmra.mxu0 %vm6823_vm4, %v13936_v7 }
0x1e57   :  { %13222 = vmatprep.mubr.msk.f32.mxu0 %vm13977_vm1, %v13976_v34 }
0x1f16   :  { %v13212_v54 = vpop.f32.mrf.mxu0 }
0x1f17   :  { %v16611_v56 = vadd.f32 %v13212_v54, %v9295_v33  ;;  %v9480_v33 = vld [vmem:[%s16710_s8 + $0x10] sm:$0xff] }
0x1f18   :  { %v9459_v57 = vpop.f32.mrf.mxu0 }
0x1f19   :  { %v16613_v51 = vadd.f32 %v9459_v57, %v9293_v37  ;;  %v9493_v60 = vsel %vm9486_vm5, %v16611_v56, 0.0  ;;  %v9505_v59 = vmul.f32 %v16611_v56, %v16611_v56 }
0x1f1a   :  { %9494 = vadd.xlane.f32.xlu1 %v9493_v60  ;;  %v13213_v3 = vpop.f32.mrf.mxu0  ;;  %v9484_v60 = vld [vmem:[%s16711_s9 + $0x10] sm:$0xff] }
0x1f1b   :  { %v9487_v0 = vsel %vm9486_vm5, %v16613_v51, 0.0  ;;  %v9503_v48 = vmul.f32 %v16613_v51, %v16613_v51  ;;  %v16627_v4 = vadd.f32 %v13213_v3, %v9296_v47  ;;  %v9513_v61 = vsel %vm9486_vm5, %v9505_v59, 0.0  ;;  %v9479_v47 = vld [vmem:[%s16710_s8 + $0x8] sm:$0xff]  ;;  %v9482_v3 = vld [vmem:[%s16711_s9] sm:$0xff] }
0x1f1c   :  { %v9462_v62 = vpop.f32.mrf.mxu0 }
0x1f1d   :  { %v16617_v53 = vadd.f32 %v9462_v62, %v9294_v50  ;;  %v9507_v8 = vsel %vm9486_vm5, %v9503_v48, 0.0  ;;  %v9496_v9 = vsel %vm9486_vm5, %v16627_v4, 0.0  ;;  %v9506_v10 = vmul.f32 %v16627_v4, %v16627_v4 }
0x1f1e   :  { %9488 = vadd.xlane.f32.xlu1 %v9487_v0 }
0x1f1f   :  { %v9490_v1 = vsel %vm9486_vm5, %v16617_v53, 0.0  ;;  %v9504_v55 = vmul.f32 %v16617_v53, %v16617_v53  ;;  %v9516_v11 = vsel %vm9486_vm5, %v9506_v10, 0.0 }
0x1f20   :  { %9491 = vadd.xlane.f32.xlu0 %v9490_v1  ;;  %v9485_v1 = vld [vmem:[%s16711_s9 + $0x18] sm:$0xff] }
0x1f21   :  { %v9510_v63 = vsel %vm9486_vm5, %v9504_v55, 0.0  ;;  %v9628_v55 = vld [vmem:[%s16713_s11] sm:$0xff] }
0x1f22   :  { %9508 = vadd.xlane.f32.xlu1 %v9507_v8  ;;  %v9631_v8 = vld [vmem:[%s16713_s11 + $0x18] sm:$0xff] }
0x1f23   :  { %13215 = vmatpush3.msra.mxu0 %v9631_v8 }
0x1f24   :  { %9514 = vadd.xlane.f32.xlu0 %v9513_v61  ;;  %13216 = vmatprep.subr.mxu0 %v13976_v34  ;;  %v9630_v61 = vld [vmem:[%s16713_s11 + $0x10] sm:$0xff] }
0x1f25   :  { %13217 = vmatpush3.msra.mxu0 %v9630_v61 }
0x1f26   :  { %9497 = vadd.xlane.f32.xlu1 %v9496_v9  ;;  %13218 = vmatprep.subr.mxu0 %v13976_v34  ;;  %v9629_v9 = vld [vmem:[%s16713_s11 + $0x8] sm:$0xff] }
0x1f27   :  { %13219 = vmatpush3.msra.mxu0 %v9629_v9 }
0x1f28   :  { %13220 = vmatprep.subr.mxu0 %v13976_v34 }
0x1f29   :  { %13221 = vmatpush3.msra.mxu0 %v9628_v55 }
0x1f2a   :  { %9511 = vadd.xlane.f32.xlu1 %v9510_v63 }
0x1f2e   :  { %9517 = vadd.xlane.f32.xlu1 %v9516_v11 }
0x1fa3   :  { %v9495_v13 = vpop.xlane.xlu1 %9494 }
0x1fa4   :  { %v9501_v16 = vmul.f32 0.03125, %v9495_v13 }
0x1fa6   :  { %v9525_v22 = vmul.f32 %v9501_v16, %v9501_v16 }
0x1fa7   :  { %v9489_v5 = vpop.xlane.xlu1 %9488 }
0x1fa8   :  { %v9499_v14 = vmul.f32 0.03125, %v9489_v5 }
0x1fa9   :  { %v9492_v58 = vpop.xlane.xlu0 %9491 }
0x1faa   :  { %v9523_v19 = vmul.f32 %v9499_v14, %v9499_v14  ;;  %v9500_v25 = vmul.f32 0.03125, %v9492_v58 }
0x1fab   :  { %v9509_v17 = vpop.xlane.xlu1 %9508 }
0x1fac   :  { %v9519_v20 = vmul.f32 0.03125, %v9509_v17  ;;  %v9524_v21 = vmul.f32 %v9500_v25, %v9500_v25 }
0x1fad   :  { %v9515_v12 = vpop.xlane.xlu0 %9514 }
0x1fae   :  { %v9527_v15 = vsub.f32 %v9519_v20, %v9523_v19  ;;  %v9521_v23 = vmul.f32 0.03125, %v9515_v12 }
0x1faf   :  { %v9498_v24 = vpop.xlane.xlu1 %9497 }
0x1fb0   :  { %v9531_v27 = vadd.f32 1e-05, %v9527_v15  ;;  %v9529_v18 = vsub.f32 %v9521_v23, %v9525_v22  ;;  %v9502_v30 = vmul.f32 0.03125, %v9498_v24  ;;  %v9608_v23 = vld [vmem:[%s16712_s10 + $0x8] sm:$0xff] }
0x1fb2   :  { %13941 = vrsqrt.f32 %v9531_v27  ;;  %v9533_v2 = vadd.f32 1e-05, %v9529_v18  ;;  %v9526_v26 = vmul.f32 %v9502_v30, %v9502_v30 }
0x1fb3   :  { %v9512_v28 = vpop.xlane.xlu1 %9511 }
0x1fb4   :  { %13943 = vrsqrt.f32 %v9533_v2  ;;  %v9520_v31 = vmul.f32 0.03125, %v9512_v28 }
0x1fb6   :  { %v9528_v32 = vsub.f32 %v9520_v31, %v9524_v21 }
0x1fb7   :  { %v9518_v35 = vpop.xlane.xlu1 %9517 }
0x1fb8   :  { %v9532_v29 = vadd.f32 1e-05, %v9528_v32  ;;  %v9522_v36 = vmul.f32 0.03125, %v9518_v35 }
0x1fba   :  { %13945 = vrsqrt.f32 %v9532_v29  ;;  %v9530_v38 = vsub.f32 %v9522_v36, %v9526_v26 }
0x1fbc   :  { %v9534_v39 = vadd.f32 1e-05, %v9530_v38 }
0x1fbe   :  { %13947 = vrsqrt.f32 %v9534_v39 }
0x1fbf   :  { %v13942_v42 = vpop.eup %13941 }
0x1fc0   :  { %v9539_v43 = vmul.f32 %v13942_v42, %v9478_v40 }
0x1fc1   :  { %v13944_v37 = vpop.eup %13943 }
0x1fc2   :  { %9553 = vperm.xlu0 %13229, %v9539_v43   ;;  %v9541_v45 = vmul.f32 %v13944_v37, %v9480_v33  ;;  %v9543_v57 = vmul.f32 %v9539_v43, %v9499_v14 }
0x1fc4   :  { %9563 = vperm.xlu1 %13230, %v9541_v45   ;;  %v9545_v54 = vmul.f32 %v9541_v45, %v9501_v16  ;;  %v9547_v0 = vsub.f32 %v9482_v3, %v9543_v57 }
0x1fc6   :  { %v9549_v62 = vsub.f32 %v9484_v60, %v9545_v54 }
0x1fc7   :  { %v13946_v49 = vpop.eup %13945 }
0x1fc8   :  { %v9540_v50 = vmul.f32 %v13946_v49, %v9479_v47 }
0x1fca   :  { %9558 = vperm.xlu1 %13230, %v9540_v50   ;;  %v9544_v52 = vmul.f32 %v9540_v50, %v9500_v25 }
0x1fcb   :  { %v13948_v46 = vpop.eup %13947 }
0x1fcc   :  { %v9548_v41 = vsub.f32 %v9483_v44, %v9544_v52  ;;  %v9542_v7 = vmul.f32 %v13948_v46, %v9481_v6 }
0x1fce   :  { %9582 = vperm.xlu1 %13230, %v9548_v41   ;;  %9568 = vperm.xlu0 %13229, %v9542_v7   ;;  %v9546_v48 = vmul.f32 %v9542_v7, %v9502_v30 }
0x1fd0   :  { %v9550_v59 = vsub.f32 %v9485_v1, %v9546_v48 }
0x1fd2   :  { %9587 = vperm.xlu1 %13230, %v9549_v62   ;;  %9577 = vperm.xlu0 %13229, %v9547_v0  }
0x1fd6   :  { %9592 = vperm.xlu0 %13229, %v9550_v59  }
0x203d   :  { %v9554_v10 = vpop.permute.xlu0 %9553 }
0x203e   :  { %v9571_v16 = vmul.f32 %v9554_v10, %v16613_v51  ;;  %v9607_v51 = vld [vmem:[%s16712_s10] sm:$0xff] }
0x203f   :  { %v9564_v63 = vpop.permute.xlu1 %9563 }
0x2040   :  { %v9573_v17 = vmul.f32 %v9564_v63, %v16611_v56  ;;  %v9609_v56 = vld [vmem:[%s16712_s10 + $0x10] sm:$0xff] }
0x2045   :  { %v9559_v11 = vpop.permute.xlu1 %9558 }
0x2046   :  { %v9572_v13 = vmul.f32 %v9559_v11, %v16617_v53 }
0x2049   :  { %v9569_v5 = vpop.permute.xlu0 %9568  ;;  %v9583_v14 = vpop.permute.xlu1 %9582 }
0x204a   :  { %v9596_v58 = vadd.f32 %v9583_v14, %v9572_v13  ;;  %v9574_v24 = vmul.f32 %v9569_v5, %v16627_v4  ;;  %v9610_v4 = vld [vmem:[%s16712_s10 + $0x18] sm:$0xff]  ;;  %s13978_s10 = smov [#allocation2]  }
0x204b   :  { %s9719_s20 = sshll.u32 %s13978_s10, 4  ;;  %s9720_s20 = int_to_ptr.vmem [resolvable:$true] %s9719_s20 }
0x204c   :  { %v9600_v19 = vmul.f32 0.2, %v9596_v58  ;;  %s13953_s21 = scalar_lea.vmem %s9720_s20, 16  ;;  %s13957_s22 = scalar_lea.vmem %s9720_s20, 32 }
0x204d   :  { %v9578_v20 = vpop.permute.xlu0 %9577  ;;  %v9588_v34 = vpop.permute.xlu1 %9587  ;;  %p13954_p0 = scmp.ne.s32.totalorder %s9720_s20, %s13953_s21  ;;  %p13958_p1 = scmp.lt.s32.totalorder %s9720_s20, %s9720_s20 }
0x204e   :  { %v9604_v12 = vmax.f32 %v9596_v58, %v9600_v19  ;;  %v9595_v22 = vadd.f32 %v9578_v20, %v9571_v16  ;;  %v9597_v15 = vadd.f32 %v9588_v34, %v9573_v17  ;;  %p13959_p2 = scmp.lt.s32.totalorder %s13957_s22, %s13953_s21 }
0x2050   :  { %v9599_v53 = vmul.f32 0.2, %v9595_v22  ;;  %v9601_v25 = vmul.f32 0.2, %v9597_v15  ;;  %v9612_v18 = vmul.f32 %v9608_v23, %v9604_v12  ;;  %p13960_p3 = por %p13959_p2, %p13958_p1 }
0x2051   :  { %v9593_v27 = vpop.permute.xlu0 %9592 }
0x2052   :  { %v9603_v2 = vmax.f32 %v9595_v22, %v9599_v53  ;;  %v9605_v28 = vmax.f32 %v9597_v15, %v9601_v25  ;;  %v9598_v21 = vadd.f32 %v9593_v27, %v9574_v24  ;;  %v9616_v35 = vsel %vm9486_vm5, %v9612_v18, 0.0  ;;  %p13961_p4 = pnand %p13960_p3, %p13954_p0 }
0x2054   :  { %v9611_v30 = vmul.f32 %v9607_v51, %v9603_v2  ;;  %v9613_v31 = vmul.f32 %v9609_v56, %v9605_v28  ;;  %v9602_v32 = vmul.f32 0.2, %v9598_v21 }
0x2056   :  { %v9615_v26 = vsel %vm9486_vm5, %v9611_v30, 0.0  ;;  %v9606_v29 = vmax.f32 %v9598_v21, %v9602_v32  ;;  %v9618_v38 = vsel %vm9486_vm5, %v9613_v31, 0.0 }
0x2057   :  { %v9617_v36 = vadd.f32 %v9616_v35, %v9615_v26 }
0x2058   :  { %v9614_v39 = vmul.f32 %v9610_v4, %v9606_v29 }
0x2059   :  { %v9619_v40 = vadd.f32 %v9618_v38, %v9617_v36 }
0x205a   :  { %v9620_v42 = vsel %vm9486_vm5, %v9614_v39, 0.0 }
0x205b   :  { %v9621_v33 = vadd.f32 %v9620_v42, %v9619_v40 }
0x205d   :  { %v9622_v43 = vrot.slane %v9621_v33, 4 }
0x205f   :  { %v9623_v37 = vadd.f32 %v9622_v43, %v9621_v33 }
0x2061   :  { %v9624_v45 = vrot.slane %v9623_v37, 2 }
0x2063   :  { %v9625_v47 = vadd.f32 %v9624_v45, %v9623_v37 }
0x2065   :  { %v9626_v49 = vrot.slane %v9625_v47, 1 }
0x2067   :  { %v9627_v50 = vadd.f32 %v9626_v49, %v9625_v47 }
0x2069   :  { %13223 = vmatmul.mubr.msk.f32.vlgmr.msra.gmra.mxu0 %vm9486_vm5, %v9627_v50 }
0x2129   :  { %v9701_v44 = vpop.f32.mrf.mxu0 }
0x212a   :  { %v11768_v6 = vmul.f32 -1.442695, %v9701_v44 }
0x212b   :  { %v13224_v52 = vpop.f32.mrf.mxu0 }
0x212c   :  { %13949 = vpow2.f32 %v11768_v6 }
0x2139   :  { %v13950_v46 = vpop.eup %13949 }
0x213a   :  { %v9708_v41 = vadd.f32 1.0, %v13950_v46 }
0x213c   :  { %13951 = vrcp.f32 %v9708_v41 }
0x2149   :  { %v13952_v7 = vpop.eup %13951 }
0x214a   :  { %9712 = vst.msk [vmem:[#allocation2] sm:$0x1] %vm9711_vm6, %v13952_v7 }
0x214b   :  { %13964 = shalt.err (!%p13961_p4)
}
0x214c   :  { %9722 = dma.vmem_to_hbm [thread:$0]  %s9720_s20, 16, %s16714_s12, [#allocation3]  }
0x214d   :  { %13973 = dma.done.wait [#allocation3], 16  }
0x214e   :  { %13974 = vsyncadd [#allocation3], 4294967280 }
0x214f   :  { %9726 = vsyncpa [#allocation3], 1 }

</bundles_post_ra>
